<compile_context>
chip_gen: v6e
topology: v6e:2x2x1
jax: 0.10.0
libtpu: 0.0.40
codegen_flags: <defaults>
</compile_context>

<pallas_src>
import jax
import jax.numpy as jnp
from jax import lax
from jax.experimental import pallas as pl
from jax.experimental.pallas import tpu as pltpu

NEG_SLOPE = 0.01     # nn.LeakyReLU default
BN_EPS = 1e-5        # nn.BatchNorm2d default

PHASES = ((0, 0), (0, 1), (1, 0), (1, 1))
# (output parity, input offset) -> transposed-conv kernel tap; (parity 0, offset 1)
# has no contributing tap (it gets zero weights in the phase weight matrix).
_KMAP = {(0, 0): 1, (1, 0): 2, (1, 1): 0}


def _fold_bn(conv_bias, gamma, beta, mean, var):
    scale = gamma / jnp.sqrt(var + BN_EPS)
    shift = (conv_bias - mean) * scale + beta
    return scale, shift


# ----------------------------- Pallas kernel ------------------------------ #
def _make_skip_block_kernel(H, W, Cin, C, Cs):
    P = H * W
    Ct = C + Cs
    f32 = jnp.float32
    bf16 = jnp.bfloat16

    def kernel(xp_ref, sk_ref, w1_ref, b1_ref, wup_ref, bup_ref, w2_ref, b2_ref,
               o_ref, xpad_ref, y1p_ref, comb_ref):
        # Up-cast the bf16 halo tile into f32 VMEM scratch once; all shifted-slice
        # reads below are cheap static-slice loads from scratch refs.
        xpad_ref[...] = xp_ref[0].astype(f32)

        # ---- stage 1: conv1 3x3 (pad=1, pre-applied) as 9 shifted-slice dots ----
        y1 = jnp.zeros((P, C), f32)
        for ky in range(3):
            for kx in range(3):
                sl = xpad_ref[ky:ky + H, kx:kx + W, :].reshape(P, Cin)
                y1 = y1 + jnp.dot(sl.astype(bf16), w1_ref[ky * 3 + kx],
                                  preferred_element_type=f32)
        y1 = y1 + b1_ref[...]
        y1 = jnp.where(y1 > 0, y1, NEG_SLOPE * y1)

        # ---- stage 2: ConvTranspose2d(3, s=2, p=1, op=1) via 4 sub-pixel phases --
        # y1 zero-extended bottom/right so every phase shares the same {0,1}^2
        # offset taps; absent taps carry zero weights inside wup.
        y1p_ref[...] = jnp.zeros_like(y1p_ref)
        y1p_ref[0:H, 0:W, :] = y1.reshape(H, W, C)
        up = jnp.zeros((P, 4 * C), f32)
        for d, (dy, dx) in enumerate(PHASES):
            sl = y1p_ref[dy:dy + H, dx:dx + W, :].reshape(P, C)
            up = up + jnp.dot(sl.astype(bf16), wup_ref[d],
                              preferred_element_type=f32)
        up = up + bup_ref[...]
        up = jnp.where(up > 0, up, NEG_SLOPE * up)

        # Scatter the 4 upsample phases and the (pre-split, pre-padded) skip phases
        # into one zero-bordered phase buffer; channel concat happens in VMEM only.
        comb_ref[...] = jnp.zeros_like(comb_ref)
        skv = sk_ref[0].astype(f32)                      # (4, H+2, W+2, Cs)
        for pi in range(4):
            comb_ref[pi, 1:1 + H, 1:1 + W, 0:C] = (
                up[:, pi * C:(pi + 1) * C].reshape(H, W, C))
            comb_ref[pi, :, :, C:Ct] = skv[pi]

        # ---- stage 3: conv2 3x3 over cat(upsampled, skip), polyphase form ----
        rows = []
        for qy, qx in PHASES:                            # output sub-pixel phase
            acc = jnp.zeros((P, C), f32)
            for ky in range(3):
                for kx in range(3):
                    ty, tx = qy + ky - 1, qx + kx - 1
                    py, dy = ty % 2, (ty - ty % 2) // 2
                    px, dx = tx % 2, (tx - tx % 2) // 2
                    sl = comb_ref[py * 2 + px,
                                  1 + dy:1 + dy + H,
                                  1 + dx:1 + dx + W, :].reshape(P, Ct)
                    acc = acc + jnp.dot(sl.astype(bf16), w2_ref[ky * 3 + kx],
                                        preferred_element_type=f32)
            rows.append(acc)
        y2 = jnp.concatenate(rows, axis=0)               # (4P, C), phase-major rows
        # Lane-dense epilogue + store: (C, 4P) puts 4*H*W (>= 128) on the lane axis.
        y2t = y2.T + b2_ref[...]
        o_ref[0] = jnp.where(y2t > 0, y2t, NEG_SLOPE * y2t)

    return kernel


# ------------------------------- wrapper ----------------------------------- #
def skip_block_forward(p, x_nchw, skip_nchw):
    if skip_nchw is None:
        # TODO(synk): skip=None path (requires in_channel == out_channel) not implemented.
        raise NotImplementedError("skip=None path is not implemented")

    N, Cin, H, W = x_nchw.shape
    C = p["conv1_w"].shape[0]                 # out_channel
    Cs = skip_nchw.shape[1]
    Ct = C + Cs
    P = H * W
    assert W % 8 == 0, "kernel assumes W is a multiple of the 8-sublane tile"
    assert p["conv2_w"].shape[1] == Ct, "conv2 expects cat(upsampled, skip) channels"

    bf16 = jnp.bfloat16
    f32 = jnp.float32

    # Activations: NHWC, zero-pad by 1 (conv halo), stream from HBM as bf16.
    x_nhwc = jnp.transpose(x_nchw, (0, 2, 3, 1))
    xp = jnp.pad(x_nhwc, ((0, 0), (1, 1), (1, 1), (0, 0))).astype(bf16)

    # Skip: NHWC, split into the 4 sub-pixel phases, zero-pad each phase by 1.
    skip_nhwc = jnp.transpose(skip_nchw, (0, 2, 3, 1))               # (N, 2H, 2W, Cs)
    skp = skip_nhwc.reshape(N, H, 2, W, 2, Cs).transpose(0, 2, 4, 1, 3, 5)
    skp = skp.reshape(N, 4, H, W, Cs)
    skp = jnp.pad(skp, ((0, 0), (0, 0), (1, 1), (1, 1), (0, 0))).astype(bf16)

    # Fold eval-mode BN into per-tap weight matrices (scale) and shift rows.
    s1, sh1 = _fold_bn(p["conv1_b"], p["bn1_g"], p["bn1_b"], p["bn1_m"], p["bn1_v"])
    w1 = (jnp.transpose(p["conv1_w"], (2, 3, 1, 0)).reshape(9, Cin, C)
          * s1).astype(bf16)                                          # (9, Cin, C)
    b1 = sh1.reshape(1, C).astype(f32)

    sup, shup = _fold_bn(p["up_b"], p["upbn_g"], p["upbn_b"], p["upbn_m"], p["upbn_v"])
    wt = p["up_w"]                           # ConvTranspose2d weight (in, out, kh, kw)
    tap_blocks = []
    for dy, dx in PHASES:                    # input offset
        phase_cols = []
        for py, px in PHASES:                # output sub-pixel phase
            ky = _KMAP.get((py, dy))
            kx = _KMAP.get((px, dx))
            if ky is None or kx is None:
                phase_cols.append(jnp.zeros((C, C), f32))
            else:
                phase_cols.append(wt[:, :, ky, kx] * sup[None, :])
        tap_blocks.append(jnp.concatenate(phase_cols, axis=1))        # (C, 4C)
    wup = jnp.stack(tap_blocks, axis=0).astype(bf16)                  # (4, C, 4C)
    bup = jnp.tile(shup, 4).reshape(1, 4 * C).astype(f32)

    s2, sh2 = _fold_bn(p["conv2_b"], p["bn2_g"], p["bn2_b"], p["bn2_m"], p["bn2_v"])
    w2 = (jnp.transpose(p["conv2_w"], (2, 3, 1, 0)).reshape(9, Ct, C)
          * s2).astype(bf16)                                          # (9, Ct, C)
    b2 = sh2.reshape(C, 1).astype(f32)

    kernel = _make_skip_block_kernel(H, W, Cin, C, Cs)

    flops = N * (2 * P * 9 * Cin * C + 2 * P * (4 * C) * (4 * C)
                 + 2 * 4 * P * 9 * Ct * C)
    bytes_accessed = (2 * (xp.size + skp.size + w1.size + wup.size + w2.size)
                      + 4 * (b1.size + bup.size + b2.size)
                      + 4 * N * C * 4 * P)

    out_flat = pl.pallas_call(
        kernel,
        out_shape=jax.ShapeDtypeStruct((N, C, 4 * P), f32),
        grid_spec=pltpu.PrefetchScalarGridSpec(
            num_scalar_prefetch=0,
            grid=(N,),
            in_specs=[
                pl.BlockSpec((1, H + 2, W + 2, Cin), lambda n: (n, 0, 0, 0)),
                pl.BlockSpec((1, 4, H + 2, W + 2, Cs), lambda n: (n, 0, 0, 0, 0)),
                pl.BlockSpec((9, Cin, C), lambda n: (0, 0, 0)),
                pl.BlockSpec((1, C), lambda n: (0, 0)),
                pl.BlockSpec((4, C, 4 * C), lambda n: (0, 0, 0)),
                pl.BlockSpec((1, 4 * C), lambda n: (0, 0)),
                pl.BlockSpec((9, Ct, C), lambda n: (0, 0, 0)),
                pl.BlockSpec((C, 1), lambda n: (0, 0)),
            ],
            out_specs=pl.BlockSpec((1, C, 4 * P), lambda n: (n, 0, 0)),
            scratch_shapes=[
                pltpu.VMEM((H + 2, W + 2, Cin), f32),     # padded conv1 input (f32)
                pltpu.VMEM((H + 1, W + 1, C), f32),       # y1, zero-extended bottom/right
                pltpu.VMEM((4, H + 2, W + 2, Ct), f32),   # phase buffer (up ++ skip)
            ],
        ),
        compiler_params=pltpu.CompilerParams(
            dimension_semantics=("parallel",),
            vmem_limit_bytes=32 * 1024 * 1024,
        ),
        cost_estimate=pl.CostEstimate(
            flops=flops, transcendentals=0, bytes_accessed=bytes_accessed),
    )(xp, skp, w1, b1, wup, bup, w2, b2)

    # Un-interleave the 4 output phases: (N, C, [qy, qx, a, b]) -> (N, C, 2H, 2W).
    out = out_flat.reshape(N, C, 2, 2, H, W).transpose(0, 1, 4, 2, 5, 3)
    return out.reshape(N, C, 2 * H, 2 * W)


# ------------------------- pure-JAX f32 reference -------------------------- #
def reference_forward(p, x_nchw, skip_nchw):
    dn = ("NCHW", "OIHW", "NCHW")

    def bn_lrelu(y, g, b, m, v):
        y = (y - m[None, :, None, None]) * (g / jnp.sqrt(v + BN_EPS))[None, :, None, None]
        y = y + b[None, :, None, None]
        return jnp.where(y > 0, y, NEG_SLOPE * y)

    y = lax.conv_general_dilated(x_nchw, p["conv1_w"], (1, 1),
                                 ((1, 1), (1, 1)), dimension_numbers=dn)
    y = y + p["conv1_b"][None, :, None, None]
    y = bn_lrelu(y, p["bn1_g"], p["bn1_b"], p["bn1_m"], p["bn1_v"])

    w_eq = jnp.transpose(p["up_w"], (1, 0, 2, 3))[:, :, ::-1, ::-1]
    y = lax.conv_general_dilated(y, w_eq, (1, 1), ((1, 2), (1, 2)),
                                 lhs_dilation=(2, 2), dimension_numbers=dn)
    y = y + p["up_b"][None, :, None, None]
    y = bn_lrelu(y, p["upbn_g"], p["upbn_b"], p["upbn_m"], p["upbn_v"])

    if skip_nchw is not None:
        y = jnp.concatenate([y, skip_nchw], axis=1)

    y = lax.conv_general_dilated(y, p["conv2_w"], (1, 1),
                                 ((1, 1), (1, 1)), dimension_numbers=dn)
    y = y + p["conv2_b"][None, :, None, None]
    y = bn_lrelu(y, p["bn2_g"], p["bn2_b"], p["bn2_m"], p["bn2_v"])
    return y


# --------------------------------- main ------------------------------------ #
def init_params(key, in_channel, out_channel):
    ks = jax.random.split(key, 18)

    def u(k, shape, s=0.2):
        return jax.random.uniform(k, shape, jnp.float32, -s, s)

    p = {}
    p["conv1_w"] = u(ks[0], (out_channel, in_channel, 3, 3))
    p["conv1_b"] = u(ks[1], (out_channel,))
    p["bn1_g"] = 1.0 + u(ks[2], (out_channel,))
    p["bn1_b"] = u(ks[3], (out_channel,))
    p["bn1_m"] = u(ks[4], (out_channel,))
    p["bn1_v"] = 1.0 + u(ks[5], (out_channel,))
    # UpSample: ConvTranspose2d weight shape (in, out, kH, kW)
    p["up_w"] = u(ks[6], (out_channel, out_channel, 3, 3))
    p["up_b"] = u(ks[7], (out_channel,))
    p["upbn_g"] = 1.0 + u(ks[8], (out_channel,))
    p["upbn_b"] = u(ks[9], (out_channel,))
    p["upbn_m"] = u(ks[10], (out_channel,))
    p["upbn_v"] = 1.0 + u(ks[11], (out_channel,))
    p["conv2_w"] = u(ks[12], (out_channel, in_channel, 3, 3))
    p["conv2_b"] = u(ks[13], (out_channel,))
    p["bn2_g"] = 1.0 + u(ks[14], (out_channel,))
    p["bn2_b"] = u(ks[15], (out_channel,))
    p["bn2_m"] = u(ks[16], (out_channel,))
    p["bn2_v"] = 1.0 + u(ks[17], (out_channel,))
    return p


if __name__ == "__main__":
    key = jax.random.PRNGKey(0)
    in_channel, out_channel = 8, 4
    batch, H, W = 2, 8, 8

    kx, ks, kp = jax.random.split(key, 3)
    params = init_params(kp, in_channel, out_channel)

    # x: NCHW input to conv1; skip: NCHW, spatial doubled, channels = in - out
    x = jax.random.normal(kx, (batch, in_channel, H, W), jnp.float32)
    skip = jax.random.normal(ks, (batch, in_channel - out_channel, 2 * H, 2 * W),
                             jnp.float32)

    fwd = jax.jit(skip_block_forward)
    out = jax.block_until_ready(fwd(params, x, skip))
    ref = jax.block_until_ready(reference_forward(params, x, skip))

    assert out.shape == (batch, out_channel, 2 * H, 2 * W), out.shape
    err = float(jnp.max(jnp.abs(out - ref)))
    # bf16 MXU inputs with f32 accumulation vs. a pure-f32 reference.
    assert jnp.allclose(out, ref, atol=5e-2, rtol=5e-2), err
    print("KERNEL_OK")
</pallas_src>

<mosaic_0001>
module attributes {stable_mosaic.version = 11 : i64} {
  func.func @kernel(%arg0: i32, %arg1: memref<1x10x10x8xbf16, #tpu.memory_space<vmem>>, %arg2: memref<1x4x10x10x4xbf16, #tpu.memory_space<vmem>>, %arg3: memref<9x8x4xbf16, #tpu.memory_space<vmem>>, %arg4: memref<1x4xf32, #tpu.memory_space<vmem>>, %arg5: memref<4x4x16xbf16, #tpu.memory_space<vmem>>, %arg6: memref<1x16xf32, #tpu.memory_space<vmem>>, %arg7: memref<9x8x4xbf16, #tpu.memory_space<vmem>>, %arg8: memref<4x1xf32, #tpu.memory_space<vmem>>, %arg9: memref<1x4x256xf32, #tpu.memory_space<vmem>>, %arg10: memref<10x10x8xf32, #tpu.memory_space<vmem>>, %arg11: memref<9x9x4xf32, #tpu.memory_space<vmem>>, %arg12: memref<4x10x10x8xf32, #tpu.memory_space<vmem>>) attributes {dimension_semantics = [#tpu.dimension_semantics<parallel>], iteration_bounds = array<i64: 2>, scalar_prefetch = 0 : i64, scratch_operands = 3 : i64, tpu.core_type = #tpu.core_type<tc>, window_params = [{transform_indices = @transform_0, window_bounds = array<i64: 1, 10, 10, 8>}, {transform_indices = @transform_1, window_bounds = array<i64: 1, 4, 10, 10, 4>}, {pipeline_mode = #tpu.pipeline_mode<synchronous>, transform_indices = @transform_2, window_bounds = array<i64: 9, 8, 4>}, {pipeline_mode = #tpu.pipeline_mode<synchronous>, transform_indices = @transform_3, window_bounds = array<i64: 1, 4>}, {pipeline_mode = #tpu.pipeline_mode<synchronous>, transform_indices = @transform_4, window_bounds = array<i64: 4, 4, 16>}, {pipeline_mode = #tpu.pipeline_mode<synchronous>, transform_indices = @transform_5, window_bounds = array<i64: 1, 16>}, {pipeline_mode = #tpu.pipeline_mode<synchronous>, transform_indices = @transform_6, window_bounds = array<i64: 9, 8, 4>}, {pipeline_mode = #tpu.pipeline_mode<synchronous>, transform_indices = @transform_7, window_bounds = array<i64: 4, 1>}, {transform_indices = @transform_8, window_bounds = array<i64: 1, 4, 256>}]} {
    %c0 = arith.constant 0 : index
    %c0_0 = arith.constant 0 : index
    %c0_1 = arith.constant 0 : index
    %c0_2 = arith.constant 0 : index
    %0 = vector.load %arg1[%c0, %c0_0, %c0_1, %c0_2] : memref<1x10x10x8xbf16, #tpu.memory_space<vmem>>, vector<1x10x10x8xbf16>
    %1 = vector.shape_cast %0 : vector<1x10x10x8xbf16> to vector<10x10x8xbf16>
    %2 = arith.extf %1 : vector<10x10x8xbf16> to vector<10x10x8xf32>
    %c0_3 = arith.constant 0 : index
    %c0_4 = arith.constant 0 : index
    %c0_5 = arith.constant 0 : index
    %3 = vector.load %arg10[%c0_3, %c0_4, %c0_5] : memref<10x10x8xf32, #tpu.memory_space<vmem>>, vector<10x10x8xf32>
    tpu.vector_store %arg10[%c0_3, %c0_4, %c0_5], %2 {strides = array<i32>} : memref<10x10x8xf32, #tpu.memory_space<vmem>>, vector<10x10x8xf32>,
    %cst = arith.constant 0.000000e+00 : f32
    %4 = vector.broadcast %cst : f32 to vector<64x4xf32>
    %c0_6 = arith.constant 0 : index
    %c0_7 = arith.constant 0 : index
    %c0_8 = arith.constant 0 : index
    %5 = vector.load %arg10[%c0_6, %c0_7, %c0_8] : memref<10x10x8xf32, #tpu.memory_space<vmem>>, vector<8x8x8xf32>
    %6 = vector.shape_cast %5 : vector<8x8x8xf32> to vector<64x8xf32>
    %7 = arith.truncf %6 : vector<64x8xf32> to vector<64x8xbf16>
    %c0_9 = arith.constant 0 : index
    %c0_10 = arith.constant 0 : index
    %c0_11 = arith.constant 0 : index
    %8 = vector.load %arg3[%c0_9, %c0_10, %c0_11] : memref<9x8x4xbf16, #tpu.memory_space<vmem>>, vector<1x8x4xbf16>
    %9 = vector.shape_cast %8 : vector<1x8x4xbf16> to vector<8x4xbf16>
    %cst_12 = arith.constant dense<0.000000e+00> : vector<64x4xf32>
    %10 = tpu.matmul %7, %9, %cst_12 {dimension_numbers = #tpu.dot_dimension_numbers<[1], [0], [0], [1], [0, 0, 1, 1], [], []>} : vector<64x8xbf16>, vector<8x4xbf16>, vector<64x4xf32> -> vector<64x4xf32>
    %11 = arith.addf %4, %10 : vector<64x4xf32>
    %c0_13 = arith.constant 0 : index
    %c1 = arith.constant 1 : index
    %c0_14 = arith.constant 0 : index
    %12 = vector.load %arg10[%c0_13, %c1, %c0_14] : memref<10x10x8xf32, #tpu.memory_space<vmem>>, vector<8x8x8xf32>
    %13 = vector.shape_cast %12 : vector<8x8x8xf32> to vector<64x8xf32>
    %14 = arith.truncf %13 : vector<64x8xf32> to vector<64x8xbf16>
    %c1_15 = arith.constant 1 : index
    %c0_16 = arith.constant 0 : index
    %c0_17 = arith.constant 0 : index
    %15 = vector.load %arg3[%c1_15, %c0_16, %c0_17] : memref<9x8x4xbf16, #tpu.memory_space<vmem>>, vector<1x8x4xbf16>
    %16 = vector.shape_cast %15 : vector<1x8x4xbf16> to vector<8x4xbf16>
    %cst_18 = arith.constant dense<0.000000e+00> : vector<64x4xf32>
    %17 = tpu.matmul %14, %16, %cst_18 {dimension_numbers = #tpu.dot_dimension_numbers<[1], [0], [0], [1], [0, 0, 1, 1], [], []>} : vector<64x8xbf16>, vector<8x4xbf16>, vector<64x4xf32> -> vector<64x4xf32>
    %18 = arith.addf %11, %17 : vector<64x4xf32>
    %c0_19 = arith.constant 0 : index
    %c2 = arith.constant 2 : index
    %c0_20 = arith.constant 0 : index
    %19 = vector.load %arg10[%c0_19, %c2, %c0_20] : memref<10x10x8xf32, #tpu.memory_space<vmem>>, vector<8x8x8xf32>
    %20 = vector.shape_cast %19 : vector<8x8x8xf32> to vector<64x8xf32>
    %21 = arith.truncf %20 : vector<64x8xf32> to vector<64x8xbf16>
    %c2_21 = arith.constant 2 : index
    %c0_22 = arith.constant 0 : index
    %c0_23 = arith.constant 0 : index
    %22 = vector.load %arg3[%c2_21, %c0_22, %c0_23] : memref<9x8x4xbf16, #tpu.memory_space<vmem>>, vector<1x8x4xbf16>
    %23 = vector.shape_cast %22 : vector<1x8x4xbf16> to vector<8x4xbf16>
    %cst_24 = arith.constant dense<0.000000e+00> : vector<64x4xf32>
    %24 = tpu.matmul %21, %23, %cst_24 {dimension_numbers = #tpu.dot_dimension_numbers<[1], [0], [0], [1], [0, 0, 1, 1], [], []>} : vector<64x8xbf16>, vector<8x4xbf16>, vector<64x4xf32> -> vector<64x4xf32>
    %25 = arith.addf %18, %24 : vector<64x4xf32>
    %c1_25 = arith.constant 1 : index
    %c0_26 = arith.constant 0 : index
    %c0_27 = arith.constant 0 : index
    %26 = vector.load %arg10[%c1_25, %c0_26, %c0_27] : memref<10x10x8xf32, #tpu.memory_space<vmem>>, vector<8x8x8xf32>
    %27 = vector.shape_cast %26 : vector<8x8x8xf32> to vector<64x8xf32>
    %28 = arith.truncf %27 : vector<64x8xf32> to vector<64x8xbf16>
    %c3 = arith.constant 3 : index
    %c0_28 = arith.constant 0 : index
    %c0_29 = arith.constant 0 : index
    %29 = vector.load %arg3[%c3, %c0_28, %c0_29] : memref<9x8x4xbf16, #tpu.memory_space<vmem>>, vector<1x8x4xbf16>
    %30 = vector.shape_cast %29 : vector<1x8x4xbf16> to vector<8x4xbf16>
    %cst_30 = arith.constant dense<0.000000e+00> : vector<64x4xf32>
    %31 = tpu.matmul %28, %30, %cst_30 {dimension_numbers = #tpu.dot_dimension_numbers<[1], [0], [0], [1], [0, 0, 1, 1], [], []>} : vector<64x8xbf16>, vector<8x4xbf16>, vector<64x4xf32> -> vector<64x4xf32>
    %32 = arith.addf %25, %31 : vector<64x4xf32>
    %c1_31 = arith.constant 1 : index
    %c1_32 = arith.constant 1 : index
    %c0_33 = arith.constant 0 : index
    %33 = vector.load %arg10[%c1_31, %c1_32, %c0_33] : memref<10x10x8xf32, #tpu.memory_space<vmem>>, vector<8x8x8xf32>
    %34 = vector.shape_cast %33 : vector<8x8x8xf32> to vector<64x8xf32>
    %35 = arith.truncf %34 : vector<64x8xf32> to vector<64x8xbf16>
    %c4 = arith.constant 4 : index
    %c0_34 = arith.constant 0 : index
    %c0_35 = arith.constant 0 : index
    %36 = vector.load %arg3[%c4, %c0_34, %c0_35] : memref<9x8x4xbf16, #tpu.memory_space<vmem>>, vector<1x8x4xbf16>
    %37 = vector.shape_cast %36 : vector<1x8x4xbf16> to vector<8x4xbf16>
    %cst_36 = arith.constant dense<0.000000e+00> : vector<64x4xf32>
    %38 = tpu.matmul %35, %37, %cst_36 {dimension_numbers = #tpu.dot_dimension_numbers<[1], [0], [0], [1], [0, 0, 1, 1], [], []>} : vector<64x8xbf16>, vector<8x4xbf16>, vector<64x4xf32> -> vector<64x4xf32>
    %39 = arith.addf %32, %38 : vector<64x4xf32>
    %c1_37 = arith.constant 1 : index
    %c2_38 = arith.constant 2 : index
    %c0_39 = arith.constant 0 : index
    %40 = vector.load %arg10[%c1_37, %c2_38, %c0_39] : memref<10x10x8xf32, #tpu.memory_space<vmem>>, vector<8x8x8xf32>
    %41 = vector.shape_cast %40 : vector<8x8x8xf32> to vector<64x8xf32>
    %42 = arith.truncf %41 : vector<64x8xf32> to vector<64x8xbf16>
    %c5 = arith.constant 5 : index
    %c0_40 = arith.constant 0 : index
    %c0_41 = arith.constant 0 : index
    %43 = vector.load %arg3[%c5, %c0_40, %c0_41] : memref<9x8x4xbf16, #tpu.memory_space<vmem>>, vector<1x8x4xbf16>
    %44 = vector.shape_cast %43 : vector<1x8x4xbf16> to vector<8x4xbf16>
    %cst_42 = arith.constant dense<0.000000e+00> : vector<64x4xf32>
    %45 = tpu.matmul %42, %44, %cst_42 {dimension_numbers = #tpu.dot_dimension_numbers<[1], [0], [0], [1], [0, 0, 1, 1], [], []>} : vector<64x8xbf16>, vector<8x4xbf16>, vector<64x4xf32> -> vector<64x4xf32>
    %46 = arith.addf %39, %45 : vector<64x4xf32>
    %c2_43 = arith.constant 2 : index
    %c0_44 = arith.constant 0 : index
    %c0_45 = arith.constant 0 : index
    %47 = vector.load %arg10[%c2_43, %c0_44, %c0_45] : memref<10x10x8xf32, #tpu.memory_space<vmem>>, vector<8x8x8xf32>
    %48 = vector.shape_cast %47 : vector<8x8x8xf32> to vector<64x8xf32>
    %49 = arith.truncf %48 : vector<64x8xf32> to vector<64x8xbf16>
    %c6 = arith.constant 6 : index
    %c0_46 = arith.constant 0 : index
    %c0_47 = arith.constant 0 : index
    %50 = vector.load %arg3[%c6, %c0_46, %c0_47] : memref<9x8x4xbf16, #tpu.memory_space<vmem>>, vector<1x8x4xbf16>
    %51 = vector.shape_cast %50 : vector<1x8x4xbf16> to vector<8x4xbf16>
    %cst_48 = arith.constant dense<0.000000e+00> : vector<64x4xf32>
    %52 = tpu.matmul %49, %51, %cst_48 {dimension_numbers = #tpu.dot_dimension_numbers<[1], [0], [0], [1], [0, 0, 1, 1], [], []>} : vector<64x8xbf16>, vector<8x4xbf16>, vector<64x4xf32> -> vector<64x4xf32>
    %53 = arith.addf %46, %52 : vector<64x4xf32>
    %c2_49 = arith.constant 2 : index
    %c1_50 = arith.constant 1 : index
    %c0_51 = arith.constant 0 : index
    %54 = vector.load %arg10[%c2_49, %c1_50, %c0_51] : memref<10x10x8xf32, #tpu.memory_space<vmem>>, vector<8x8x8xf32>
    %55 = vector.shape_cast %54 : vector<8x8x8xf32> to vector<64x8xf32>
    %56 = arith.truncf %55 : vector<64x8xf32> to vector<64x8xbf16>
    %c7 = arith.constant 7 : index
    %c0_52 = arith.constant 0 : index
    %c0_53 = arith.constant 0 : index
    %57 = vector.load %arg3[%c7, %c0_52, %c0_53] : memref<9x8x4xbf16, #tpu.memory_space<vmem>>, vector<1x8x4xbf16>
    %58 = vector.shape_cast %57 : vector<1x8x4xbf16> to vector<8x4xbf16>
    %cst_54 = arith.constant dense<0.000000e+00> : vector<64x4xf32>
    %59 = tpu.matmul %56, %58, %cst_54 {dimension_numbers = #tpu.dot_dimension_numbers<[1], [0], [0], [1], [0, 0, 1, 1], [], []>} : vector<64x8xbf16>, vector<8x4xbf16>, vector<64x4xf32> -> vector<64x4xf32>
    %60 = arith.addf %53, %59 : vector<64x4xf32>
    %c2_55 = arith.constant 2 : index
    %c2_56 = arith.constant 2 : index
    %c0_57 = arith.constant 0 : index
    %61 = vector.load %arg10[%c2_55, %c2_56, %c0_57] : memref<10x10x8xf32, #tpu.memory_space<vmem>>, vector<8x8x8xf32>
    %62 = vector.shape_cast %61 : vector<8x8x8xf32> to vector<64x8xf32>
    %63 = arith.truncf %62 : vector<64x8xf32> to vector<64x8xbf16>
    %c8 = arith.constant 8 : index
    %c0_58 = arith.constant 0 : index
    %c0_59 = arith.constant 0 : index
    %64 = vector.load %arg3[%c8, %c0_58, %c0_59] : memref<9x8x4xbf16, #tpu.memory_space<vmem>>, vector<1x8x4xbf16>
    %65 = vector.shape_cast %64 : vector<1x8x4xbf16> to vector<8x4xbf16>
    %cst_60 = arith.constant dense<0.000000e+00> : vector<64x4xf32>
    %66 = tpu.matmul %63, %65, %cst_60 {dimension_numbers = #tpu.dot_dimension_numbers<[1], [0], [0], [1], [0, 0, 1, 1], [], []>} : vector<64x8xbf16>, vector<8x4xbf16>, vector<64x4xf32> -> vector<64x4xf32>
    %67 = arith.addf %60, %66 : vector<64x4xf32>
    %c0_61 = arith.constant 0 : index
    %c0_62 = arith.constant 0 : index
    %68 = vector.load %arg4[%c0_61, %c0_62] : memref<1x4xf32, #tpu.memory_space<vmem>>, vector<1x4xf32>
    %69 = vector.broadcast %68 : vector<1x4xf32> to vector<64x4xf32>
    %70 = arith.addf %67, %69 : vector<64x4xf32>
    %cst_63 = arith.constant 0.000000e+00 : f32
    %71 = vector.broadcast %cst_63 : f32 to vector<64x4xf32>
    %72 = arith.cmpf ogt, %70, %71 : vector<64x4xf32>
    %cst_64 = arith.constant 0.00999999977 : f32
    %73 = vector.broadcast %cst_64 : f32 to vector<64x4xf32>
    %74 = arith.mulf %73, %70 : vector<64x4xf32>
    %75 = arith.select %72, %70, %74 : vector<64x4xi1>, vector<64x4xf32>
    %cst_65 = arith.constant 0.000000e+00 : f32
    %76 = vector.broadcast %cst_65 : f32 to vector<9x9x4xf32>
    %c0_66 = arith.constant 0 : index
    %c0_67 = arith.constant 0 : index
    %c0_68 = arith.constant 0 : index
    %77 = vector.load %arg11[%c0_66, %c0_67, %c0_68] : memref<9x9x4xf32, #tpu.memory_space<vmem>>, vector<9x9x4xf32>
    tpu.vector_store %arg11[%c0_66, %c0_67, %c0_68], %76 {strides = array<i32>} : memref<9x9x4xf32, #tpu.memory_space<vmem>>, vector<9x9x4xf32>,
    %78 = vector.shape_cast %75 : vector<64x4xf32> to vector<8x8x4xf32>
    %c0_69 = arith.constant 0 : index
    %c0_70 = arith.constant 0 : index
    %c0_71 = arith.constant 0 : index
    %79 = vector.load %arg11[%c0_69, %c0_70, %c0_71] : memref<9x9x4xf32, #tpu.memory_space<vmem>>, vector<8x8x4xf32>
    tpu.vector_store %arg11[%c0_69, %c0_70, %c0_71], %78 {strides = array<i32>} : memref<9x9x4xf32, #tpu.memory_space<vmem>>, vector<8x8x4xf32>,
    %cst_72 = arith.constant 0.000000e+00 : f32
    %80 = vector.broadcast %cst_72 : f32 to vector<64x16xf32>
    %c0_73 = arith.constant 0 : index
    %c0_74 = arith.constant 0 : index
    %c0_75 = arith.constant 0 : index
    %81 = vector.load %arg11[%c0_73, %c0_74, %c0_75] : memref<9x9x4xf32, #tpu.memory_space<vmem>>, vector<8x8x4xf32>
    %82 = vector.shape_cast %81 : vector<8x8x4xf32> to vector<64x4xf32>
    %83 = arith.truncf %82 : vector<64x4xf32> to vector<64x4xbf16>
    %c0_76 = arith.constant 0 : index
    %c0_77 = arith.constant 0 : index
    %c0_78 = arith.constant 0 : index
    %84 = vector.load %arg5[%c0_76, %c0_77, %c0_78] : memref<4x4x16xbf16, #tpu.memory_space<vmem>>, vector<1x4x16xbf16>
    %85 = vector.shape_cast %84 : vector<1x4x16xbf16> to vector<4x16xbf16>
    %cst_79 = arith.constant dense<0.000000e+00> : vector<64x16xf32>
    %86 = tpu.matmul %83, %85, %cst_79 {dimension_numbers = #tpu.dot_dimension_numbers<[1], [0], [0], [1], [0, 0, 1, 1], [], []>} : vector<64x4xbf16>, vector<4x16xbf16>, vector<64x16xf32> -> vector<64x16xf32>
    %87 = arith.addf %80, %86 : vector<64x16xf32>
    %c0_80 = arith.constant 0 : index
    %c1_81 = arith.constant 1 : index
    %c0_82 = arith.constant 0 : index
    %88 = vector.load %arg11[%c0_80, %c1_81, %c0_82] : memref<9x9x4xf32, #tpu.memory_space<vmem>>, vector<8x8x4xf32>
    %89 = vector.shape_cast %88 : vector<8x8x4xf32> to vector<64x4xf32>
    %90 = arith.truncf %89 : vector<64x4xf32> to vector<64x4xbf16>
    %c1_83 = arith.constant 1 : index
    %c0_84 = arith.constant 0 : index
    %c0_85 = arith.constant 0 : index
    %91 = vector.load %arg5[%c1_83, %c0_84, %c0_85] : memref<4x4x16xbf16, #tpu.memory_space<vmem>>, vector<1x4x16xbf16>
    %92 = vector.shape_cast %91 : vector<1x4x16xbf16> to vector<4x16xbf16>
    %cst_86 = arith.constant dense<0.000000e+00> : vector<64x16xf32>
    %93 = tpu.matmul %90, %92, %cst_86 {dimension_numbers = #tpu.dot_dimension_numbers<[1], [0], [0], [1], [0, 0, 1, 1], [], []>} : vector<64x4xbf16>, vector<4x16xbf16>, vector<64x16xf32> -> vector<64x16xf32>
    %94 = arith.addf %87, %93 : vector<64x16xf32>
    %c1_87 = arith.constant 1 : index
    %c0_88 = arith.constant 0 : index
    %c0_89 = arith.constant 0 : index
    %95 = vector.load %arg11[%c1_87, %c0_88, %c0_89] : memref<9x9x4xf32, #tpu.memory_space<vmem>>, vector<8x8x4xf32>
    %96 = vector.shape_cast %95 : vector<8x8x4xf32> to vector<64x4xf32>
    %97 = arith.truncf %96 : vector<64x4xf32> to vector<64x4xbf16>
    %c2_90 = arith.constant 2 : index
    %c0_91 = arith.constant 0 : index
    %c0_92 = arith.constant 0 : index
    %98 = vector.load %arg5[%c2_90, %c0_91, %c0_92] : memref<4x4x16xbf16, #tpu.memory_space<vmem>>, vector<1x4x16xbf16>
    %99 = vector.shape_cast %98 : vector<1x4x16xbf16> to vector<4x16xbf16>
    %cst_93 = arith.constant dense<0.000000e+00> : vector<64x16xf32>
    %100 = tpu.matmul %97, %99, %cst_93 {dimension_numbers = #tpu.dot_dimension_numbers<[1], [0], [0], [1], [0, 0, 1, 1], [], []>} : vector<64x4xbf16>, vector<4x16xbf16>, vector<64x16xf32> -> vector<64x16xf32>
    %101 = arith.addf %94, %100 : vector<64x16xf32>
    %c1_94 = arith.constant 1 : index
    %c1_95 = arith.constant 1 : index
    %c0_96 = arith.constant 0 : index
    %102 = vector.load %arg11[%c1_94, %c1_95, %c0_96] : memref<9x9x4xf32, #tpu.memory_space<vmem>>, vector<8x8x4xf32>
    %103 = vector.shape_cast %102 : vector<8x8x4xf32> to vector<64x4xf32>
    %104 = arith.truncf %103 : vector<64x4xf32> to vector<64x4xbf16>
    %c3_97 = arith.constant 3 : index
    %c0_98 = arith.constant 0 : index
    %c0_99 = arith.constant 0 : index
    %105 = vector.load %arg5[%c3_97, %c0_98, %c0_99] : memref<4x4x16xbf16, #tpu.memory_space<vmem>>, vector<1x4x16xbf16>
    %106 = vector.shape_cast %105 : vector<1x4x16xbf16> to vector<4x16xbf16>
    %cst_100 = arith.constant dense<0.000000e+00> : vector<64x16xf32>
    %107 = tpu.matmul %104, %106, %cst_100 {dimension_numbers = #tpu.dot_dimension_numbers<[1], [0], [0], [1], [0, 0, 1, 1], [], []>} : vector<64x4xbf16>, vector<4x16xbf16>, vector<64x16xf32> -> vector<64x16xf32>
    %108 = arith.addf %101, %107 : vector<64x16xf32>
    %c0_101 = arith.constant 0 : index
    %c0_102 = arith.constant 0 : index
    %109 = vector.load %arg6[%c0_101, %c0_102] : memref<1x16xf32, #tpu.memory_space<vmem>>, vector<1x16xf32>
    %110 = vector.broadcast %109 : vector<1x16xf32> to vector<64x16xf32>
    %111 = arith.addf %108, %110 : vector<64x16xf32>
    %cst_103 = arith.constant 0.000000e+00 : f32
    %112 = vector.broadcast %cst_103 : f32 to vector<64x16xf32>
    %113 = arith.cmpf ogt, %111, %112 : vector<64x16xf32>
    %cst_104 = arith.constant 0.00999999977 : f32
    %114 = vector.broadcast %cst_104 : f32 to vector<64x16xf32>
    %115 = arith.mulf %114, %111 : vector<64x16xf32>
    %116 = arith.select %113, %111, %115 : vector<64x16xi1>, vector<64x16xf32>
    %cst_105 = arith.constant 0.000000e+00 : f32
    %117 = vector.broadcast %cst_105 : f32 to vector<4x10x10x8xf32>
    %c0_106 = arith.constant 0 : index
    %c0_107 = arith.constant 0 : index
    %c0_108 = arith.constant 0 : index
    %c0_109 = arith.constant 0 : index
    %118 = vector.load %arg12[%c0_106, %c0_107, %c0_108, %c0_109] : memref<4x10x10x8xf32, #tpu.memory_space<vmem>>, vector<4x10x10x8xf32>
    tpu.vector_store %arg12[%c0_106, %c0_107, %c0_108, %c0_109], %117 {strides = array<i32>} : memref<4x10x10x8xf32, #tpu.memory_space<vmem>>, vector<4x10x10x8xf32>,
    %c0_110 = arith.constant 0 : index
    %c0_111 = arith.constant 0 : index
    %c0_112 = arith.constant 0 : index
    %c0_113 = arith.constant 0 : index
    %c0_114 = arith.constant 0 : index
    %119 = vector.load %arg2[%c0_110, %c0_111, %c0_112, %c0_113, %c0_114] : memref<1x4x10x10x4xbf16, #tpu.memory_space<vmem>>, vector<1x4x10x10x4xbf16>
    %120 = vector.shape_cast %119 : vector<1x4x10x10x4xbf16> to vector<4x10x10x4xbf16>
    %121 = arith.extf %120 : vector<4x10x10x4xbf16> to vector<4x10x10x4xf32>
    %122 = vector.extract_strided_slice %116 {offsets = [0, 0], sizes = [64, 4], strides = [1, 1]} : vector<64x16xf32> to vector<64x4xf32>
    %123 = vector.shape_cast %122 : vector<64x4xf32> to vector<8x8x4xf32>
    %c0_115 = arith.constant 0 : index
    %c1_116 = arith.constant 1 : index
    %c1_117 = arith.constant 1 : index
    %c0_118 = arith.constant 0 : index
    %124 = vector.load %arg12[%c0_115, %c1_116, %c1_117, %c0_118] : memref<4x10x10x8xf32, #tpu.memory_space<vmem>>, vector<1x8x8x4xf32>
    %125 = vector.shape_cast %124 : vector<1x8x8x4xf32> to vector<8x8x4xf32>
    %126 = vector.shape_cast %123 : vector<8x8x4xf32> to vector<1x8x8x4xf32>
    tpu.vector_store %arg12[%c0_115, %c1_116, %c1_117, %c0_118], %126 {strides = array<i32>} : memref<4x10x10x8xf32, #tpu.memory_space<vmem>>, vector<1x8x8x4xf32>,
    %127 = vector.extract_strided_slice %121 {offsets = [0, 0, 0, 0], sizes = [1, 10, 10, 4], strides = [1, 1, 1, 1]} : vector<4x10x10x4xf32> to vector<1x10x10x4xf32>
    %128 = vector.shape_cast %127 : vector<1x10x10x4xf32> to vector<10x10x4xf32>
    %c0_119 = arith.constant 0 : index
    %c0_120 = arith.constant 0 : index
    %c0_121 = arith.constant 0 : index
    %c4_122 = arith.constant 4 : index
    %129 = vector.load %arg12[%c0_119, %c0_120, %c0_121, %c4_122] : memref<4x10x10x8xf32, #tpu.memory_space<vmem>>, vector<1x10x10x4xf32>
    %130 = vector.shape_cast %129 : vector<1x10x10x4xf32> to vector<10x10x4xf32>
    %131 = vector.shape_cast %128 : vector<10x10x4xf32> to vector<1x10x10x4xf32>
    tpu.vector_store %arg12[%c0_119, %c0_120, %c0_121, %c4_122], %131 {strides = array<i32>} : memref<4x10x10x8xf32, #tpu.memory_space<vmem>>, vector<1x10x10x4xf32>,
    %132 = vector.extract_strided_slice %116 {offsets = [0, 4], sizes = [64, 4], strides = [1, 1]} : vector<64x16xf32> to vector<64x4xf32>
    %133 = vector.shape_cast %132 : vector<64x4xf32> to vector<8x8x4xf32>
    %c1_123 = arith.constant 1 : index
    %c1_124 = arith.constant 1 : index
    %c1_125 = arith.constant 1 : index
    %c0_126 = arith.constant 0 : index
    %134 = vector.load %arg12[%c1_123, %c1_124, %c1_125, %c0_126] : memref<4x10x10x8xf32, #tpu.memory_space<vmem>>, vector<1x8x8x4xf32>
    %135 = vector.shape_cast %134 : vector<1x8x8x4xf32> to vector<8x8x4xf32>
    %136 = vector.shape_cast %133 : vector<8x8x4xf32> to vector<1x8x8x4xf32>
    tpu.vector_store %arg12[%c1_123, %c1_124, %c1_125, %c0_126], %136 {strides = array<i32>} : memref<4x10x10x8xf32, #tpu.memory_space<vmem>>, vector<1x8x8x4xf32>,
    %137 = vector.extract_strided_slice %121 {offsets = [1, 0, 0, 0], sizes = [1, 10, 10, 4], strides = [1, 1, 1, 1]} : vector<4x10x10x4xf32> to vector<1x10x10x4xf32>
    %138 = vector.shape_cast %137 : vector<1x10x10x4xf32> to vector<10x10x4xf32>
    %c1_127 = arith.constant 1 : index
    %c0_128 = arith.constant 0 : index
    %c0_129 = arith.constant 0 : index
    %c4_130 = arith.constant 4 : index
    %139 = vector.load %arg12[%c1_127, %c0_128, %c0_129, %c4_130] : memref<4x10x10x8xf32, #tpu.memory_space<vmem>>, vector<1x10x10x4xf32>
    %140 = vector.shape_cast %139 : vector<1x10x10x4xf32> to vector<10x10x4xf32>
    %141 = vector.shape_cast %138 : vector<10x10x4xf32> to vector<1x10x10x4xf32>
    tpu.vector_store %arg12[%c1_127, %c0_128, %c0_129, %c4_130], %141 {strides = array<i32>} : memref<4x10x10x8xf32, #tpu.memory_space<vmem>>, vector<1x10x10x4xf32>,
    %142 = vector.extract_strided_slice %116 {offsets = [0, 8], sizes = [64, 4], strides = [1, 1]} : vector<64x16xf32> to vector<64x4xf32>
    %143 = vector.shape_cast %142 : vector<64x4xf32> to vector<8x8x4xf32>
    %c2_131 = arith.constant 2 : index
    %c1_132 = arith.constant 1 : index
    %c1_133 = arith.constant 1 : index
    %c0_134 = arith.constant 0 : index
    %144 = vector.load %arg12[%c2_131, %c1_132, %c1_133, %c0_134] : memref<4x10x10x8xf32, #tpu.memory_space<vmem>>, vector<1x8x8x4xf32>
    %145 = vector.shape_cast %144 : vector<1x8x8x4xf32> to vector<8x8x4xf32>
    %146 = vector.shape_cast %143 : vector<8x8x4xf32> to vector<1x8x8x4xf32>
    tpu.vector_store %arg12[%c2_131, %c1_132, %c1_133, %c0_134], %146 {strides = array<i32>} : memref<4x10x10x8xf32, #tpu.memory_space<vmem>>, vector<1x8x8x4xf32>,
    %147 = vector.extract_strided_slice %121 {offsets = [2, 0, 0, 0], sizes = [1, 10, 10, 4], strides = [1, 1, 1, 1]} : vector<4x10x10x4xf32> to vector<1x10x10x4xf32>
    %148 = vector.shape_cast %147 : vector<1x10x10x4xf32> to vector<10x10x4xf32>
    %c2_135 = arith.constant 2 : index
    %c0_136 = arith.constant 0 : index
    %c0_137 = arith.constant 0 : index
    %c4_138 = arith.constant 4 : index
    %149 = vector.load %arg12[%c2_135, %c0_136, %c0_137, %c4_138] : memref<4x10x10x8xf32, #tpu.memory_space<vmem>>, vector<1x10x10x4xf32>
    %150 = vector.shape_cast %149 : vector<1x10x10x4xf32> to vector<10x10x4xf32>
    %151 = vector.shape_cast %148 : vector<10x10x4xf32> to vector<1x10x10x4xf32>
    tpu.vector_store %arg12[%c2_135, %c0_136, %c0_137, %c4_138], %151 {strides = array<i32>} : memref<4x10x10x8xf32, #tpu.memory_space<vmem>>, vector<1x10x10x4xf32>,
    %152 = vector.extract_strided_slice %116 {offsets = [0, 12], sizes = [64, 4], strides = [1, 1]} : vector<64x16xf32> to vector<64x4xf32>
    %153 = vector.shape_cast %152 : vector<64x4xf32> to vector<8x8x4xf32>
    %c3_139 = arith.constant 3 : index
    %c1_140 = arith.constant 1 : index
    %c1_141 = arith.constant 1 : index
    %c0_142 = arith.constant 0 : index
    %154 = vector.load %arg12[%c3_139, %c1_140, %c1_141, %c0_142] : memref<4x10x10x8xf32, #tpu.memory_space<vmem>>, vector<1x8x8x4xf32>
    %155 = vector.shape_cast %154 : vector<1x8x8x4xf32> to vector<8x8x4xf32>
    %156 = vector.shape_cast %153 : vector<8x8x4xf32> to vector<1x8x8x4xf32>
    tpu.vector_store %arg12[%c3_139, %c1_140, %c1_141, %c0_142], %156 {strides = array<i32>} : memref<4x10x10x8xf32, #tpu.memory_space<vmem>>, vector<1x8x8x4xf32>,
    %157 = vector.extract_strided_slice %121 {offsets = [3, 0, 0, 0], sizes = [1, 10, 10, 4], strides = [1, 1, 1, 1]} : vector<4x10x10x4xf32> to vector<1x10x10x4xf32>
    %158 = vector.shape_cast %157 : vector<1x10x10x4xf32> to vector<10x10x4xf32>
    %c3_143 = arith.constant 3 : index
    %c0_144 = arith.constant 0 : index
    %c0_145 = arith.constant 0 : index
    %c4_146 = arith.constant 4 : index
    %159 = vector.load %arg12[%c3_143, %c0_144, %c0_145, %c4_146] : memref<4x10x10x8xf32, #tpu.memory_space<vmem>>, vector<1x10x10x4xf32>
    %160 = vector.shape_cast %159 : vector<1x10x10x4xf32> to vector<10x10x4xf32>
    %161 = vector.shape_cast %158 : vector<10x10x4xf32> to vector<1x10x10x4xf32>
    tpu.vector_store %arg12[%c3_143, %c0_144, %c0_145, %c4_146], %161 {strides = array<i32>} : memref<4x10x10x8xf32, #tpu.memory_space<vmem>>, vector<1x10x10x4xf32>,
    %cst_147 = arith.constant 0.000000e+00 : f32
    %162 = vector.broadcast %cst_147 : f32 to vector<64x4xf32>
    %c3_148 = arith.constant 3 : index
    %c0_149 = arith.constant 0 : index
    %c0_150 = arith.constant 0 : index
    %c0_151 = arith.constant 0 : index
    %163 = vector.load %arg12[%c3_148, %c0_149, %c0_150, %c0_151] : memref<4x10x10x8xf32, #tpu.memory_space<vmem>>, vector<1x8x8x8xf32>
    %164 = vector.shape_cast %163 : vector<1x8x8x8xf32> to vector<8x8x8xf32>
    %165 = vector.shape_cast %164 : vector<8x8x8xf32> to vector<64x8xf32>
    %166 = arith.truncf %165 : vector<64x8xf32> to vector<64x8xbf16>
    %c0_152 = arith.constant 0 : index
    %c0_153 = arith.constant 0 : index
    %c0_154 = arith.constant 0 : index
    %167 = vector.load %arg7[%c0_152, %c0_153, %c0_154] : memref<9x8x4xbf16, #tpu.memory_space<vmem>>, vector<1x8x4xbf16>
    %168 = vector.shape_cast %167 : vector<1x8x4xbf16> to vector<8x4xbf16>
    %cst_155 = arith.constant dense<0.000000e+00> : vector<64x4xf32>
    %169 = tpu.matmul %166, %168, %cst_155 {dimension_numbers = #tpu.dot_dimension_numbers<[1], [0], [0], [1], [0, 0, 1, 1], [], []>} : vector<64x8xbf16>, vector<8x4xbf16>, vector<64x4xf32> -> vector<64x4xf32>
    %170 = arith.addf %162, %169 : vector<64x4xf32>
    %c2_156 = arith.constant 2 : index
    %c0_157 = arith.constant 0 : index
    %c1_158 = arith.constant 1 : index
    %c0_159 = arith.constant 0 : index
    %171 = vector.load %arg12[%c2_156, %c0_157, %c1_158, %c0_159] : memref<4x10x10x8xf32, #tpu.memory_space<vmem>>, vector<1x8x8x8xf32>
    %172 = vector.shape_cast %171 : vector<1x8x8x8xf32> to vector<8x8x8xf32>
    %173 = vector.shape_cast %172 : vector<8x8x8xf32> to vector<64x8xf32>
    %174 = arith.truncf %173 : vector<64x8xf32> to vector<64x8xbf16>
    %c1_160 = arith.constant 1 : index
    %c0_161 = arith.constant 0 : index
    %c0_162 = arith.constant 0 : index
    %175 = vector.load %arg7[%c1_160, %c0_161, %c0_162] : memref<9x8x4xbf16, #tpu.memory_space<vmem>>, vector<1x8x4xbf16>
    %176 = vector.shape_cast %175 : vector<1x8x4xbf16> to vector<8x4xbf16>
    %cst_163 = arith.constant dense<0.000000e+00> : vector<64x4xf32>
    %177 = tpu.matmul %174, %176, %cst_163 {dimension_numbers = #tpu.dot_dimension_numbers<[1], [0], [0], [1], [0, 0, 1, 1], [], []>} : vector<64x8xbf16>, vector<8x4xbf16>, vector<64x4xf32> -> vector<64x4xf32>
    %178 = arith.addf %170, %177 : vector<64x4xf32>
    %c3_164 = arith.constant 3 : index
    %c0_165 = arith.constant 0 : index
    %c1_166 = arith.constant 1 : index
    %c0_167 = arith.constant 0 : index
    %179 = vector.load %arg12[%c3_164, %c0_165, %c1_166, %c0_167] : memref<4x10x10x8xf32, #tpu.memory_space<vmem>>, vector<1x8x8x8xf32>
    %180 = vector.shape_cast %179 : vector<1x8x8x8xf32> to vector<8x8x8xf32>
    %181 = vector.shape_cast %180 : vector<8x8x8xf32> to vector<64x8xf32>
    %182 = arith.truncf %181 : vector<64x8xf32> to vector<64x8xbf16>
    %c2_168 = arith.constant 2 : index
    %c0_169 = arith.constant 0 : index
    %c0_170 = arith.constant 0 : index
    %183 = vector.load %arg7[%c2_168, %c0_169, %c0_170] : memref<9x8x4xbf16, #tpu.memory_space<vmem>>, vector<1x8x4xbf16>
    %184 = vector.shape_cast %183 : vector<1x8x4xbf16> to vector<8x4xbf16>
    %cst_171 = arith.constant dense<0.000000e+00> : vector<64x4xf32>
    %185 = tpu.matmul %182, %184, %cst_171 {dimension_numbers = #tpu.dot_dimension_numbers<[1], [0], [0], [1], [0, 0, 1, 1], [], []>} : vector<64x8xbf16>, vector<8x4xbf16>, vector<64x4xf32> -> vector<64x4xf32>
    %186 = arith.addf %178, %185 : vector<64x4xf32>
    %c1_172 = arith.constant 1 : index
    %c1_173 = arith.constant 1 : index
    %c0_174 = arith.constant 0 : index
    %c0_175 = arith.constant 0 : index
    %187 = vector.load %arg12[%c1_172, %c1_173, %c0_174, %c0_175] : memref<4x10x10x8xf32, #tpu.memory_space<vmem>>, vector<1x8x8x8xf32>
    %188 = vector.shape_cast %187 : vector<1x8x8x8xf32> to vector<8x8x8xf32>
    %189 = vector.shape_cast %188 : vector<8x8x8xf32> to vector<64x8xf32>
    %190 = arith.truncf %189 : vector<64x8xf32> to vector<64x8xbf16>
    %c3_176 = arith.constant 3 : index
    %c0_177 = arith.constant 0 : index
    %c0_178 = arith.constant 0 : index
    %191 = vector.load %arg7[%c3_176, %c0_177, %c0_178] : memref<9x8x4xbf16, #tpu.memory_space<vmem>>, vector<1x8x4xbf16>
    %192 = vector.shape_cast %191 : vector<1x8x4xbf16> to vector<8x4xbf16>
    %cst_179 = arith.constant dense<0.000000e+00> : vector<64x4xf32>
    %193 = tpu.matmul %190, %192, %cst_179 {dimension_numbers = #tpu.dot_dimension_numbers<[1], [0], [0], [1], [0, 0, 1, 1], [], []>} : vector<64x8xbf16>, vector<8x4xbf16>, vector<64x4xf32> -> vector<64x4xf32>
    %194 = arith.addf %186, %193 : vector<64x4xf32>
    %c0_180 = arith.constant 0 : index
    %c1_181 = arith.constant 1 : index
    %c1_182 = arith.constant 1 : index
    %c0_183 = arith.constant 0 : index
    %195 = vector.load %arg12[%c0_180, %c1_181, %c1_182, %c0_183] : memref<4x10x10x8xf32, #tpu.memory_space<vmem>>, vector<1x8x8x8xf32>
    %196 = vector.shape_cast %195 : vector<1x8x8x8xf32> to vector<8x8x8xf32>
    %197 = vector.shape_cast %196 : vector<8x8x8xf32> to vector<64x8xf32>
    %198 = arith.truncf %197 : vector<64x8xf32> to vector<64x8xbf16>
    %c4_184 = arith.constant 4 : index
    %c0_185 = arith.constant 0 : index
    %c0_186 = arith.constant 0 : index
    %199 = vector.load %arg7[%c4_184, %c0_185, %c0_186] : memref<9x8x4xbf16, #tpu.memory_space<vmem>>, vector<1x8x4xbf16>
    %200 = vector.shape_cast %199 : vector<1x8x4xbf16> to vector<8x4xbf16>
    %cst_187 = arith.constant dense<0.000000e+00> : vector<64x4xf32>
    %201 = tpu.matmul %198, %200, %cst_187 {dimension_numbers = #tpu.dot_dimension_numbers<[1], [0], [0], [1], [0, 0, 1, 1], [], []>} : vector<64x8xbf16>, vector<8x4xbf16>, vector<64x4xf32> -> vector<64x4xf32>
    %202 = arith.addf %194, %201 : vector<64x4xf32>
    %c1_188 = arith.constant 1 : index
    %c1_189 = arith.constant 1 : index
    %c1_190 = arith.constant 1 : index
    %c0_191 = arith.constant 0 : index
    %203 = vector.load %arg12[%c1_188, %c1_189, %c1_190, %c0_191] : memref<4x10x10x8xf32, #tpu.memory_space<vmem>>, vector<1x8x8x8xf32>
    %204 = vector.shape_cast %203 : vector<1x8x8x8xf32> to vector<8x8x8xf32>
    %205 = vector.shape_cast %204 : vector<8x8x8xf32> to vector<64x8xf32>
    %206 = arith.truncf %205 : vector<64x8xf32> to vector<64x8xbf16>
    %c5_192 = arith.constant 5 : index
    %c0_193 = arith.constant 0 : index
    %c0_194 = arith.constant 0 : index
    %207 = vector.load %arg7[%c5_192, %c0_193, %c0_194] : memref<9x8x4xbf16, #tpu.memory_space<vmem>>, vector<1x8x4xbf16>
    %208 = vector.shape_cast %207 : vector<1x8x4xbf16> to vector<8x4xbf16>
    %cst_195 = arith.constant dense<0.000000e+00> : vector<64x4xf32>
    %209 = tpu.matmul %206, %208, %cst_195 {dimension_numbers = #tpu.dot_dimension_numbers<[1], [0], [0], [1], [0, 0, 1, 1], [], []>} : vector<64x8xbf16>, vector<8x4xbf16>, vector<64x4xf32> -> vector<64x4xf32>
    %210 = arith.addf %202, %209 : vector<64x4xf32>
    %c3_196 = arith.constant 3 : index
    %c1_197 = arith.constant 1 : index
    %c0_198 = arith.constant 0 : index
    %c0_199 = arith.constant 0 : index
    %211 = vector.load %arg12[%c3_196, %c1_197, %c0_198, %c0_199] : memref<4x10x10x8xf32, #tpu.memory_space<vmem>>, vector<1x8x8x8xf32>
    %212 = vector.shape_cast %211 : vector<1x8x8x8xf32> to vector<8x8x8xf32>
    %213 = vector.shape_cast %212 : vector<8x8x8xf32> to vector<64x8xf32>
    %214 = arith.truncf %213 : vector<64x8xf32> to vector<64x8xbf16>
    %c6_200 = arith.constant 6 : index
    %c0_201 = arith.constant 0 : index
    %c0_202 = arith.constant 0 : index
    %215 = vector.load %arg7[%c6_200, %c0_201, %c0_202] : memref<9x8x4xbf16, #tpu.memory_space<vmem>>, vector<1x8x4xbf16>
    %216 = vector.shape_cast %215 : vector<1x8x4xbf16> to vector<8x4xbf16>
    %cst_203 = arith.constant dense<0.000000e+00> : vector<64x4xf32>
    %217 = tpu.matmul %214, %216, %cst_203 {dimension_numbers = #tpu.dot_dimension_numbers<[1], [0], [0], [1], [0, 0, 1, 1], [], []>} : vector<64x8xbf16>, vector<8x4xbf16>, vector<64x4xf32> -> vector<64x4xf32>
    %218 = arith.addf %210, %217 : vector<64x4xf32>
    %c2_204 = arith.constant 2 : index
    %c1_205 = arith.constant 1 : index
    %c1_206 = arith.constant 1 : index
    %c0_207 = arith.constant 0 : index
    %219 = vector.load %arg12[%c2_204, %c1_205, %c1_206, %c0_207] : memref<4x10x10x8xf32, #tpu.memory_space<vmem>>, vector<1x8x8x8xf32>
    %220 = vector.shape_cast %219 : vector<1x8x8x8xf32> to vector<8x8x8xf32>
    %221 = vector.shape_cast %220 : vector<8x8x8xf32> to vector<64x8xf32>
    %222 = arith.truncf %221 : vector<64x8xf32> to vector<64x8xbf16>
    %c7_208 = arith.constant 7 : index
    %c0_209 = arith.constant 0 : index
    %c0_210 = arith.constant 0 : index
    %223 = vector.load %arg7[%c7_208, %c0_209, %c0_210] : memref<9x8x4xbf16, #tpu.memory_space<vmem>>, vector<1x8x4xbf16>
    %224 = vector.shape_cast %223 : vector<1x8x4xbf16> to vector<8x4xbf16>
    %cst_211 = arith.constant dense<0.000000e+00> : vector<64x4xf32>
    %225 = tpu.matmul %222, %224, %cst_211 {dimension_numbers = #tpu.dot_dimension_numbers<[1], [0], [0], [1], [0, 0, 1, 1], [], []>} : vector<64x8xbf16>, vector<8x4xbf16>, vector<64x4xf32> -> vector<64x4xf32>
    %226 = arith.addf %218, %225 : vector<64x4xf32>
    %c3_212 = arith.constant 3 : index
    %c1_213 = arith.constant 1 : index
    %c1_214 = arith.constant 1 : index
    %c0_215 = arith.constant 0 : index
    %227 = vector.load %arg12[%c3_212, %c1_213, %c1_214, %c0_215] : memref<4x10x10x8xf32, #tpu.memory_space<vmem>>, vector<1x8x8x8xf32>
    %228 = vector.shape_cast %227 : vector<1x8x8x8xf32> to vector<8x8x8xf32>
    %229 = vector.shape_cast %228 : vector<8x8x8xf32> to vector<64x8xf32>
    %230 = arith.truncf %229 : vector<64x8xf32> to vector<64x8xbf16>
    %c8_216 = arith.constant 8 : index
    %c0_217 = arith.constant 0 : index
    %c0_218 = arith.constant 0 : index
    %231 = vector.load %arg7[%c8_216, %c0_217, %c0_218] : memref<9x8x4xbf16, #tpu.memory_space<vmem>>, vector<1x8x4xbf16>
    %232 = vector.shape_cast %231 : vector<1x8x4xbf16> to vector<8x4xbf16>
    %cst_219 = arith.constant dense<0.000000e+00> : vector<64x4xf32>
    %233 = tpu.matmul %230, %232, %cst_219 {dimension_numbers = #tpu.dot_dimension_numbers<[1], [0], [0], [1], [0, 0, 1, 1], [], []>} : vector<64x8xbf16>, vector<8x4xbf16>, vector<64x4xf32> -> vector<64x4xf32>
    %234 = arith.addf %226, %233 : vector<64x4xf32>
    %cst_220 = arith.constant 0.000000e+00 : f32
    %235 = vector.broadcast %cst_220 : f32 to vector<64x4xf32>
    %c2_221 = arith.constant 2 : index
    %c0_222 = arith.constant 0 : index
    %c1_223 = arith.constant 1 : index
    %c0_224 = arith.constant 0 : index
    %236 = vector.load %arg12[%c2_221, %c0_222, %c1_223, %c0_224] : memref<4x10x10x8xf32, #tpu.memory_space<vmem>>, vector<1x8x8x8xf32>
    %237 = vector.shape_cast %236 : vector<1x8x8x8xf32> to vector<8x8x8xf32>
    %238 = vector.shape_cast %237 : vector<8x8x8xf32> to vector<64x8xf32>
    %239 = arith.truncf %238 : vector<64x8xf32> to vector<64x8xbf16>
    %c0_225 = arith.constant 0 : index
    %c0_226 = arith.constant 0 : index
    %c0_227 = arith.constant 0 : index
    %240 = vector.load %arg7[%c0_225, %c0_226, %c0_227] : memref<9x8x4xbf16, #tpu.memory_space<vmem>>, vector<1x8x4xbf16>
    %241 = vector.shape_cast %240 : vector<1x8x4xbf16> to vector<8x4xbf16>
    %cst_228 = arith.constant dense<0.000000e+00> : vector<64x4xf32>
    %242 = tpu.matmul %239, %241, %cst_228 {dimension_numbers = #tpu.dot_dimension_numbers<[1], [0], [0], [1], [0, 0, 1, 1], [], []>} : vector<64x8xbf16>, vector<8x4xbf16>, vector<64x4xf32> -> vector<64x4xf32>
    %243 = arith.addf %235, %242 : vector<64x4xf32>
    %c3_229 = arith.constant 3 : index
    %c0_230 = arith.constant 0 : index
    %c1_231 = arith.constant 1 : index
    %c0_232 = arith.constant 0 : index
    %244 = vector.load %arg12[%c3_229, %c0_230, %c1_231, %c0_232] : memref<4x10x10x8xf32, #tpu.memory_space<vmem>>, vector<1x8x8x8xf32>
    %245 = vector.shape_cast %244 : vector<1x8x8x8xf32> to vector<8x8x8xf32>
    %246 = vector.shape_cast %245 : vector<8x8x8xf32> to vector<64x8xf32>
    %247 = arith.truncf %246 : vector<64x8xf32> to vector<64x8xbf16>
    %c1_233 = arith.constant 1 : index
    %c0_234 = arith.constant 0 : index
    %c0_235 = arith.constant 0 : index
    %248 = vector.load %arg7[%c1_233, %c0_234, %c0_235] : memref<9x8x4xbf16, #tpu.memory_space<vmem>>, vector<1x8x4xbf16>
    %249 = vector.shape_cast %248 : vector<1x8x4xbf16> to vector<8x4xbf16>
    %cst_236 = arith.constant dense<0.000000e+00> : vector<64x4xf32>
    %250 = tpu.matmul %247, %249, %cst_236 {dimension_numbers = #tpu.dot_dimension_numbers<[1], [0], [0], [1], [0, 0, 1, 1], [], []>} : vector<64x8xbf16>, vector<8x4xbf16>, vector<64x4xf32> -> vector<64x4xf32>
    %251 = arith.addf %243, %250 : vector<64x4xf32>
    %c2_237 = arith.constant 2 : index
    %c0_238 = arith.constant 0 : index
    %c2_239 = arith.constant 2 : index
    %c0_240 = arith.constant 0 : index
    %252 = vector.load %arg12[%c2_237, %c0_238, %c2_239, %c0_240] : memref<4x10x10x8xf32, #tpu.memory_space<vmem>>, vector<1x8x8x8xf32>
    %253 = vector.shape_cast %252 : vector<1x8x8x8xf32> to vector<8x8x8xf32>
    %254 = vector.shape_cast %253 : vector<8x8x8xf32> to vector<64x8xf32>
    %255 = arith.truncf %254 : vector<64x8xf32> to vector<64x8xbf16>
    %c2_241 = arith.constant 2 : index
    %c0_242 = arith.constant 0 : index
    %c0_243 = arith.constant 0 : index
    %256 = vector.load %arg7[%c2_241, %c0_242, %c0_243] : memref<9x8x4xbf16, #tpu.memory_space<vmem>>, vector<1x8x4xbf16>
    %257 = vector.shape_cast %256 : vector<1x8x4xbf16> to vector<8x4xbf16>
    %cst_244 = arith.constant dense<0.000000e+00> : vector<64x4xf32>
    %258 = tpu.matmul %255, %257, %cst_244 {dimension_numbers = #tpu.dot_dimension_numbers<[1], [0], [0], [1], [0, 0, 1, 1], [], []>} : vector<64x8xbf16>, vector<8x4xbf16>, vector<64x4xf32> -> vector<64x4xf32>
    %259 = arith.addf %251, %258 : vector<64x4xf32>
    %c0_245 = arith.constant 0 : index
    %c1_246 = arith.constant 1 : index
    %c1_247 = arith.constant 1 : index
    %c0_248 = arith.constant 0 : index
    %260 = vector.load %arg12[%c0_245, %c1_246, %c1_247, %c0_248] : memref<4x10x10x8xf32, #tpu.memory_space<vmem>>, vector<1x8x8x8xf32>
    %261 = vector.shape_cast %260 : vector<1x8x8x8xf32> to vector<8x8x8xf32>
    %262 = vector.shape_cast %261 : vector<8x8x8xf32> to vector<64x8xf32>
    %263 = arith.truncf %262 : vector<64x8xf32> to vector<64x8xbf16>
    %c3_249 = arith.constant 3 : index
    %c0_250 = arith.constant 0 : index
    %c0_251 = arith.constant 0 : index
    %264 = vector.load %arg7[%c3_249, %c0_250, %c0_251] : memref<9x8x4xbf16, #tpu.memory_space<vmem>>, vector<1x8x4xbf16>
    %265 = vector.shape_cast %264 : vector<1x8x4xbf16> to vector<8x4xbf16>
    %cst_252 = arith.constant dense<0.000000e+00> : vector<64x4xf32>
    %266 = tpu.matmul %263, %265, %cst_252 {dimension_numbers = #tpu.dot_dimension_numbers<[1], [0], [0], [1], [0, 0, 1, 1], [], []>} : vector<64x8xbf16>, vector<8x4xbf16>, vector<64x4xf32> -> vector<64x4xf32>
    %267 = arith.addf %259, %266 : vector<64x4xf32>
    %c1_253 = arith.constant 1 : index
    %c1_254 = arith.constant 1 : index
    %c1_255 = arith.constant 1 : index
    %c0_256 = arith.constant 0 : index
    %268 = vector.load %arg12[%c1_253, %c1_254, %c1_255, %c0_256] : memref<4x10x10x8xf32, #tpu.memory_space<vmem>>, vector<1x8x8x8xf32>
    %269 = vector.shape_cast %268 : vector<1x8x8x8xf32> to vector<8x8x8xf32>
    %270 = vector.shape_cast %269 : vector<8x8x8xf32> to vector<64x8xf32>
    %271 = arith.truncf %270 : vector<64x8xf32> to vector<64x8xbf16>
    %c4_257 = arith.constant 4 : index
    %c0_258 = arith.constant 0 : index
    %c0_259 = arith.constant 0 : index
    %272 = vector.load %arg7[%c4_257, %c0_258, %c0_259] : memref<9x8x4xbf16, #tpu.memory_space<vmem>>, vector<1x8x4xbf16>
    %273 = vector.shape_cast %272 : vector<1x8x4xbf16> to vector<8x4xbf16>
    %cst_260 = arith.constant dense<0.000000e+00> : vector<64x4xf32>
    %274 = tpu.matmul %271, %273, %cst_260 {dimension_numbers = #tpu.dot_dimension_numbers<[1], [0], [0], [1], [0, 0, 1, 1], [], []>} : vector<64x8xbf16>, vector<8x4xbf16>, vector<64x4xf32> -> vector<64x4xf32>
    %275 = arith.addf %267, %274 : vector<64x4xf32>
    %c0_261 = arith.constant 0 : index
    %c1_262 = arith.constant 1 : index
    %c2_263 = arith.constant 2 : index
    %c0_264 = arith.constant 0 : index
    %276 = vector.load %arg12[%c0_261, %c1_262, %c2_263, %c0_264] : memref<4x10x10x8xf32, #tpu.memory_space<vmem>>, vector<1x8x8x8xf32>
    %277 = vector.shape_cast %276 : vector<1x8x8x8xf32> to vector<8x8x8xf32>
    %278 = vector.shape_cast %277 : vector<8x8x8xf32> to vector<64x8xf32>
    %279 = arith.truncf %278 : vector<64x8xf32> to vector<64x8xbf16>
    %c5_265 = arith.constant 5 : index
    %c0_266 = arith.constant 0 : index
    %c0_267 = arith.constant 0 : index
    %280 = vector.load %arg7[%c5_265, %c0_266, %c0_267] : memref<9x8x4xbf16, #tpu.memory_space<vmem>>, vector<1x8x4xbf16>
    %281 = vector.shape_cast %280 : vector<1x8x4xbf16> to vector<8x4xbf16>
    %cst_268 = arith.constant dense<0.000000e+00> : vector<64x4xf32>
    %282 = tpu.matmul %279, %281, %cst_268 {dimension_numbers = #tpu.dot_dimension_numbers<[1], [0], [0], [1], [0, 0, 1, 1], [], []>} : vector<64x8xbf16>, vector<8x4xbf16>, vector<64x4xf32> -> vector<64x4xf32>
    %283 = arith.addf %275, %282 : vector<64x4xf32>
    %c2_269 = arith.constant 2 : index
    %c1_270 = arith.constant 1 : index
    %c1_271 = arith.constant 1 : index
    %c0_272 = arith.constant 0 : index
    %284 = vector.load %arg12[%c2_269, %c1_270, %c1_271, %c0_272] : memref<4x10x10x8xf32, #tpu.memory_space<vmem>>, vector<1x8x8x8xf32>
    %285 = vector.shape_cast %284 : vector<1x8x8x8xf32> to vector<8x8x8xf32>
    %286 = vector.shape_cast %285 : vector<8x8x8xf32> to vector<64x8xf32>
    %287 = arith.truncf %286 : vector<64x8xf32> to vector<64x8xbf16>
    %c6_273 = arith.constant 6 : index
    %c0_274 = arith.constant 0 : index
    %c0_275 = arith.constant 0 : index
    %288 = vector.load %arg7[%c6_273, %c0_274, %c0_275] : memref<9x8x4xbf16, #tpu.memory_space<vmem>>, vector<1x8x4xbf16>
    %289 = vector.shape_cast %288 : vector<1x8x4xbf16> to vector<8x4xbf16>
    %cst_276 = arith.constant dense<0.000000e+00> : vector<64x4xf32>
    %290 = tpu.matmul %287, %289, %cst_276 {dimension_numbers = #tpu.dot_dimension_numbers<[1], [0], [0], [1], [0, 0, 1, 1], [], []>} : vector<64x8xbf16>, vector<8x4xbf16>, vector<64x4xf32> -> vector<64x4xf32>
    %291 = arith.addf %283, %290 : vector<64x4xf32>
    %c3_277 = arith.constant 3 : index
    %c1_278 = arith.constant 1 : index
    %c1_279 = arith.constant 1 : index
    %c0_280 = arith.constant 0 : index
    %292 = vector.load %arg12[%c3_277, %c1_278, %c1_279, %c0_280] : memref<4x10x10x8xf32, #tpu.memory_space<vmem>>, vector<1x8x8x8xf32>
    %293 = vector.shape_cast %292 : vector<1x8x8x8xf32> to vector<8x8x8xf32>
    %294 = vector.shape_cast %293 : vector<8x8x8xf32> to vector<64x8xf32>
    %295 = arith.truncf %294 : vector<64x8xf32> to vector<64x8xbf16>
    %c7_281 = arith.constant 7 : index
    %c0_282 = arith.constant 0 : index
    %c0_283 = arith.constant 0 : index
    %296 = vector.load %arg7[%c7_281, %c0_282, %c0_283] : memref<9x8x4xbf16, #tpu.memory_space<vmem>>, vector<1x8x4xbf16>
    %297 = vector.shape_cast %296 : vector<1x8x4xbf16> to vector<8x4xbf16>
    %cst_284 = arith.constant dense<0.000000e+00> : vector<64x4xf32>
    %298 = tpu.matmul %295, %297, %cst_284 {dimension_numbers = #tpu.dot_dimension_numbers<[1], [0], [0], [1], [0, 0, 1, 1], [], []>} : vector<64x8xbf16>, vector<8x4xbf16>, vector<64x4xf32> -> vector<64x4xf32>
    %299 = arith.addf %291, %298 : vector<64x4xf32>
    %c2_285 = arith.constant 2 : index
    %c1_286 = arith.constant 1 : index
    %c2_287 = arith.constant 2 : index
    %c0_288 = arith.constant 0 : index
    %300 = vector.load %arg12[%c2_285, %c1_286, %c2_287, %c0_288] : memref<4x10x10x8xf32, #tpu.memory_space<vmem>>, vector<1x8x8x8xf32>
    %301 = vector.shape_cast %300 : vector<1x8x8x8xf32> to vector<8x8x8xf32>
    %302 = vector.shape_cast %301 : vector<8x8x8xf32> to vector<64x8xf32>
    %303 = arith.truncf %302 : vector<64x8xf32> to vector<64x8xbf16>
    %c8_289 = arith.constant 8 : index
    %c0_290 = arith.constant 0 : index
    %c0_291 = arith.constant 0 : index
    %304 = vector.load %arg7[%c8_289, %c0_290, %c0_291] : memref<9x8x4xbf16, #tpu.memory_space<vmem>>, vector<1x8x4xbf16>
    %305 = vector.shape_cast %304 : vector<1x8x4xbf16> to vector<8x4xbf16>
    %cst_292 = arith.constant dense<0.000000e+00> : vector<64x4xf32>
    %306 = tpu.matmul %303, %305, %cst_292 {dimension_numbers = #tpu.dot_dimension_numbers<[1], [0], [0], [1], [0, 0, 1, 1], [], []>} : vector<64x8xbf16>, vector<8x4xbf16>, vector<64x4xf32> -> vector<64x4xf32>
    %307 = arith.addf %299, %306 : vector<64x4xf32>
    %cst_293 = arith.constant 0.000000e+00 : f32
    %308 = vector.broadcast %cst_293 : f32 to vector<64x4xf32>
    %c1_294 = arith.constant 1 : index
    %c1_295 = arith.constant 1 : index
    %c0_296 = arith.constant 0 : index
    %c0_297 = arith.constant 0 : index
    %309 = vector.load %arg12[%c1_294, %c1_295, %c0_296, %c0_297] : memref<4x10x10x8xf32, #tpu.memory_space<vmem>>, vector<1x8x8x8xf32>
    %310 = vector.shape_cast %309 : vector<1x8x8x8xf32> to vector<8x8x8xf32>
    %311 = vector.shape_cast %310 : vector<8x8x8xf32> to vector<64x8xf32>
    %312 = arith.truncf %311 : vector<64x8xf32> to vector<64x8xbf16>
    %c0_298 = arith.constant 0 : index
    %c0_299 = arith.constant 0 : index
    %c0_300 = arith.constant 0 : index
    %313 = vector.load %arg7[%c0_298, %c0_299, %c0_300] : memref<9x8x4xbf16, #tpu.memory_space<vmem>>, vector<1x8x4xbf16>
    %314 = vector.shape_cast %313 : vector<1x8x4xbf16> to vector<8x4xbf16>
    %cst_301 = arith.constant dense<0.000000e+00> : vector<64x4xf32>
    %315 = tpu.matmul %312, %314, %cst_301 {dimension_numbers = #tpu.dot_dimension_numbers<[1], [0], [0], [1], [0, 0, 1, 1], [], []>} : vector<64x8xbf16>, vector<8x4xbf16>, vector<64x4xf32> -> vector<64x4xf32>
    %316 = arith.addf %308, %315 : vector<64x4xf32>
    %c0_302 = arith.constant 0 : index
    %c1_303 = arith.constant 1 : index
    %c1_304 = arith.constant 1 : index
    %c0_305 = arith.constant 0 : index
    %317 = vector.load %arg12[%c0_302, %c1_303, %c1_304, %c0_305] : memref<4x10x10x8xf32, #tpu.memory_space<vmem>>, vector<1x8x8x8xf32>
    %318 = vector.shape_cast %317 : vector<1x8x8x8xf32> to vector<8x8x8xf32>
    %319 = vector.shape_cast %318 : vector<8x8x8xf32> to vector<64x8xf32>
    %320 = arith.truncf %319 : vector<64x8xf32> to vector<64x8xbf16>
    %c1_306 = arith.constant 1 : index
    %c0_307 = arith.constant 0 : index
    %c0_308 = arith.constant 0 : index
    %321 = vector.load %arg7[%c1_306, %c0_307, %c0_308] : memref<9x8x4xbf16, #tpu.memory_space<vmem>>, vector<1x8x4xbf16>
    %322 = vector.shape_cast %321 : vector<1x8x4xbf16> to vector<8x4xbf16>
    %cst_309 = arith.constant dense<0.000000e+00> : vector<64x4xf32>
    %323 = tpu.matmul %320, %322, %cst_309 {dimension_numbers = #tpu.dot_dimension_numbers<[1], [0], [0], [1], [0, 0, 1, 1], [], []>} : vector<64x8xbf16>, vector<8x4xbf16>, vector<64x4xf32> -> vector<64x4xf32>
    %324 = arith.addf %316, %323 : vector<64x4xf32>
    %c1_310 = arith.constant 1 : index
    %c1_311 = arith.constant 1 : index
    %c1_312 = arith.constant 1 : index
    %c0_313 = arith.constant 0 : index
    %325 = vector.load %arg12[%c1_310, %c1_311, %c1_312, %c0_313] : memref<4x10x10x8xf32, #tpu.memory_space<vmem>>, vector<1x8x8x8xf32>
    %326 = vector.shape_cast %325 : vector<1x8x8x8xf32> to vector<8x8x8xf32>
    %327 = vector.shape_cast %326 : vector<8x8x8xf32> to vector<64x8xf32>
    %328 = arith.truncf %327 : vector<64x8xf32> to vector<64x8xbf16>
    %c2_314 = arith.constant 2 : index
    %c0_315 = arith.constant 0 : index
    %c0_316 = arith.constant 0 : index
    %329 = vector.load %arg7[%c2_314, %c0_315, %c0_316] : memref<9x8x4xbf16, #tpu.memory_space<vmem>>, vector<1x8x4xbf16>
    %330 = vector.shape_cast %329 : vector<1x8x4xbf16> to vector<8x4xbf16>
    %cst_317 = arith.constant dense<0.000000e+00> : vector<64x4xf32>
    %331 = tpu.matmul %328, %330, %cst_317 {dimension_numbers = #tpu.dot_dimension_numbers<[1], [0], [0], [1], [0, 0, 1, 1], [], []>} : vector<64x8xbf16>, vector<8x4xbf16>, vector<64x4xf32> -> vector<64x4xf32>
    %332 = arith.addf %324, %331 : vector<64x4xf32>
    %c3_318 = arith.constant 3 : index
    %c1_319 = arith.constant 1 : index
    %c0_320 = arith.constant 0 : index
    %c0_321 = arith.constant 0 : index
    %333 = vector.load %arg12[%c3_318, %c1_319, %c0_320, %c0_321] : memref<4x10x10x8xf32, #tpu.memory_space<vmem>>, vector<1x8x8x8xf32>
    %334 = vector.shape_cast %333 : vector<1x8x8x8xf32> to vector<8x8x8xf32>
    %335 = vector.shape_cast %334 : vector<8x8x8xf32> to vector<64x8xf32>
    %336 = arith.truncf %335 : vector<64x8xf32> to vector<64x8xbf16>
    %c3_322 = arith.constant 3 : index
    %c0_323 = arith.constant 0 : index
    %c0_324 = arith.constant 0 : index
    %337 = vector.load %arg7[%c3_322, %c0_323, %c0_324] : memref<9x8x4xbf16, #tpu.memory_space<vmem>>, vector<1x8x4xbf16>
    %338 = vector.shape_cast %337 : vector<1x8x4xbf16> to vector<8x4xbf16>
    %cst_325 = arith.constant dense<0.000000e+00> : vector<64x4xf32>
    %339 = tpu.matmul %336, %338, %cst_325 {dimension_numbers = #tpu.dot_dimension_numbers<[1], [0], [0], [1], [0, 0, 1, 1], [], []>} : vector<64x8xbf16>, vector<8x4xbf16>, vector<64x4xf32> -> vector<64x4xf32>
    %340 = arith.addf %332, %339 : vector<64x4xf32>
    %c2_326 = arith.constant 2 : index
    %c1_327 = arith.constant 1 : index
    %c1_328 = arith.constant 1 : index
    %c0_329 = arith.constant 0 : index
    %341 = vector.load %arg12[%c2_326, %c1_327, %c1_328, %c0_329] : memref<4x10x10x8xf32, #tpu.memory_space<vmem>>, vector<1x8x8x8xf32>
    %342 = vector.shape_cast %341 : vector<1x8x8x8xf32> to vector<8x8x8xf32>
    %343 = vector.shape_cast %342 : vector<8x8x8xf32> to vector<64x8xf32>
    %344 = arith.truncf %343 : vector<64x8xf32> to vector<64x8xbf16>
    %c4_330 = arith.constant 4 : index
    %c0_331 = arith.constant 0 : index
    %c0_332 = arith.constant 0 : index
    %345 = vector.load %arg7[%c4_330, %c0_331, %c0_332] : memref<9x8x4xbf16, #tpu.memory_space<vmem>>, vector<1x8x4xbf16>
    %346 = vector.shape_cast %345 : vector<1x8x4xbf16> to vector<8x4xbf16>
    %cst_333 = arith.constant dense<0.000000e+00> : vector<64x4xf32>
    %347 = tpu.matmul %344, %346, %cst_333 {dimension_numbers = #tpu.dot_dimension_numbers<[1], [0], [0], [1], [0, 0, 1, 1], [], []>} : vector<64x8xbf16>, vector<8x4xbf16>, vector<64x4xf32> -> vector<64x4xf32>
    %348 = arith.addf %340, %347 : vector<64x4xf32>
    %c3_334 = arith.constant 3 : index
    %c1_335 = arith.constant 1 : index
    %c1_336 = arith.constant 1 : index
    %c0_337 = arith.constant 0 : index
    %349 = vector.load %arg12[%c3_334, %c1_335, %c1_336, %c0_337] : memref<4x10x10x8xf32, #tpu.memory_space<vmem>>, vector<1x8x8x8xf32>
    %350 = vector.shape_cast %349 : vector<1x8x8x8xf32> to vector<8x8x8xf32>
    %351 = vector.shape_cast %350 : vector<8x8x8xf32> to vector<64x8xf32>
    %352 = arith.truncf %351 : vector<64x8xf32> to vector<64x8xbf16>
    %c5_338 = arith.constant 5 : index
    %c0_339 = arith.constant 0 : index
    %c0_340 = arith.constant 0 : index
    %353 = vector.load %arg7[%c5_338, %c0_339, %c0_340] : memref<9x8x4xbf16, #tpu.memory_space<vmem>>, vector<1x8x4xbf16>
    %354 = vector.shape_cast %353 : vector<1x8x4xbf16> to vector<8x4xbf16>
    %cst_341 = arith.constant dense<0.000000e+00> : vector<64x4xf32>
    %355 = tpu.matmul %352, %354, %cst_341 {dimension_numbers = #tpu.dot_dimension_numbers<[1], [0], [0], [1], [0, 0, 1, 1], [], []>} : vector<64x8xbf16>, vector<8x4xbf16>, vector<64x4xf32> -> vector<64x4xf32>
    %356 = arith.addf %348, %355 : vector<64x4xf32>
    %c1_342 = arith.constant 1 : index
    %c2_343 = arith.constant 2 : index
    %c0_344 = arith.constant 0 : index
    %c0_345 = arith.constant 0 : index
    %357 = vector.load %arg12[%c1_342, %c2_343, %c0_344, %c0_345] : memref<4x10x10x8xf32, #tpu.memory_space<vmem>>, vector<1x8x8x8xf32>
    %358 = vector.shape_cast %357 : vector<1x8x8x8xf32> to vector<8x8x8xf32>
    %359 = vector.shape_cast %358 : vector<8x8x8xf32> to vector<64x8xf32>
    %360 = arith.truncf %359 : vector<64x8xf32> to vector<64x8xbf16>
    %c6_346 = arith.constant 6 : index
    %c0_347 = arith.constant 0 : index
    %c0_348 = arith.constant 0 : index
    %361 = vector.load %arg7[%c6_346, %c0_347, %c0_348] : memref<9x8x4xbf16, #tpu.memory_space<vmem>>, vector<1x8x4xbf16>
    %362 = vector.shape_cast %361 : vector<1x8x4xbf16> to vector<8x4xbf16>
    %cst_349 = arith.constant dense<0.000000e+00> : vector<64x4xf32>
    %363 = tpu.matmul %360, %362, %cst_349 {dimension_numbers = #tpu.dot_dimension_numbers<[1], [0], [0], [1], [0, 0, 1, 1], [], []>} : vector<64x8xbf16>, vector<8x4xbf16>, vector<64x4xf32> -> vector<64x4xf32>
    %364 = arith.addf %356, %363 : vector<64x4xf32>
    %c0_350 = arith.constant 0 : index
    %c2_351 = arith.constant 2 : index
    %c1_352 = arith.constant 1 : index
    %c0_353 = arith.constant 0 : index
    %365 = vector.load %arg12[%c0_350, %c2_351, %c1_352, %c0_353] : memref<4x10x10x8xf32, #tpu.memory_space<vmem>>, vector<1x8x8x8xf32>
    %366 = vector.shape_cast %365 : vector<1x8x8x8xf32> to vector<8x8x8xf32>
    %367 = vector.shape_cast %366 : vector<8x8x8xf32> to vector<64x8xf32>
    %368 = arith.truncf %367 : vector<64x8xf32> to vector<64x8xbf16>
    %c7_354 = arith.constant 7 : index
    %c0_355 = arith.constant 0 : index
    %c0_356 = arith.constant 0 : index
    %369 = vector.load %arg7[%c7_354, %c0_355, %c0_356] : memref<9x8x4xbf16, #tpu.memory_space<vmem>>, vector<1x8x4xbf16>
    %370 = vector.shape_cast %369 : vector<1x8x4xbf16> to vector<8x4xbf16>
    %cst_357 = arith.constant dense<0.000000e+00> : vector<64x4xf32>
    %371 = tpu.matmul %368, %370, %cst_357 {dimension_numbers = #tpu.dot_dimension_numbers<[1], [0], [0], [1], [0, 0, 1, 1], [], []>} : vector<64x8xbf16>, vector<8x4xbf16>, vector<64x4xf32> -> vector<64x4xf32>
    %372 = arith.addf %364, %371 : vector<64x4xf32>
    %c1_358 = arith.constant 1 : index
    %c2_359 = arith.constant 2 : index
    %c1_360 = arith.constant 1 : index
    %c0_361 = arith.constant 0 : index
    %373 = vector.load %arg12[%c1_358, %c2_359, %c1_360, %c0_361] : memref<4x10x10x8xf32, #tpu.memory_space<vmem>>, vector<1x8x8x8xf32>
    %374 = vector.shape_cast %373 : vector<1x8x8x8xf32> to vector<8x8x8xf32>
    %375 = vector.shape_cast %374 : vector<8x8x8xf32> to vector<64x8xf32>
    %376 = arith.truncf %375 : vector<64x8xf32> to vector<64x8xbf16>
    %c8_362 = arith.constant 8 : index
    %c0_363 = arith.constant 0 : index
    %c0_364 = arith.constant 0 : index
    %377 = vector.load %arg7[%c8_362, %c0_363, %c0_364] : memref<9x8x4xbf16, #tpu.memory_space<vmem>>, vector<1x8x4xbf16>
    %378 = vector.shape_cast %377 : vector<1x8x4xbf16> to vector<8x4xbf16>
    %cst_365 = arith.constant dense<0.000000e+00> : vector<64x4xf32>
    %379 = tpu.matmul %376, %378, %cst_365 {dimension_numbers = #tpu.dot_dimension_numbers<[1], [0], [0], [1], [0, 0, 1, 1], [], []>} : vector<64x8xbf16>, vector<8x4xbf16>, vector<64x4xf32> -> vector<64x4xf32>
    %380 = arith.addf %372, %379 : vector<64x4xf32>
    %cst_366 = arith.constant 0.000000e+00 : f32
    %381 = vector.broadcast %cst_366 : f32 to vector<64x4xf32>
    %c0_367 = arith.constant 0 : index
    %c1_368 = arith.constant 1 : index
    %c1_369 = arith.constant 1 : index
    %c0_370 = arith.constant 0 : index
    %382 = vector.load %arg12[%c0_367, %c1_368, %c1_369, %c0_370] : memref<4x10x10x8xf32, #tpu.memory_space<vmem>>, vector<1x8x8x8xf32>
    %383 = vector.shape_cast %382 : vector<1x8x8x8xf32> to vector<8x8x8xf32>
    %384 = vector.shape_cast %383 : vector<8x8x8xf32> to vector<64x8xf32>
    %385 = arith.truncf %384 : vector<64x8xf32> to vector<64x8xbf16>
    %c0_371 = arith.constant 0 : index
    %c0_372 = arith.constant 0 : index
    %c0_373 = arith.constant 0 : index
    %386 = vector.load %arg7[%c0_371, %c0_372, %c0_373] : memref<9x8x4xbf16, #tpu.memory_space<vmem>>, vector<1x8x4xbf16>
    %387 = vector.shape_cast %386 : vector<1x8x4xbf16> to vector<8x4xbf16>
    %cst_374 = arith.constant dense<0.000000e+00> : vector<64x4xf32>
    %388 = tpu.matmul %385, %387, %cst_374 {dimension_numbers = #tpu.dot_dimension_numbers<[1], [0], [0], [1], [0, 0, 1, 1], [], []>} : vector<64x8xbf16>, vector<8x4xbf16>, vector<64x4xf32> -> vector<64x4xf32>
    %389 = arith.addf %381, %388 : vector<64x4xf32>
    %c1_375 = arith.constant 1 : index
    %c1_376 = arith.constant 1 : index
    %c1_377 = arith.constant 1 : index
    %c0_378 = arith.constant 0 : index
    %390 = vector.load %arg12[%c1_375, %c1_376, %c1_377, %c0_378] : memref<4x10x10x8xf32, #tpu.memory_space<vmem>>, vector<1x8x8x8xf32>
    %391 = vector.shape_cast %390 : vector<1x8x8x8xf32> to vector<8x8x8xf32>
    %392 = vector.shape_cast %391 : vector<8x8x8xf32> to vector<64x8xf32>
    %393 = arith.truncf %392 : vector<64x8xf32> to vector<64x8xbf16>
    %c1_379 = arith.constant 1 : index
    %c0_380 = arith.constant 0 : index
    %c0_381 = arith.constant 0 : index
    %394 = vector.load %arg7[%c1_379, %c0_380, %c0_381] : memref<9x8x4xbf16, #tpu.memory_space<vmem>>, vector<1x8x4xbf16>
    %395 = vector.shape_cast %394 : vector<1x8x4xbf16> to vector<8x4xbf16>
    %cst_382 = arith.constant dense<0.000000e+00> : vector<64x4xf32>
    %396 = tpu.matmul %393, %395, %cst_382 {dimension_numbers = #tpu.dot_dimension_numbers<[1], [0], [0], [1], [0, 0, 1, 1], [], []>} : vector<64x8xbf16>, vector<8x4xbf16>, vector<64x4xf32> -> vector<64x4xf32>
    %397 = arith.addf %389, %396 : vector<64x4xf32>
    %c0_383 = arith.constant 0 : index
    %c1_384 = arith.constant 1 : index
    %c2_385 = arith.constant 2 : index
    %c0_386 = arith.constant 0 : index
    %398 = vector.load %arg12[%c0_383, %c1_384, %c2_385, %c0_386] : memref<4x10x10x8xf32, #tpu.memory_space<vmem>>, vector<1x8x8x8xf32>
    %399 = vector.shape_cast %398 : vector<1x8x8x8xf32> to vector<8x8x8xf32>
    %400 = vector.shape_cast %399 : vector<8x8x8xf32> to vector<64x8xf32>
    %401 = arith.truncf %400 : vector<64x8xf32> to vector<64x8xbf16>
    %c2_387 = arith.constant 2 : index
    %c0_388 = arith.constant 0 : index
    %c0_389 = arith.constant 0 : index
    %402 = vector.load %arg7[%c2_387, %c0_388, %c0_389] : memref<9x8x4xbf16, #tpu.memory_space<vmem>>, vector<1x8x4xbf16>
    %403 = vector.shape_cast %402 : vector<1x8x4xbf16> to vector<8x4xbf16>
    %cst_390 = arith.constant dense<0.000000e+00> : vector<64x4xf32>
    %404 = tpu.matmul %401, %403, %cst_390 {dimension_numbers = #tpu.dot_dimension_numbers<[1], [0], [0], [1], [0, 0, 1, 1], [], []>} : vector<64x8xbf16>, vector<8x4xbf16>, vector<64x4xf32> -> vector<64x4xf32>
    %405 = arith.addf %397, %404 : vector<64x4xf32>
    %c2_391 = arith.constant 2 : index
    %c1_392 = arith.constant 1 : index
    %c1_393 = arith.constant 1 : index
    %c0_394 = arith.constant 0 : index
    %406 = vector.load %arg12[%c2_391, %c1_392, %c1_393, %c0_394] : memref<4x10x10x8xf32, #tpu.memory_space<vmem>>, vector<1x8x8x8xf32>
    %407 = vector.shape_cast %406 : vector<1x8x8x8xf32> to vector<8x8x8xf32>
    %408 = vector.shape_cast %407 : vector<8x8x8xf32> to vector<64x8xf32>
    %409 = arith.truncf %408 : vector<64x8xf32> to vector<64x8xbf16>
    %c3_395 = arith.constant 3 : index
    %c0_396 = arith.constant 0 : index
    %c0_397 = arith.constant 0 : index
    %410 = vector.load %arg7[%c3_395, %c0_396, %c0_397] : memref<9x8x4xbf16, #tpu.memory_space<vmem>>, vector<1x8x4xbf16>
    %411 = vector.shape_cast %410 : vector<1x8x4xbf16> to vector<8x4xbf16>
    %cst_398 = arith.constant dense<0.000000e+00> : vector<64x4xf32>
    %412 = tpu.matmul %409, %411, %cst_398 {dimension_numbers = #tpu.dot_dimension_numbers<[1], [0], [0], [1], [0, 0, 1, 1], [], []>} : vector<64x8xbf16>, vector<8x4xbf16>, vector<64x4xf32> -> vector<64x4xf32>
    %413 = arith.addf %405, %412 : vector<64x4xf32>
    %c3_399 = arith.constant 3 : index
    %c1_400 = arith.constant 1 : index
    %c1_401 = arith.constant 1 : index
    %c0_402 = arith.constant 0 : index
    %414 = vector.load %arg12[%c3_399, %c1_400, %c1_401, %c0_402] : memref<4x10x10x8xf32, #tpu.memory_space<vmem>>, vector<1x8x8x8xf32>
    %415 = vector.shape_cast %414 : vector<1x8x8x8xf32> to vector<8x8x8xf32>
    %416 = vector.shape_cast %415 : vector<8x8x8xf32> to vector<64x8xf32>
    %417 = arith.truncf %416 : vector<64x8xf32> to vector<64x8xbf16>
    %c4_403 = arith.constant 4 : index
    %c0_404 = arith.constant 0 : index
    %c0_405 = arith.constant 0 : index
    %418 = vector.load %arg7[%c4_403, %c0_404, %c0_405] : memref<9x8x4xbf16, #tpu.memory_space<vmem>>, vector<1x8x4xbf16>
    %419 = vector.shape_cast %418 : vector<1x8x4xbf16> to vector<8x4xbf16>
    %cst_406 = arith.constant dense<0.000000e+00> : vector<64x4xf32>
    %420 = tpu.matmul %417, %419, %cst_406 {dimension_numbers = #tpu.dot_dimension_numbers<[1], [0], [0], [1], [0, 0, 1, 1], [], []>} : vector<64x8xbf16>, vector<8x4xbf16>, vector<64x4xf32> -> vector<64x4xf32>
    %421 = arith.addf %413, %420 : vector<64x4xf32>
    %c2_407 = arith.constant 2 : index
    %c1_408 = arith.constant 1 : index
    %c2_409 = arith.constant 2 : index
    %c0_410 = arith.constant 0 : index
    %422 = vector.load %arg12[%c2_407, %c1_408, %c2_409, %c0_410] : memref<4x10x10x8xf32, #tpu.memory_space<vmem>>, vector<1x8x8x8xf32>
    %423 = vector.shape_cast %422 : vector<1x8x8x8xf32> to vector<8x8x8xf32>
    %424 = vector.shape_cast %423 : vector<8x8x8xf32> to vector<64x8xf32>
    %425 = arith.truncf %424 : vector<64x8xf32> to vector<64x8xbf16>
    %c5_411 = arith.constant 5 : index
    %c0_412 = arith.constant 0 : index
    %c0_413 = arith.constant 0 : index
    %426 = vector.load %arg7[%c5_411, %c0_412, %c0_413] : memref<9x8x4xbf16, #tpu.memory_space<vmem>>, vector<1x8x4xbf16>
    %427 = vector.shape_cast %426 : vector<1x8x4xbf16> to vector<8x4xbf16>
    %cst_414 = arith.constant dense<0.000000e+00> : vector<64x4xf32>
    %428 = tpu.matmul %425, %427, %cst_414 {dimension_numbers = #tpu.dot_dimension_numbers<[1], [0], [0], [1], [0, 0, 1, 1], [], []>} : vector<64x8xbf16>, vector<8x4xbf16>, vector<64x4xf32> -> vector<64x4xf32>
    %429 = arith.addf %421, %428 : vector<64x4xf32>
    %c0_415 = arith.constant 0 : index
    %c2_416 = arith.constant 2 : index
    %c1_417 = arith.constant 1 : index
    %c0_418 = arith.constant 0 : index
    %430 = vector.load %arg12[%c0_415, %c2_416, %c1_417, %c0_418] : memref<4x10x10x8xf32, #tpu.memory_space<vmem>>, vector<1x8x8x8xf32>
    %431 = vector.shape_cast %430 : vector<1x8x8x8xf32> to vector<8x8x8xf32>
    %432 = vector.shape_cast %431 : vector<8x8x8xf32> to vector<64x8xf32>
    %433 = arith.truncf %432 : vector<64x8xf32> to vector<64x8xbf16>
    %c6_419 = arith.constant 6 : index
    %c0_420 = arith.constant 0 : index
    %c0_421 = arith.constant 0 : index
    %434 = vector.load %arg7[%c6_419, %c0_420, %c0_421] : memref<9x8x4xbf16, #tpu.memory_space<vmem>>, vector<1x8x4xbf16>
    %435 = vector.shape_cast %434 : vector<1x8x4xbf16> to vector<8x4xbf16>
    %cst_422 = arith.constant dense<0.000000e+00> : vector<64x4xf32>
    %436 = tpu.matmul %433, %435, %cst_422 {dimension_numbers = #tpu.dot_dimension_numbers<[1], [0], [0], [1], [0, 0, 1, 1], [], []>} : vector<64x8xbf16>, vector<8x4xbf16>, vector<64x4xf32> -> vector<64x4xf32>
    %437 = arith.addf %429, %436 : vector<64x4xf32>
    %c1_423 = arith.constant 1 : index
    %c2_424 = arith.constant 2 : index
    %c1_425 = arith.constant 1 : index
    %c0_426 = arith.constant 0 : index
    %438 = vector.load %arg12[%c1_423, %c2_424, %c1_425, %c0_426] : memref<4x10x10x8xf32, #tpu.memory_space<vmem>>, vector<1x8x8x8xf32>
    %439 = vector.shape_cast %438 : vector<1x8x8x8xf32> to vector<8x8x8xf32>
    %440 = vector.shape_cast %439 : vector<8x8x8xf32> to vector<64x8xf32>
    %441 = arith.truncf %440 : vector<64x8xf32> to vector<64x8xbf16>
    %c7_427 = arith.constant 7 : index
    %c0_428 = arith.constant 0 : index
    %c0_429 = arith.constant 0 : index
    %442 = vector.load %arg7[%c7_427, %c0_428, %c0_429] : memref<9x8x4xbf16, #tpu.memory_space<vmem>>, vector<1x8x4xbf16>
    %443 = vector.shape_cast %442 : vector<1x8x4xbf16> to vector<8x4xbf16>
    %cst_430 = arith.constant dense<0.000000e+00> : vector<64x4xf32>
    %444 = tpu.matmul %441, %443, %cst_430 {dimension_numbers = #tpu.dot_dimension_numbers<[1], [0], [0], [1], [0, 0, 1, 1], [], []>} : vector<64x8xbf16>, vector<8x4xbf16>, vector<64x4xf32> -> vector<64x4xf32>
    %445 = arith.addf %437, %444 : vector<64x4xf32>
    %c0_431 = arith.constant 0 : index
    %c2_432 = arith.constant 2 : index
    %c2_433 = arith.constant 2 : index
    %c0_434 = arith.constant 0 : index
    %446 = vector.load %arg12[%c0_431, %c2_432, %c2_433, %c0_434] : memref<4x10x10x8xf32, #tpu.memory_space<vmem>>, vector<1x8x8x8xf32>
    %447 = vector.shape_cast %446 : vector<1x8x8x8xf32> to vector<8x8x8xf32>
    %448 = vector.shape_cast %447 : vector<8x8x8xf32> to vector<64x8xf32>
    %449 = arith.truncf %448 : vector<64x8xf32> to vector<64x8xbf16>
    %c8_435 = arith.constant 8 : index
    %c0_436 = arith.constant 0 : index
    %c0_437 = arith.constant 0 : index
    %450 = vector.load %arg7[%c8_435, %c0_436, %c0_437] : memref<9x8x4xbf16, #tpu.memory_space<vmem>>, vector<1x8x4xbf16>
    %451 = vector.shape_cast %450 : vector<1x8x4xbf16> to vector<8x4xbf16>
    %cst_438 = arith.constant dense<0.000000e+00> : vector<64x4xf32>
    %452 = tpu.matmul %449, %451, %cst_438 {dimension_numbers = #tpu.dot_dimension_numbers<[1], [0], [0], [1], [0, 0, 1, 1], [], []>} : vector<64x8xbf16>, vector<8x4xbf16>, vector<64x4xf32> -> vector<64x4xf32>
    %453 = arith.addf %445, %452 : vector<64x4xf32>
    %454 = tpu.concatenate %234, %307, %380, %453 in 0 : vector<64x4xf32>, vector<64x4xf32>, vector<64x4xf32>, vector<64x4xf32> -> vector<256x4xf32>
    %455 = tpu.transpose %454, [1, 0] : vector<256x4xf32> -> vector<4x256xf32>
    %c0_439 = arith.constant 0 : index
    %c0_440 = arith.constant 0 : index
    %456 = vector.load %arg8[%c0_439, %c0_440] : memref<4x1xf32, #tpu.memory_space<vmem>>, vector<4x1xf32>
    %457 = vector.broadcast %456 : vector<4x1xf32> to vector<4x256xf32>
    %458 = arith.addf %455, %457 : vector<4x256xf32>
    %cst_441 = arith.constant 0.000000e+00 : f32
    %459 = vector.broadcast %cst_441 : f32 to vector<4x256xf32>
    %460 = arith.cmpf ogt, %458, %459 : vector<4x256xf32>
    %cst_442 = arith.constant 0.00999999977 : f32
    %461 = vector.broadcast %cst_442 : f32 to vector<4x256xf32>
    %462 = arith.mulf %461, %458 : vector<4x256xf32>
    %463 = arith.select %460, %458, %462 : vector<4x256xi1>, vector<4x256xf32>
    %c0_443 = arith.constant 0 : index
    %c0_444 = arith.constant 0 : index
    %c0_445 = arith.constant 0 : index
    %464 = vector.load %arg9[%c0_443, %c0_444, %c0_445] : memref<1x4x256xf32, #tpu.memory_space<vmem>>, vector<1x4x256xf32>
    %465 = vector.shape_cast %464 : vector<1x4x256xf32> to vector<4x256xf32>
    %466 = vector.shape_cast %463 : vector<4x256xf32> to vector<1x4x256xf32>
    tpu.vector_store %arg9[%c0_443, %c0_444, %c0_445], %466 {strides = array<i32>} : memref<1x4x256xf32, #tpu.memory_space<vmem>>, vector<1x4x256xf32>,
    return
  }
  func.func @transform_0(%arg0: i32) -> (i32, i32, i32, i32) {
    %c0_i32 = arith.constant 0 : i32
    %c0_i32_0 = arith.constant 0 : i32
    %c0_i32_1 = arith.constant 0 : i32
    %c0_i32_2 = arith.constant 0 : i32
    return %arg0, %c0_i32, %c0_i32_0, %c0_i32_1 : i32, i32, i32, i32
  }
  func.func @transform_1(%arg0: i32) -> (i32, i32, i32, i32, i32) {
    %c0_i32 = arith.constant 0 : i32
    %c0_i32_0 = arith.constant 0 : i32
    %c0_i32_1 = arith.constant 0 : i32
    %c0_i32_2 = arith.constant 0 : i32
    %c0_i32_3 = arith.constant 0 : i32
    return %arg0, %c0_i32, %c0_i32_0, %c0_i32_1, %c0_i32_2 : i32, i32, i32, i32, i32
  }
  func.func @transform_2(%arg0: i32) -> (i32, i32, i32) {
    %c0_i32 = arith.constant 0 : i32
    %c0_i32_0 = arith.constant 0 : i32
    %c0_i32_1 = arith.constant 0 : i32
    %c0_i32_2 = arith.constant 0 : i32
    return %c0_i32, %c0_i32_0, %c0_i32_1 : i32, i32, i32
  }
  func.func @transform_3(%arg0: i32) -> (i32, i32) {
    %c0_i32 = arith.constant 0 : i32
    %c0_i32_0 = arith.constant 0 : i32
    %c0_i32_1 = arith.constant 0 : i32
    return %c0_i32, %c0_i32_0 : i32, i32
  }
  func.func @transform_4(%arg0: i32) -> (i32, i32, i32) {
    %c0_i32 = arith.constant 0 : i32
    %c0_i32_0 = arith.constant 0 : i32
    %c0_i32_1 = arith.constant 0 : i32
    %c0_i32_2 = arith.constant 0 : i32
    return %c0_i32, %c0_i32_0, %c0_i32_1 : i32, i32, i32
  }
  func.func @transform_5(%arg0: i32) -> (i32, i32) {
    %c0_i32 = arith.constant 0 : i32
    %c0_i32_0 = arith.constant 0 : i32
    %c0_i32_1 = arith.constant 0 : i32
    return %c0_i32, %c0_i32_0 : i32, i32
  }
  func.func @transform_6(%arg0: i32) -> (i32, i32, i32) {
    %c0_i32 = arith.constant 0 : i32
    %c0_i32_0 = arith.constant 0 : i32
    %c0_i32_1 = arith.constant 0 : i32
    %c0_i32_2 = arith.constant 0 : i32
    return %c0_i32, %c0_i32_0, %c0_i32_1 : i32, i32, i32
  }
  func.func @transform_7(%arg0: i32) -> (i32, i32) {
    %c0_i32 = arith.constant 0 : i32
    %c0_i32_0 = arith.constant 0 : i32
    %c0_i32_1 = arith.constant 0 : i32
    return %c0_i32, %c0_i32_0 : i32, i32
  }
  func.func @transform_8(%arg0: i32) -> (i32, i32, i32) {
    %c0_i32 = arith.constant 0 : i32
    %c0_i32_0 = arith.constant 0 : i32
    %c0_i32_1 = arith.constant 0 : i32
    return %arg0, %c0_i32, %c0_i32_0 : i32, i32, i32
  }
}

</mosaic_0001>

<bundles_post_ra>
// kernel: tile.8
= control target key start
LH: loop header
LB: loop body
LE: loop exit
PB: predicated region body
PF: predicated region fallthrough
CT: control target
= control target key end

     0   :  { %s22_s0 = inlined_call_operand.vmem [shape: f32[4], index: 0, kind: input, shape index: {}]   ;;  %s23_s1 = inlined_call_operand.vmem [shape: f32[4,4], index: 1, kind: output, shape index: {}]  }
   0x1   :  { %v4_v0 = vld [vmem:[%s22_s0] ss:$0 sm:$0xff] }
   0x2   :  { %5 = vst [vmem:[%s23_s1] sm:$0xf] %v4_v0 }

// kernel: tile.9
= control target key start
LH: loop header
LB: loop body
LE: loop exit
PB: predicated region body
PF: predicated region fallthrough
CT: control target
= control target key end

     0   :  { %vm8_vm0 = vcmask 31744   ;;  %s40_s8 = smov 4   ;;  %s41_s9 = smov 8   ;;  %vm14_vm1 = vcmask 130144   ;;  %vm20_vm2 = vcmask 97344   ;;  %vm26_vm3 = vcmask 64544   ;;  %s58_s0 = inlined_call_operand.vmem [shape: f32[4,4], index: 0, kind: input, shape index: {}]   ;;  %s59_s1 = inlined_call_operand.vmem [shape: f32[1,16], index: 1, kind: output, shape index: {}]  }
   0x1   :  { %v5_v0 = vld [vmem:[%s58_s0] sm:$0xf]  ;;  %s39_s0 = smov 12  }
   0x2   :  { %6 = vst [vmem:[#allocation1] sm:$0xf] %v5_v0 }
   0x9   :  { %v11_v1 = vld [vmem:[#allocation1 + $0x3] sm:$0x1]   ;;  %v23_v2 = vld [vmem:[#allocation1 + $0x1] sm:$0x1]   ;;  %v7_v3 = vld [vmem:[#allocation1] sm:$0x1]  }
   0xa   :  { %12 = vrot.lane.b32.xlu0 %v11_v1, %s39_s0  ;;  %24 = vrot.lane.b32.xlu1 %v23_v2, %s40_s8  ;;  %v17_v4 = vld [vmem:[#allocation1 + $0x2] sm:$0x1]   ;;  %9 = vst.msk [vmem:[#allocation0] sm:$0x1] %vm8_vm0, %v7_v3  }
   0xe   :  { %18 = vrot.lane.b32.xlu0 %v17_v4, %s41_s9 }
  0x7c   :  { %v13_v5 = vpop.permute.xlu0 %12   ;;  %v25_v6 = vpop.permute.xlu1 %24  }
  0x7d   :  { %15 = vst.msk [vmem:[#allocation0] sm:$0x1] %vm14_vm1, %v13_v5  }
  0x80   :  { %v19_v7 = vpop.permute.xlu0 %18  }
  0x81   :  { %21 = vst.msk [vmem:[#allocation0] sm:$0x1] %vm20_vm2, %v19_v7  }
  0x82   :  { %27 = vst.msk [vmem:[#allocation0] sm:$0x1] %vm26_vm3, %v25_v6  }
  0x89   :  { %v32_v8 = vld [vmem:[#allocation0] sm:$0x1] }
  0x8a   :  { %35 = vst [vmem:[%s59_s1] sm:$0x1] %v32_v8 }

// kernel: skip_block_forward.1
= control target key start
LH: loop header
LB: loop body
LE: loop exit
PB: predicated region body
PF: predicated region fallthrough
CT: control target
= control target key end

     0   :  { %s6984_s27 = smov 0   ;;  %s9041_s0 = inlined_call_operand.vmem [shape: bf16[2,10,10,8], index: 0, kind: input, shape index: {}]   ;;  %s9042_s1 = inlined_call_operand.vmem [shape: bf16[2,4,10,10,4], index: 1, kind: input, shape index: {}]   ;;  %s9043_s2 = inlined_call_operand.vmem [shape: bf16[9,8,4], index: 2, kind: input, shape index: {}]   ;;  %s9044_s3 = inlined_call_operand.vmem [shape: f32[1,4], index: 3, kind: input, shape index: {}]   ;;  %s9045_s4 = inlined_call_operand.vmem [shape: bf16[4,4,16], index: 4, kind: input, shape index: {}]   ;;  %s9046_s5 = inlined_call_operand.vmem [shape: f32[1,16], index: 5, kind: input, shape index: {}]   ;;  %s9047_s6 = inlined_call_operand.vmem [shape: bf16[9,8,4], index: 6, kind: input, shape index: {}]   ;;  %s9048_s7 = inlined_call_operand.vmem [shape: f32[4,1], index: 7, kind: input, shape index: {}]   ;;  %s9049_s8 = inlined_call_operand.vmem [shape: f32[2,4,256], index: 8, kind: output, shape index: {}]  }
   0x1 LB: > { %s5697_s28 = sadd.s32 4294967295, %s6931_s27   ;;  %p5701_p0 = scmp.ge.s32.totalorder %s6931_s27, 1  ;;  %s6931_s27 = sphi %s6984_s27, %s18_s27  }
   0x2   : > { %p272_p1 = scmp.lt.s32.totalorder %s6931_s27, 3 }
   0x4   : > { %p273_p2 = pnand %p5701_p0, %p272_p1 }
   0x6   : > { %276 = sbr.rel (%p273_p2) target bundleno = 1258 (0x4ea), region = 52 }
   0xb   : > { %v5706_v0 = vld [vmem:[%s9043_s2 + $0x4] sm:$0xf]  ;;  %vm428_vm0 = vcmask 1043456   ;;  %p311_p3 = scmp.lt.s32.totalorder %s5697_s28, 1  ;;  %v7001_v2 = vld [vmem:[%s9043_s2] sm:$0xf] }
   0xc   : > { %6664 = vmatprep.subr.msk.bf16.mxu1 %vm428_vm0, %v5706_v0  ;;  %6663 = vmatprep.subr.msk.bf16.mxu0 %vm428_vm0, %v5706_v0  ;;  %v430_v1 = vsel %vm428_vm0, %v5706_v0, 0  ;;  %v7006_v3 = vld [vmem:[%s9043_s2 + $0x8] sm:$0xf]  ;;  %vm367_vm1 = vcmask 64512   ;;  %vm369_vm2 = vcmask 58368   ;;  %v510_v57 = vsel %vm428_vm0, %v7001_v2, 0 }
   0xd   : > { %6662 = vmatpush3.bf16.msra.mxu1 %v430_v1  ;;  %6172 = vmatpush3.bf16.msra.mxu0 %v430_v1  ;;  %s9194_s28 = smov (!%p311_p3, %s5697_s28), 1  ;;  %v604_v53 = vsel %vm428_vm0, %v7006_v3, 0  ;;  %v5720_v59 = vld [vmem:[%s9043_s2 + $0xc] sm:$0xf]  ;;  %v5725_v62 = vld [vmem:[%s9043_s2 + $0x10] sm:$0xf] }
   0xe   : > { %6665 = vmatprep.subr.msk.bf16.mxu1 %vm428_vm0, %v7001_v2  ;;  %6666 = vmatprep.subr.msk.bf16.mxu0 %vm428_vm0, %v7006_v3  ;;  %s6713_s13 = smul.u32 80, %s9194_s28  ;;  %vm1332_vm3 = vcmask 31744   ;;  %vm1334_vm4 = vcmask 24576   ;;  %vm1399_vm5 = vcmask 1041408   ;;  %s6934_s21 = smov 4   ;;  %vm2121_vm14 = vcmask 64544  }
   0xf   : > { %s6714_s17 = smul.u32 320, %s9194_s28  ;;  %vm2123_vm15 = vcmask 58400   ;;  %s6935_s26 = smov 124  }
  0x10   : > { %s7018_s16 = scalar_lea.vmem %s9041_s0, %s6713_s13  ;;  %s6936_s29 = smov 120  }
  0x11   : > { %v327_v4 = vld [vmem:[%s7018_s16] ss:$8 sps:$4 sm:$0xff]   ;;  %v328_v5 = vld [vmem:[%s7018_s16 + $0x4] sm:$0x1]  ;;  %v330_v6 = vld [vmem:[%s7018_s16 + $0xc] sm:$0x1]  ;;  %s7376_s20 = scalar_lea.vmem %s9042_s1, %s6714_s17 }
  0x12   : > { %v347_v7 = vunpack.c.l.bf16 %v327_v4  ;;  %v348_v8 = vunpack.c.l.bf16 %v328_v5  ;;  %v349_v9 = vunpack.c.h.bf16 %v327_v4  ;;  %v350_v10 = vunpack.c.l.bf16 %v330_v6  ;;  %v335_v11 = vld [vmem:[%s7018_s16 + $0x20] ss:$8 sps:$4 sm:$0xff]   ;;  %v336_v12 = vld [vmem:[%s7018_s16 + $0x24] sm:$0x1]  ;;  %v338_v13 = vld [vmem:[%s7018_s16 + $0x2c] sm:$0x1] }
  0x13   : > { %v355_v14 = vunpack.c.l.bf16 %v335_v11  ;;  %v356_v15 = vunpack.c.l.bf16 %v336_v12  ;;  %v357_v16 = vunpack.c.h.bf16 %v335_v11  ;;  %v358_v17 = vunpack.c.l.bf16 %v338_v13  ;;  %v331_v18 = vld [vmem:[%s7018_s16 + $0x10] ss:$8 sps:$4 sm:$0xff]   ;;  %v332_v19 = vld [vmem:[%s7018_s16 + $0x14] sm:$0x1]  ;;  %v334_v20 = vld [vmem:[%s7018_s16 + $0x1c] sm:$0x1] }
  0x14   : > { %368 = vst.msk [vmem:[#allocation2] sm:$0xff] %vm367_vm1, %v347_v7  ;;  %371 = vst.msk [vmem:[#allocation2 + $0x10] sm:$0xff] %vm367_vm1, %v349_v9  ;;  %v351_v21 = vunpack.c.l.bf16 %v331_v18  ;;  %v352_v22 = vunpack.c.l.bf16 %v332_v19  ;;  %v353_v23 = vunpack.c.h.bf16 %v331_v18  ;;  %v354_v24 = vunpack.c.l.bf16 %v334_v20  ;;  %v339_v25 = vld [vmem:[%s7018_s16 + $0x30] ss:$8 sps:$4 sm:$0xff]   ;;  %v340_v26 = vld [vmem:[%s7018_s16 + $0x34] sm:$0x1] }
  0x15   : > { %370 = vst.msk [vmem:[#allocation2 + $0x8] sm:$0x3] %vm369_vm2, %v348_v8  ;;  %372 = vst.msk [vmem:[#allocation2 + $0x18] sm:$0x3] %vm369_vm2, %v350_v10  ;;  %v342_v27 = vld [vmem:[%s7018_s16 + $0x3c] sm:$0x1]  ;;  %v359_v28 = vunpack.c.l.bf16 %v339_v25  ;;  %v360_v29 = vunpack.c.l.bf16 %v340_v26  ;;  %v361_v30 = vunpack.c.h.bf16 %v339_v25 }
  0x16   : > { %377 = vst.msk [vmem:[#allocation2 + $0x40] sm:$0xff] %vm367_vm1, %v355_v14  ;;  %379 = vst.msk [vmem:[#allocation2 + $0x50] sm:$0xff] %vm367_vm1, %v357_v16  ;;  %v362_v31 = vunpack.c.l.bf16 %v342_v27  ;;  %v343_v32 = vld [vmem:[%s7018_s16 + $0x40] ss:$8 sps:$4 sm:$0xff]   ;;  %v344_v33 = vld [vmem:[%s7018_s16 + $0x44] sm:$0x1] }
  0x17   : > { %378 = vst.msk [vmem:[#allocation2 + $0x48] sm:$0x3] %vm369_vm2, %v356_v15  ;;  %380 = vst.msk [vmem:[#allocation2 + $0x58] sm:$0x3] %vm369_vm2, %v358_v17  ;;  %v346_v34 = vld [vmem:[%s7018_s16 + $0x4c] sm:$0x1]  ;;  %v363_v35 = vunpack.c.l.bf16 %v343_v32  ;;  %v364_v36 = vunpack.c.l.bf16 %v344_v33  ;;  %v365_v37 = vunpack.c.h.bf16 %v343_v32 }
  0x18   : > { %373 = vst.msk [vmem:[#allocation2 + $0x20] sm:$0xff] %vm367_vm1, %v351_v21  ;;  %375 = vst.msk [vmem:[#allocation2 + $0x30] sm:$0xff] %vm367_vm1, %v353_v23  ;;  %v366_v38 = vunpack.c.l.bf16 %v346_v34  ;;  %v809_v7 = vsel %vm428_vm0, %v5725_v62, 0  ;;  %v707_v9 = vsel %vm428_vm0, %v5720_v59, 0  ;;  %v5730_v11 = vld [vmem:[%s9043_s2 + $0x14] sm:$0xf] }
  0x19   : > { %374 = vst.msk [vmem:[#allocation2 + $0x28] sm:$0x3] %vm369_vm2, %v352_v22  ;;  %376 = vst.msk [vmem:[#allocation2 + $0x38] sm:$0x3] %vm369_vm2, %v354_v24  ;;  %v5735_v14 = vld [vmem:[%s9043_s2 + $0x18] sm:$0xf] }
  0x1a   : > { %381 = vst.msk [vmem:[#allocation2 + $0x60] sm:$0xff] %vm367_vm1, %v359_v28  ;;  %383 = vst.msk [vmem:[#allocation2 + $0x70] sm:$0xff] %vm367_vm1, %v361_v30  ;;  %v1014_v23 = vsel %vm428_vm0, %v5735_v14, 0  ;;  %v911_v25 = vsel %vm428_vm0, %v5730_v11, 0  ;;  %v5740_v27 = vld [vmem:[%s9043_s2 + $0x1c] sm:$0xf] }
  0x1b   : > { %382 = vst.msk [vmem:[#allocation2 + $0x68] sm:$0x3] %vm369_vm2, %v360_v29  ;;  %384 = vst.msk [vmem:[#allocation2 + $0x78] sm:$0x3] %vm369_vm2, %v362_v31  ;;  %v389_v41 = vld [vmem:[#allocation2] sm:$0xff]  ;;  %v390_v45 = vld [vmem:[#allocation2 + $0x10] sm:$0xff] }
  0x1c   : > { %385 = vst.msk [vmem:[#allocation2 + $0x80] sm:$0xff] %vm367_vm1, %v363_v35  ;;  %387 = vst.msk [vmem:[#allocation2 + $0x90] sm:$0xff] %vm367_vm1, %v365_v37  ;;  %v402_v39 = vld [vmem:[#allocation2 + $0x1] sm:$0xff]  ;;  %v7055_v40 = vld [vmem:[#allocation2 + $0x11] sm:$0xff]  ;;  %v397_v54 = vpack.c.bf16 %v390_v45, %v389_v41  ;;  %v1116_v37 = vsel %vm428_vm0, %v5740_v27, 0  ;;  %s6937_s30 = smov 116  }
  0x1d   : > { %386 = vst.msk [vmem:[#allocation2 + $0x88] sm:$0x3] %vm369_vm2, %v364_v36  ;;  %388 = vst.msk [vmem:[#allocation2 + $0x98] sm:$0x3] %vm369_vm2, %v366_v38  ;;  %v410_v42 = vpack.c.bf16 %v7055_v40, %v402_v39  ;;  %v577_v49 = vld [vmem:[#allocation2 + $0x2] sm:$0xff]  ;;  %v7078_v55 = vld [vmem:[#allocation2 + $0x12] sm:$0xff] }
  0x1e   : > { %v7058_v43 = vld [vmem:[#allocation2 + $0x41] sm:$0xff]  ;;  %v7060_v44 = vld [vmem:[#allocation2 + $0x51] sm:$0xff]  ;;  %v585_v58 = vpack.c.bf16 %v7078_v55, %v577_v49 }
  0x1f   : > { %v7064_v46 = vpack.c.bf16 %v7060_v44, %v7058_v43  ;;  %6173 = vmatprep.mubr.msk.bf16.mxu0 %vm367_vm1, %v410_v42  ;;  %v391_v63 = vld [vmem:[#allocation2 + $0x20] sm:$0xff]  ;;  %v392_v0 = vld [vmem:[#allocation2 + $0x30] sm:$0xff] }
  0x20   : > { %v404_v47 = vld [vmem:[#allocation2 + $0x21] sm:$0xff]  ;;  %v7066_v48 = vld [vmem:[#allocation2 + $0x31] sm:$0xff]  ;;  %v398_v6 = vpack.c.bf16 %v392_v0, %v391_v63  ;;  %v688_v20 = vpack.c.bf16 %v391_v63, %v390_v45 }
  0x21   : > { %v7070_v50 = vpack.c.bf16 %v7066_v48, %v404_v47  ;;  %6177 = vmatprep.mubr.msk.bf16.mxu1 %vm367_vm1, %v7064_v46  ;;  %v7096_v60 = vld [vmem:[#allocation2 + $0x22] sm:$0xff]  ;;  %v7098_v61 = vld [vmem:[#allocation2 + $0x32] sm:$0xff]  ;;  %v790_v19 = vpack.c.bf16 %v404_v47, %v7055_v40  ;;  %v791_v21 = vpack.c.bf16 %v7058_v43, %v7066_v48  ;;  %v6933_v47 = vmov 0.0   ;;  %v1372_v49 = vld [vmem:[%s9045_s4] sm:$0x3] }
  0x22   : > { %v7072_v51 = vld [vmem:[#allocation2 + $0x61] sm:$0xff]  ;;  %v7074_v52 = vld [vmem:[#allocation2 + $0x71] sm:$0xff]  ;;  %v7108_v3 = vpack.c.bf16 %v7098_v61, %v7096_v60  ;;  %v892_v33 = vpack.c.bf16 %v7096_v60, %v7078_v55  ;;  %1338 = vst.msk [vmem:[#allocation3 + $0x20] sm:$0xff] %vm1332_vm3, %v6933_v47  ;;  %1333 = vst.msk [vmem:[#allocation3] sm:$0xff] %vm1332_vm3, %v6933_v47 }
  0x23   : > { %v7084_v56 = vpack.c.bf16 %v7074_v52, %v7072_v51  ;;  %6174 = vmatmul.mubr.msk.bf16.vlgmr.msra.gmra.mxu0 %vm367_vm1, %v7070_v50  ;;  %v393_v1 = vld [vmem:[#allocation2 + $0x40] sm:$0xff]  ;;  %v394_v2 = vld [vmem:[#allocation2 + $0x50] sm:$0xff]  ;;  %v792_v26 = vpack.c.bf16 %v7072_v51, %v7060_v44  ;;  %1336 = vst.msk [vmem:[#allocation3 + $0x10] sm:$0xff] %vm1332_vm3, %v6933_v47  ;;  %1340 = vst.msk [vmem:[#allocation3 + $0x30] sm:$0xff] %vm1332_vm3, %v6933_v47 }
  0x24   : > { %6192 = vmatpush3.bf16.msra.mxu0 %v604_v53  ;;  %6193 = vmatprep.mubr.msk.bf16.mxu0 %vm367_vm1, %v585_v58  ;;  %v581_v4 = vld [vmem:[#allocation2 + $0x42] sm:$0xff]  ;;  %v7111_v5 = vld [vmem:[#allocation2 + $0x52] sm:$0xff]  ;;  %v399_v8 = vpack.c.bf16 %v394_v2, %v393_v1  ;;  %v689_v22 = vpack.c.bf16 %v393_v1, %v392_v0  ;;  %1342 = vst.msk [vmem:[#allocation3 + $0x40] sm:$0xff] %vm1332_vm3, %v6933_v47  ;;  %1344 = vst.msk [vmem:[#allocation3 + $0x50] sm:$0xff] %vm1332_vm3, %v6933_v47 }
  0x25   : > { %6178 = vmatmul.mubr.msk.bf16.vlgmr.msra.gmra.mxu1 %vm367_vm1, %v7084_v56  ;;  %6668 = vmatprep.subr.msk.bf16.mxu0 %vm428_vm0, %v5725_v62  ;;  %v7116_v10 = vpack.c.bf16 %v7111_v5, %v581_v4  ;;  %v583_v12 = vld [vmem:[#allocation2 + $0x62] sm:$0xff]  ;;  %v584_v13 = vld [vmem:[#allocation2 + $0x72] sm:$0xff]  ;;  %v893_v34 = vpack.c.bf16 %v581_v4, %v7098_v61  ;;  %1346 = vst.msk [vmem:[#allocation3 + $0x60] sm:$0xff] %vm1332_vm3, %v6933_v47  ;;  %1348 = vst.msk [vmem:[#allocation3 + $0x70] sm:$0xff] %vm1332_vm3, %v6933_v47 }
  0x26   : > { %6182 = vmatpush3.bf16.msra.mxu1 %v510_v57  ;;  %6183 = vmatprep.mubr.msk.bf16.mxu1 %vm367_vm1, %v397_v54  ;;  %v395_v15 = vld [vmem:[#allocation2 + $0x60] sm:$0xff]  ;;  %v396_v16 = vld [vmem:[#allocation2 + $0x70] sm:$0xff]  ;;  %v588_v17 = vpack.c.bf16 %v584_v13, %v583_v12  ;;  %v894_v36 = vpack.c.bf16 %v583_v12, %v7111_v5  ;;  %1350 = vst.msk [vmem:[#allocation3 + $0x80] sm:$0xff] %vm1332_vm3, %v6933_v47  ;;  %v1914_v55 = vld [vmem:[%s7376_s20 + $0xa8] ss:$16 sps:$4 sm:$0xff]  }
  0x27   : > { %6667 = vmatprep.subr.msk.bf16.mxu1 %vm428_vm0, %v5720_v59  ;;  %v400_v18 = vpack.c.bf16 %v396_v16, %v395_v15  ;;  %v690_v24 = vpack.c.bf16 %v395_v15, %v394_v2  ;;  %v789_v28 = vld [vmem:[#allocation2 + $0x81] sm:$0xff]  ;;  %v994_v38 = vld [vmem:[#allocation2 + $0x90] sm:$0xff]  ;;  %1794 = vst.msk [vmem:[#allocation4 + $0x10] sm:$0xff] %vm367_vm1, %v6933_v47  ;;  %1796 = vst.msk [vmem:[#allocation4 + $0x20] sm:$0xff] %vm367_vm1, %v6933_v47  ;;  %v1994_v57 = vunpack.c.l.bf16 %v1914_v55  ;;  %v1998_v60 = vunpack.c.h.bf16 %v1914_v55 }
  0x28   : > { %v5745_v29 = vld [vmem:[%s9043_s2 + $0x20] sm:$0xf]  ;;  %v793_v31 = vpack.c.bf16 %v789_v28, %v7074_v52  ;;  %v1198_v42 = vld [vmem:[#allocation2 + $0x92] sm:$0xff]  ;;  %1795 = vst.msk [vmem:[#allocation4 + $0x18] sm:$0x3] %vm369_vm2, %v6933_v47 }
  0x29   : > { %v687_v30 = vld [vmem:[#allocation2 + $0x80] sm:$0xff]  ;;  %v1218_v35 = vsel %vm428_vm0, %v5745_v29, 0  ;;  %v1096_v43 = vld [vmem:[#allocation2 + $0x91] sm:$0xff]  ;;  %1797 = vst.msk [vmem:[#allocation4 + $0x28] sm:$0x3] %vm369_vm2, %v6933_v47 }
  0x2a   : > { %v691_v32 = vpack.c.bf16 %v687_v30, %v396_v16  ;;  %v891_v39 = vld [vmem:[#allocation2 + $0x82] sm:$0xff]  ;;  %v998_v40 = vpack.c.bf16 %v994_v38, %v687_v30  ;;  %v1100_v45 = vpack.c.bf16 %v1096_v43, %v789_v28  ;;  %1798 = vst.msk [vmem:[#allocation4 + $0x30] sm:$0xff] %vm367_vm1, %v6933_v47  ;;  %1800 = vst.msk [vmem:[#allocation4 + $0x40] sm:$0xff] %vm367_vm1, %v6933_v47  ;;  %v1919_v59 = vld [vmem:[%s7376_s20 + $0xbc] sm:$0x1] }
  0x2b   : > { %6194 = vmatmul.mubr.msk.bf16.vlgmr.msra.gmra.mxu0 %vm367_vm1, %v7108_v3  ;;  %v895_v41 = vpack.c.bf16 %v891_v39, %v584_v13  ;;  %v1202_v44 = vpack.c.bf16 %v1198_v42, %v891_v39  ;;  %1799 = vst.msk [vmem:[#allocation4 + $0x38] sm:$0x3] %vm369_vm2, %v6933_v47  ;;  %1801 = vst.msk [vmem:[#allocation4 + $0x48] sm:$0x3] %vm369_vm2, %v6933_v47  ;;  %v5760_v51 = vld [vmem:[%s9045_s4 + $0x4] sm:$0x3]  ;;  %v1999_v61 = vunpack.c.l.bf16 %v1919_v59 }
  0x2c   : > { %6212 = vmatpush3.bf16.msra.mxu0 %v809_v7  ;;  %6197 = vmatprep.mubr.msk.bf16.mxu0 %vm367_vm1, %v7116_v10  ;;  %1802 = vst.msk [vmem:[#allocation4 + $0x50] sm:$0xff] %vm367_vm1, %v6933_v47  ;;  %1804 = vst.msk [vmem:[#allocation4 + $0x60] sm:$0xff] %vm367_vm1, %v6933_v47  ;;  %v7365_v52 = vsel %vm1399_vm5, %v5760_v51, 0  ;;  %v5765_v53 = vld [vmem:[%s9045_s4 + $0x6] sm:$0x3] }
  0x2d   : > { %6184 = vmatmul.mubr.msk.bf16.vlgmr.msra.gmra.mxu1 %vm367_vm1, %v398_v6  ;;  %6670 = vmatprep.subr.msk.bf16.mxu0 %vm428_vm0, %v5735_v14  ;;  %1803 = vst.msk [vmem:[#allocation4 + $0x58] sm:$0x3] %vm369_vm2, %v6933_v47  ;;  %1805 = vst.msk [vmem:[#allocation4 + $0x68] sm:$0x3] %vm369_vm2, %v6933_v47  ;;  %v7370_v54 = vsel %vm1399_vm5, %v5765_v53, 0 }
  0x2e   : > { %6202 = vmatpush3.bf16.msra.mxu1 %v707_v9  ;;  %6187 = vmatprep.mubr.msk.bf16.mxu1 %vm367_vm1, %v399_v8  ;;  %1806 = vst.msk [vmem:[#allocation4 + $0x70] sm:$0xff] %vm367_vm1, %v6933_v47  ;;  %1808 = vst.msk [vmem:[#allocation4 + $0x80] sm:$0xff] %vm367_vm1, %v6933_v47  ;;  %v1932_v62 = vld [vmem:[%s7376_s20 + $0xf0] ss:$8 sps:$4 sm:$0xff]   ;;  %v1913_v1 = vld [vmem:[%s7376_s20 + $0xa4] sm:$0x1] }
  0x2f   : > { %6669 = vmatprep.subr.msk.bf16.mxu1 %vm428_vm0, %v5730_v11  ;;  %1807 = vst.msk [vmem:[#allocation4 + $0x78] sm:$0x3] %vm369_vm2, %v6933_v47  ;;  %1809 = vst.msk [vmem:[#allocation4 + $0x88] sm:$0x3] %vm369_vm2, %v6933_v47  ;;  %v1912_v63 = vld [vmem:[%s7376_s20 + $0xa0] ss:$112 sps:$4 sm:$0xff]   ;;  %v1993_v5 = vunpack.c.l.bf16 %v1913_v1  ;;  %v2012_v7 = vunpack.c.l.bf16 %v1932_v62 }
  0x30   : > { %1810 = vst.msk [vmem:[#allocation4 + $0x90] sm:$0xff] %vm367_vm1, %v6933_v47  ;;  %1814 = vst.msk [vmem:[#allocation4 + $0xb0] sm:$0xff] %vm367_vm1, %v6933_v47  ;;  %v1942_v2 = vld [vmem:[%s7376_s20 + $0xb0] ss:$104 sps:$4 sm:$0xff]   ;;  %v1992_v4 = vunpack.c.l.bf16 %v1912_v63  ;;  %v1936_v9 = vld [vmem:[%s7376_s20 + $0x100] ss:$8 sps:$4 sm:$0xff]  }
  0x31   : > { %1811 = vst.msk [vmem:[#allocation4 + $0x98] sm:$0x3] %vm369_vm2, %v6933_v47  ;;  %1815 = vst.msk [vmem:[#allocation4 + $0xb8] sm:$0x3] %vm369_vm2, %v6933_v47  ;;  %v1921_v11 = vld [vmem:[%s7376_s20 + $0xc4] sm:$0x1]  ;;  %v1996_v13 = vunpack.c.l.bf16 %v1942_v2  ;;  %v2016_v16 = vunpack.c.l.bf16 %v1936_v9  ;;  %v2022_v28 = vunpack.c.h.bf16 %v1942_v2 }
  0x32   : > { %1816 = vst.msk [vmem:[#allocation4 + $0xc0] sm:$0xff] %vm367_vm1, %v6933_v47  ;;  %1818 = vst.msk [vmem:[#allocation4 + $0xd0] sm:$0xff] %vm367_vm1, %v6933_v47  ;;  %v6729_v12 = vpack.i.bf16 %v1993_v5, %v1992_v4  ;;  %v1935_v30 = vld [vmem:[%s7376_s20 + $0xfc] sm:$0x1] }
  0x33   : > { %6198 = vmatmul.mubr.msk.bf16.gmra.mxu0 %vm367_vm1, %v588_v17  ;;  %1817 = vst.msk [vmem:[#allocation4 + $0xc8] sm:$0x3] %vm369_vm2, %v6933_v47  ;;  %1819 = vst.msk [vmem:[#allocation4 + $0xd8] sm:$0x3] %vm369_vm2, %v6933_v47 }
  0x34   : > { %6213 = vmatprep.mubr.msk.bf16.mxu0 %vm367_vm1, %v790_v19  ;;  %1820 = vst.msk [vmem:[#allocation4 + $0xe0] sm:$0xff] %vm367_vm1, %v6933_v47  ;;  %1822 = vst.msk [vmem:[#allocation4 + $0xf0] sm:$0xff] %vm367_vm1, %v6933_v47  ;;  %6730 = vrot.lane.b32.xlu1 %v6729_v12, %s6934_s21 }
  0x35   : > { %6188 = vmatmul.mubr.msk.bf16.gmra.mxu1 %vm367_vm1, %v400_v18  ;;  %1821 = vst.msk [vmem:[#allocation4 + $0xe8] sm:$0x3] %vm369_vm2, %v6933_v47  ;;  %1823 = vst.msk [vmem:[#allocation4 + $0xf8] sm:$0x3] %vm369_vm2, %v6933_v47 }
  0x36   : > { %6203 = vmatprep.mubr.msk.bf16.mxu1 %vm367_vm1, %v688_v20  ;;  %1824 = vst.msk [vmem:[#allocation4 + $0x100] sm:$0xff] %vm367_vm1, %v6933_v47  ;;  %1826 = vst.msk [vmem:[#allocation4 + $0x110] sm:$0xff] %vm367_vm1, %v6933_v47  ;;  %v2001_v20 = vunpack.c.l.bf16 %v1921_v11 }
  0x37   : > { %1825 = vst.msk [vmem:[#allocation4 + $0x108] sm:$0x3] %vm369_vm2, %v6933_v47  ;;  %1827 = vst.msk [vmem:[#allocation4 + $0x118] sm:$0x3] %vm369_vm2, %v6933_v47 }
  0x38   : > { %1828 = vst.msk [vmem:[#allocation4 + $0x120] sm:$0xff] %vm367_vm1, %v6933_v47  ;;  %1830 = vst.msk [vmem:[#allocation4 + $0x130] sm:$0xff] %vm367_vm1, %v6933_v47 }
  0x39   : > { %1829 = vst.msk [vmem:[#allocation4 + $0x128] sm:$0x3] %vm369_vm2, %v6933_v47  ;;  %1831 = vst.msk [vmem:[#allocation4 + $0x138] sm:$0x3] %vm369_vm2, %v6933_v47 }
  0x3a   : > { %1832 = vst.msk [vmem:[#allocation4 + $0x140] sm:$0xff] %vm367_vm1, %v6933_v47  ;;  %1834 = vst.msk [vmem:[#allocation4 + $0x150] sm:$0xff] %vm367_vm1, %v6933_v47 }
  0x3b   : > { %6214 = vmatmul.mubr.msk.bf16.vlgmr.msra.gmra.mxu0 %vm367_vm1, %v791_v21  ;;  %1833 = vst.msk [vmem:[#allocation4 + $0x148] sm:$0x3] %vm369_vm2, %v6933_v47  ;;  %1835 = vst.msk [vmem:[#allocation4 + $0x158] sm:$0x3] %vm369_vm2, %v6933_v47  ;;  %v1925_v21 = vld [vmem:[%s7376_s20 + $0xd4] sm:$0x1] }
  0x3c   : > { %6232 = vmatpush3.bf16.msra.mxu0 %v1014_v23  ;;  %6217 = vmatprep.mubr.msk.bf16.mxu0 %vm367_vm1, %v792_v26  ;;  %1836 = vst.msk [vmem:[#allocation4 + $0x160] sm:$0xff] %vm367_vm1, %v6933_v47  ;;  %1838 = vst.msk [vmem:[#allocation4 + $0x170] sm:$0xff] %vm367_vm1, %v6933_v47 }
  0x3d   : > { %6204 = vmatmul.mubr.msk.bf16.vlgmr.msra.gmra.mxu1 %vm367_vm1, %v689_v22  ;;  %6672 = vmatprep.subr.msk.bf16.mxu0 %vm428_vm0, %v5745_v29  ;;  %1837 = vst.msk [vmem:[#allocation4 + $0x168] sm:$0x3] %vm369_vm2, %v6933_v47  ;;  %1839 = vst.msk [vmem:[#allocation4 + $0x178] sm:$0x3] %vm369_vm2, %v6933_v47  ;;  %v1933_v29 = vld [vmem:[%s7376_s20 + $0xf4] sm:$0x1] }
  0x3e   : > { %6222 = vmatpush3.bf16.msra.mxu1 %v911_v25  ;;  %6207 = vmatprep.mubr.msk.bf16.mxu1 %vm367_vm1, %v690_v24  ;;  %1840 = vst.msk [vmem:[#allocation4 + $0x180] sm:$0xff] %vm367_vm1, %v6933_v47  ;;  %1842 = vst.msk [vmem:[#allocation4 + $0x190] sm:$0xff] %vm367_vm1, %v6933_v47  ;;  %v2005_v25 = vunpack.c.l.bf16 %v1925_v21 }
  0x3f   : > { %6671 = vmatprep.subr.msk.bf16.mxu1 %vm428_vm0, %v5740_v27  ;;  %1841 = vst.msk [vmem:[#allocation4 + $0x188] sm:$0x3] %vm369_vm2, %v6933_v47  ;;  %1843 = vst.msk [vmem:[#allocation4 + $0x198] sm:$0x3] %vm369_vm2, %v6933_v47  ;;  %v2020_v27 = vunpack.c.h.bf16 %v1912_v63 }
  0x40   : > { %1844 = vst.msk [vmem:[#allocation4 + $0x1a0] sm:$0xff] %vm367_vm1, %v6933_v47  ;;  %1846 = vst.msk [vmem:[#allocation4 + $0x1b0] sm:$0xff] %vm367_vm1, %v6933_v47 }
  0x41   : > { %1845 = vst.msk [vmem:[#allocation4 + $0x1a8] sm:$0x3] %vm369_vm2, %v6933_v47  ;;  %1847 = vst.msk [vmem:[#allocation4 + $0x1b8] sm:$0x3] %vm369_vm2, %v6933_v47 }
  0x42   : > { %1848 = vst.msk [vmem:[#allocation4 + $0x1c0] sm:$0xff] %vm367_vm1, %v6933_v47  ;;  %1852 = vst.msk [vmem:[#allocation4 + $0x1e0] sm:$0xff] %vm367_vm1, %v6933_v47 }
  0x43   : > { %6218 = vmatmul.mubr.msk.bf16.gmra.mxu0 %vm367_vm1, %v793_v31  ;;  %1849 = vst.msk [vmem:[#allocation4 + $0x1c8] sm:$0x3] %vm369_vm2, %v6933_v47  ;;  %1853 = vst.msk [vmem:[#allocation4 + $0x1e8] sm:$0x3] %vm369_vm2, %v6933_v47 }
  0x44   : > { %6233 = vmatprep.mubr.msk.bf16.mxu0 %vm367_vm1, %v398_v6  ;;  %1854 = vst.msk [vmem:[#allocation4 + $0x1f0] sm:$0xff] %vm367_vm1, %v6933_v47  ;;  %1856 = vst.msk [vmem:[#allocation4 + $0x200] sm:$0xff] %vm367_vm1, %v6933_v47  ;;  %v6744_v6 = vpack.i.bf16 %v1999_v61, %v1998_v60 }
  0x45   : > { %6208 = vmatmul.mubr.msk.bf16.gmra.mxu1 %vm367_vm1, %v691_v32  ;;  %1855 = vst.msk [vmem:[#allocation4 + $0x1f8] sm:$0x3] %vm369_vm2, %v6933_v47  ;;  %1857 = vst.msk [vmem:[#allocation4 + $0x208] sm:$0x3] %vm369_vm2, %v6933_v47 }
  0x46   : > { %6223 = vmatprep.mubr.msk.bf16.mxu1 %vm367_vm1, %v892_v33  ;;  %1858 = vst.msk [vmem:[#allocation4 + $0x210] sm:$0xff] %vm367_vm1, %v6933_v47  ;;  %1860 = vst.msk [vmem:[#allocation4 + $0x220] sm:$0xff] %vm367_vm1, %v6933_v47 }
  0x47   : > { %1859 = vst.msk [vmem:[#allocation4 + $0x218] sm:$0x3] %vm369_vm2, %v6933_v47  ;;  %1861 = vst.msk [vmem:[#allocation4 + $0x228] sm:$0x3] %vm369_vm2, %v6933_v47 }
  0x48   : > { %1862 = vst.msk [vmem:[#allocation4 + $0x230] sm:$0xff] %vm367_vm1, %v6933_v47  ;;  %1864 = vst.msk [vmem:[#allocation4 + $0x240] sm:$0xff] %vm367_vm1, %v6933_v47 }
  0x49   : > { %1863 = vst.msk [vmem:[#allocation4 + $0x238] sm:$0x3] %vm369_vm2, %v6933_v47  ;;  %1865 = vst.msk [vmem:[#allocation4 + $0x248] sm:$0x3] %vm369_vm2, %v6933_v47 }
  0x4a   : > { %1866 = vst.msk [vmem:[#allocation4 + $0x250] sm:$0xff] %vm367_vm1, %v6933_v47  ;;  %1868 = vst.msk [vmem:[#allocation4 + $0x260] sm:$0xff] %vm367_vm1, %v6933_v47 }
  0x4b   : > { %6234 = vmatmul.mubr.msk.bf16.vlgmr.msra.gmra.mxu0 %vm367_vm1, %v399_v8  ;;  %1867 = vst.msk [vmem:[#allocation4 + $0x258] sm:$0x3] %vm369_vm2, %v6933_v47  ;;  %1869 = vst.msk [vmem:[#allocation4 + $0x268] sm:$0x3] %vm369_vm2, %v6933_v47  ;;  %v2014_v8 = vunpack.c.h.bf16 %v1932_v62 }
  0x4c   : > { %6252 = vmatpush3.bf16.msra.mxu0 %v1218_v35  ;;  %6237 = vmatprep.mubr.msk.bf16.mxu0 %vm367_vm1, %v400_v18  ;;  %1335 = vst.msk [vmem:[#allocation3 + $0x8] sm:$0x1] %vm1334_vm4, %v6933_v47  ;;  %1337 = vst.msk [vmem:[#allocation3 + $0x18] sm:$0x1] %vm1334_vm4, %v6933_v47  ;;  %v2013_v35 = vunpack.c.l.bf16 %v1933_v29 }
  0x4d   : > { %6224 = vmatmul.mubr.msk.bf16.vlgmr.msra.gmra.mxu1 %vm367_vm1, %v893_v34  ;;  %1339 = vst.msk [vmem:[#allocation3 + $0x28] sm:$0x1] %vm1334_vm4, %v6933_v47  ;;  %1341 = vst.msk [vmem:[#allocation3 + $0x38] sm:$0x1] %vm1334_vm4, %v6933_v47  ;;  %6674 = vmatprep.subr.msk.bf16.mxu0 %vm1399_vm5, %v1372_v49  ;;  %v6749_v18 = vpack.i.bf16 %v2014_v8, %v2012_v7  ;;  %v6779_v34 = vpack.i.bf16 %v2022_v28, %v2020_v27 }
  0x4e   : > { %6242 = vmatpush3.bf16.msra.mxu1 %v1116_v37  ;;  %6227 = vmatprep.mubr.msk.bf16.mxu1 %vm367_vm1, %v894_v36  ;;  %1343 = vst.msk [vmem:[#allocation3 + $0x48] sm:$0x1] %vm1334_vm4, %v6933_v47  ;;  %1345 = vst.msk [vmem:[#allocation3 + $0x58] sm:$0x1] %vm1334_vm4, %v6933_v47  ;;  %v2015_v36 = vunpack.c.l.bf16 %v1935_v30 }
  0x4f   : > { %1347 = vst.msk [vmem:[#allocation3 + $0x68] sm:$0x1] %vm1334_vm4, %v6933_v47  ;;  %1349 = vst.msk [vmem:[#allocation3 + $0x78] sm:$0x1] %vm1334_vm4, %v6933_v47 }
  0x50   : > { %1351 = vst.msk [vmem:[#allocation3 + $0x88] sm:$0x1] %vm1334_vm4, %v6933_v47 }
  0x53   : > { %6238 = vmatmul.mubr.msk.bf16.gmra.mxu0 %vm367_vm1, %v998_v40 }
  0x54   : > { %6253 = vmatprep.mubr.msk.bf16.mxu0 %vm367_vm1, %v7108_v3  ;;  %v1917_v3 = vld [vmem:[%s7376_s20 + $0xb4] sm:$0x1] }
  0x55   : > { %6228 = vmatmul.mubr.msk.bf16.gmra.mxu1 %vm367_vm1, %v895_v41  ;;  %v1997_v14 = vunpack.c.l.bf16 %v1917_v3  ;;  %v6789_v41 = vpack.i.bf16 %v2015_v36, %v2013_v35 }
  0x56   : > { %6243 = vmatprep.mubr.msk.bf16.mxu1 %vm367_vm1, %v7070_v50  ;;  %v1481_v50 = vsel %vm1399_vm5, %v1372_v49, 0 }
  0x57   : > { %v6739_v15 = vpack.i.bf16 %v1997_v14, %v1996_v13 }
  0x59   : > { %6740 = vrot.lane.b32.xlu1 %v6739_v15, %s6934_s21 }
  0x5b   : > { %6254 = vmatmul.mubr.msk.bf16.vlgmr.msra.gmra.mxu0 %vm367_vm1, %v7116_v10  ;;  %v1920_v10 = vld [vmem:[%s7376_s20 + $0xc0] ss:$16 sps:$4 sm:$0xff]  }
  0x5c   : > { %6257 = vmatprep.mubr.msk.bf16.mxu0 %vm367_vm1, %v588_v17  ;;  %6272 = vmatpush3.bf16.msra.mxu0 %v1481_v50  ;;  %v2018_v17 = vunpack.c.h.bf16 %v1936_v9  ;;  %v2000_v19 = vunpack.c.l.bf16 %v1920_v10  ;;  %v2004_v24 = vunpack.c.h.bf16 %v1920_v10 }
  0x5d   : > { %6244 = vmatmul.mubr.msk.bf16.vlgmr.msra.gmra.mxu1 %vm367_vm1, %v7064_v46  ;;  %v5751_v46 = vld [vmem:[%s9045_s4 + $0x2] sm:$0x3]  ;;  %6676 = vmatprep.subr.msk.bf16.mxu0 %vm1399_vm5, %v5765_v53 }
  0x5e   : > { %6247 = vmatprep.mubr.msk.bf16.mxu1 %vm367_vm1, %v7084_v56  ;;  %6673 = vmatprep.subr.msk.bf16.mxu1 %vm1399_vm5, %v5751_v46  ;;  %v1401_v48 = vsel %vm1399_vm5, %v5751_v46, 0  ;;  %v1915_v56 = vld [vmem:[%s7376_s20 + $0xac] sm:$0x1]  ;;  %v6754_v22 = vpack.i.bf16 %v2018_v17, %v2016_v16  ;;  %v6759_v23 = vpack.i.bf16 %v2001_v20, %v2000_v19  ;;  %v6769_v26 = vpack.i.bf16 %v2005_v25, %v2004_v24 }
  0x5f   : > { %6262 = vmatpush3.bf16.msra.mxu1 %v1401_v48  ;;  %v1995_v58 = vunpack.c.l.bf16 %v1915_v56 }
  0x60   : > { %6675 = vmatprep.subr.msk.bf16.mxu1 %vm1399_vm5, %v5760_v51  ;;  %6755 = vrot.lane.b32.xlu1 %v6754_v22, %s6934_s21 }
  0x61   : > { %v6734_v0 = vpack.i.bf16 %v1995_v58, %v1994_v57 }
  0x63   : > { %6258 = vmatmul.mubr.msk.bf16.gmra.mxu0 %vm367_vm1, %v1202_v44  ;;  %6735 = vrot.lane.b32.xlu0 %v6734_v0, %s6934_s21 }
  0x65   : > { %6248 = vmatmul.mubr.msk.bf16.gmra.mxu1 %vm367_vm1, %v1100_v45 }
  0x67   : > { %6745 = vrot.lane.b32.xlu0 %v6744_v6, %s6934_s21 }
  0x6b   : > { %6750 = vrot.lane.b32.xlu0 %v6749_v18, %s6934_s21 }
  0x6f   : > { %6760 = vrot.lane.b32.xlu0 %v6759_v23, %s6934_s21 }
  0x73   : > { %6770 = vrot.lane.b32.xlu0 %v6769_v26, %s6934_s21 }
  0x77   : > { %6780 = vrot.lane.b32.xlu0 %v6779_v34, %s6934_s21 }
  0x7b   : > { %6790 = vrot.lane.b32.xlu0 %v6789_v41, %s6934_s21 }
  0xe3   : > { %v6175_v31 = vpop.f32.mrf.mxu0 }
  0xe5   : > { %v7399_v32 = vpop.f32.mrf.mxu1  ;;  %v466_v33 = vpop.f32.mrf.mxu0 }
  0xe7   : > { %v482_v37 = vpop.f32.mrf.mxu1  ;;  %v6176_v38 = vpop.f32.mrf.mxu0 }
  0xe9   : > { %v7402_v39 = vpop.f32.mrf.mxu1  ;;  %v469_v40 = vpop.f32.mrf.mxu0 }
  0xeb   : > { %v7405_v42 = vpop.f32.mrf.mxu1  ;;  %v6195_v43 = vpop.f32.mrf.mxu0 }
  0xed   : > { %v6185_v44 = vpop.f32.mrf.mxu1  ;;  %v640_v45 = vpop.f32.mrf.mxu0 }
  0xee   : > { %v555_v13 = vadd.f32 %v6185_v44, %v6175_v31 }
  0xef   : > { %v546_v47 = vpop.f32.mrf.mxu1  ;;  %v6196_v46 = vpop.f32.mrf.mxu0 }
  0xf0   : > { %v547_v16 = vadd.f32 %v546_v47, %v466_v33  ;;  %v673_v19 = vadd.f32 %v6195_v43, %v555_v13 }
  0xf1   : > { %v6186_v48 = vpop.f32.mrf.mxu1  ;;  %v643_v49 = vpop.f32.mrf.mxu0 }
  0xf2   : > { %v558_v20 = vadd.f32 %v6186_v48, %v6176_v38  ;;  %v671_v23 = vadd.f32 %v640_v45, %v547_v16 }
  0xf3   : > { %v549_v50 = vpop.f32.mrf.mxu1  ;;  %v6199_v51 = vpop.f32.mrf.mxu0 }
  0xf4   : > { %v550_v26 = vadd.f32 %v549_v50, %v469_v40  ;;  %v674_v28 = vadd.f32 %v6196_v46, %v558_v20 }
  0xf5   : > { %v6189_v53 = vpop.f32.mrf.mxu1  ;;  %v656_v55 = vpop.f32.mrf.mxu0 }
  0xf6   : > { %v571_v34 = vadd.f32 %v6189_v53, %v7399_v32  ;;  %v672_v44 = vadd.f32 %v643_v49, %v550_v26 }
  0xf7   : > { %v562_v56 = vpop.f32.mrf.mxu1  ;;  %v6200_v57 = vpop.f32.mrf.mxu0 }
  0xf8   : > { %v563_v31 = vadd.f32 %v562_v56, %v482_v37 }
  0xf9   : > { %v6190_v58 = vpop.f32.mrf.mxu1  ;;  %v7408_v59 = vpop.f32.mrf.mxu0 }
  0xfa   : > { %v574_v38 = vadd.f32 %v6190_v58, %v7402_v39  ;;  %v675_v40 = vadd.f32 %v656_v55, %v563_v31 }
  0xfb   : > { %v565_v60 = vpop.f32.mrf.mxu1  ;;  %v6215_v61 = vpop.f32.mrf.mxu0 }
  0xfc   : > { %v566_v46 = vadd.f32 %v565_v60, %v7405_v42  ;;  %v678_v53 = vadd.f32 %v6200_v57, %v574_v38  ;;  %v7423_v57 = vld [vmem:[%s9044_s3] ss:$0 sm:$0xff] }
  0xfd   : > { %v6205_v62 = vpop.f32.mrf.mxu1  ;;  %v845_v63 = vpop.f32.mrf.mxu0 }
  0xfe   : > { %v776_v24 = vadd.f32 %v6205_v62, %v673_v19  ;;  %v677_v62 = vadd.f32 %v6199_v51, %v571_v34 }
  0xff   : > { %v743_v0 = vpop.f32.mrf.mxu1  ;;  %v6216_v1 = vpop.f32.mrf.mxu0 }
 0x100   : > { %v774_v29 = vadd.f32 %v743_v0, %v671_v23  ;;  %v878_v36 = vadd.f32 %v6215_v61, %v776_v24 }
 0x101   : > { %v6206_v2 = vpop.f32.mrf.mxu1  ;;  %v848_v3 = vpop.f32.mrf.mxu0 }
 0x102   : > { %v777_v33 = vadd.f32 %v6206_v2, %v674_v28  ;;  %v876_v47 = vadd.f32 %v845_v63, %v774_v29  ;;  %v676_v63 = vadd.f32 %v7408_v59, %v566_v46 }
 0x103   : > { %v746_v4 = vpop.f32.mrf.mxu1  ;;  %v6219_v5 = vpop.f32.mrf.mxu0 }
 0x104   : > { %v775_v50 = vadd.f32 %v746_v4, %v672_v44  ;;  %v879_v13 = vadd.f32 %v6216_v1, %v777_v33 }
 0x105   : > { %v6209_v6 = vpop.f32.mrf.mxu1  ;;  %v861_v7 = vpop.f32.mrf.mxu0 }
 0x106   : > { %v780_v56 = vadd.f32 %v6209_v6, %v677_v62 }
 0x107   : > { %v759_v8 = vpop.f32.mrf.mxu1  ;;  %v7410_v9 = vpop.f32.mrf.mxu0 }
 0x108   : > { %v778_v61 = vadd.f32 %v759_v8, %v675_v40  ;;  %v882_v4 = vadd.f32 %v6219_v5, %v780_v56 }
 0x109   : > { %v6210_v10 = vpop.f32.mrf.mxu1  ;;  %v7412_v11 = vpop.f32.mrf.mxu0 }
 0x10a   : > { %v781_v51 = vadd.f32 %v6210_v10, %v678_v53  ;;  %v880_v1 = vadd.f32 %v861_v7, %v778_v61 }
 0x10b   : > { %v762_v12 = vpop.f32.mrf.mxu1  ;;  %v6235_v14 = vpop.f32.mrf.mxu0 }
 0x10d   : > { %v6225_v15 = vpop.f32.mrf.mxu1  ;;  %v1050_v17 = vpop.f32.mrf.mxu0 }
 0x10e   : > { %v980_v45 = vadd.f32 %v6225_v15, %v878_v36  ;;  %v877_v15 = vadd.f32 %v848_v3, %v775_v50  ;;  %v883_v3 = vadd.f32 %v7410_v9, %v781_v51 }
 0x10f   : > { %v947_v18 = vpop.f32.mrf.mxu1  ;;  %v6236_v21 = vpop.f32.mrf.mxu0 }
 0x110   : > { %v978_v32 = vadd.f32 %v947_v18, %v876_v47  ;;  %v1083_v2 = vadd.f32 %v6235_v14, %v980_v45  ;;  %v779_v18 = vadd.f32 %v762_v12, %v676_v63 }
 0x111   : > { %v6226_v22 = vpop.f32.mrf.mxu1  ;;  %v1053_v25 = vpop.f32.mrf.mxu0 }
 0x112   : > { %v981_v39 = vadd.f32 %v6226_v22, %v879_v13  ;;  %v1081_v16 = vadd.f32 %v1050_v17, %v978_v32  ;;  %v881_v24 = vadd.f32 %v7412_v11, %v779_v18 }
 0x113   : > { %v950_v27 = vpop.f32.mrf.mxu1  ;;  %v6239_v30 = vpop.f32.mrf.mxu0 }
 0x114   : > { %v979_v19 = vadd.f32 %v950_v27, %v877_v15  ;;  %v1084_v8 = vadd.f32 %v6236_v21, %v981_v39 }
 0x115   : > { %v6229_v35 = vpop.f32.mrf.mxu1  ;;  %v1066_v41 = vpop.f32.mrf.mxu0 }
 0x116   : > { %v984_v10 = vadd.f32 %v6229_v35, %v882_v4  ;;  %v1082_v26 = vadd.f32 %v1053_v25, %v979_v19 }
 0x117   : > { %v963_v43 = vpop.f32.mrf.mxu1  ;;  %v6240_v48 = vpop.f32.mrf.mxu0 }
 0x118   : > { %v982_v17 = vadd.f32 %v963_v43, %v880_v1  ;;  %v1087_v9 = vadd.f32 %v6239_v30, %v984_v10 }
 0x119   : > { %v6230_v0 = vpop.f32.mrf.mxu1  ;;  %v7417_v37 = vpop.f32.mrf.mxu0 }
 0x11a   : > { %v985_v27 = vadd.f32 %v6230_v0, %v883_v3  ;;  %v1085_v35 = vadd.f32 %v1066_v41, %v982_v17 }
 0x11b   : > { %v966_v49 = vpop.f32.mrf.mxu1  ;;  %v6255_v58 = vpop.f32.mrf.mxu0 }
 0x11c   : > { %v983_v36 = vadd.f32 %v966_v49, %v881_v24  ;;  %v1088_v25 = vadd.f32 %v6240_v48, %v985_v27 }
 0x11d   : > { %v6245_v55 = vpop.f32.mrf.mxu1  ;;  %v1254_v60 = vpop.f32.mrf.mxu0 }
 0x11e   : > { %v1185_v42 = vadd.f32 %v6245_v55, %v1083_v2  ;;  %v1086_v53 = vadd.f32 %v7417_v37, %v983_v36 }
 0x11f   : > { %v1152_v6 = vpop.f32.mrf.mxu1  ;;  %v6256_v59 = vpop.f32.mrf.mxu0 }
 0x120   : > { %v1287_v14 = vadd.f32 %v6255_v58, %v1185_v42  ;;  %v1183_v20 = vadd.f32 %v1152_v6, %v1081_v16 }
 0x121   : > { %v6246_v22 = vpop.f32.mrf.mxu1  ;;  %v1257_v23 = vpop.f32.mrf.mxu0 }
 0x122   : > { %v1302_v5 = vadd.f32 %v7423_v57, %v1287_v14  ;;  %v1285_v7 = vadd.f32 %v1254_v60, %v1183_v20  ;;  %v1186_v12 = vadd.f32 %v6246_v22, %v1084_v8 }
 0x123   : > { %v1155_v28 = vpop.f32.mrf.mxu1  ;;  %v6259_v31 = vpop.f32.mrf.mxu0 }
 0x124   : > { %vm1310_vm6 = vcmp.gt.f32.partialorder %v1302_v5, 0.0  ;;  %v1318_v21 = vmul.f32 0.01, %v1302_v5  ;;  %v1300_v29 = vadd.f32 %v7423_v57, %v1285_v7  ;;  %v1288_v34 = vadd.f32 %v6256_v59, %v1186_v12 }
 0x125   : > { %v1184_v33 = vadd.f32 %v1155_v28, %v1082_v26  ;;  %v6249_v44 = vpop.f32.mrf.mxu1  ;;  %v1270_v11 = vpop.f32.mrf.mxu0 }
 0x126   : > { %v1326_v38 = vsel %vm1310_vm6, %v1302_v5, %v1318_v21  ;;  %vm1308_vm7 = vcmp.gt.f32.partialorder %v1300_v29, 0.0  ;;  %v1316_v43 = vmul.f32 0.01, %v1300_v29  ;;  %v1303_v47 = vadd.f32 %v7423_v57, %v1288_v34 }
 0x127   : > { %1354 = vst.msk [vmem:[#allocation3 + $0x20] sm:$0xff] %vm1332_vm3, %v1326_v38  ;;  %v1286_v45 = vadd.f32 %v1257_v23, %v1184_v33  ;;  %v1189_v62 = vadd.f32 %v6249_v44, %v1087_v9  ;;  %v1168_v40 = vpop.f32.mrf.mxu1  ;;  %v6260_v32 = vpop.f32.mrf.mxu0 }
 0x128   : > { %v1324_v46 = vsel %vm1308_vm7, %v1300_v29, %v1316_v43  ;;  %vm1311_vm8 = vcmp.gt.f32.partialorder %v1303_v47, 0.0  ;;  %v1319_v50 = vmul.f32 0.01, %v1303_v47  ;;  %v1187_v30 = vadd.f32 %v1168_v40, %v1085_v35 }
 0x129   : > { %1352 = vst.msk [vmem:[#allocation3] sm:$0xff] %vm1332_vm3, %v1324_v46  ;;  %v1301_v41 = vadd.f32 %v7423_v57, %v1286_v45  ;;  %v1291_v0 = vadd.f32 %v6259_v31, %v1189_v62  ;;  %v6250_v13 = vpop.f32.mrf.mxu1  ;;  %v1273_v16 = vpop.f32.mrf.mxu0  ;;  %v1658_v45 = vld [vmem:[#allocation3 + $0x81] sm:$0xff] }
 0x12a   : > { %v1327_v56 = vsel %vm1311_vm8, %v1303_v47, %v1319_v50  ;;  %v1289_v48 = vadd.f32 %v1270_v11, %v1187_v30  ;;  %v1190_v61 = vadd.f32 %v6250_v13, %v1088_v25  ;;  %v1556_v25 = vld [vmem:[#allocation3 + $0x80] sm:$0xff]  ;;  %v1922_v46 = vld [vmem:[%s7376_s20 + $0xc8] ss:$16 sps:$4 sm:$0xff]   ;;  %v1923_v50 = vld [vmem:[%s7376_s20 + $0xcc] sm:$0x1] }
 0x12b   : > { %1355 = vst.msk [vmem:[#allocation3 + $0x30] sm:$0xff] %vm1332_vm3, %v1327_v56  ;;  %vm1309_vm9 = vcmp.gt.f32.partialorder %v1301_v41, 0.0  ;;  %v1317_v49 = vmul.f32 0.01, %v1301_v41  ;;  %v1306_v2 = vadd.f32 %v7423_v57, %v1291_v0  ;;  %v1171_v39 = vpop.f32.mrf.mxu1  ;;  %v2002_v30 = vunpack.c.l.bf16 %v1922_v46  ;;  %v1927_v13 = vld [vmem:[%s7376_s20 + $0xdc] sm:$0x1] }
 0x12c   : > { %v1304_v58 = vadd.f32 %v7423_v57, %v1289_v48  ;;  %v1292_v63 = vadd.f32 %v6260_v32, %v1190_v61  ;;  %v1188_v15 = vadd.f32 %v1171_v39, %v1086_v53  ;;  %v2006_v32 = vunpack.c.h.bf16 %v1922_v46  ;;  %v1944_v48 = vld [vmem:[%s7376_s20 + $0x120] ss:$8 sps:$4 sm:$0xff]   ;;  %v1937_v39 = vld [vmem:[%s7376_s20 + $0x104] sm:$0x1] }
 0x12d   : > { %v1325_v51 = vsel %vm1309_vm9, %v1301_v41, %v1317_v49  ;;  %vm1314_vm10 = vcmp.gt.f32.partialorder %v1306_v2, 0.0  ;;  %v1322_v55 = vmul.f32 0.01, %v1306_v2  ;;  %v2003_v41 = vunpack.c.l.bf16 %v1923_v50 }
 0x12e   : > { %1353 = vst.msk [vmem:[#allocation3 + $0x10] sm:$0xff] %vm1332_vm3, %v1325_v51  ;;  %vm1312_vm11 = vcmp.gt.f32.partialorder %v1304_v58, 0.0  ;;  %v1320_v37 = vmul.f32 0.01, %v1304_v58  ;;  %v1307_v42 = vadd.f32 %v7423_v57, %v1292_v63  ;;  %v1290_v60 = vadd.f32 %v1273_v16, %v1188_v15  ;;  %v1375_v12 = vld [vmem:[#allocation3 + $0x21] sm:$0xff] }
 0x12f   : > { %v1330_v4 = vsel %vm1314_vm10, %v1306_v2, %v1322_v55  ;;  %v6764_v0 = vpack.i.bf16 %v2003_v41, %v2002_v30  ;;  %v2007_v53 = vunpack.c.l.bf16 %v1927_v13  ;;  %v2024_v61 = vunpack.c.l.bf16 %v1944_v48  ;;  %v1898_v55 = vld [vmem:[%s7376_s20 + $0x68] ss:$8 sps:$4 sm:$0xff]   ;;  %v1894_v16 = vld [vmem:[%s7376_s20 + $0x58] ss:$8 sps:$4 sm:$0xff]  }
 0x130   : > { %1358 = vst.msk [vmem:[#allocation3 + $0x60] sm:$0xff] %vm1332_vm3, %v1330_v4  ;;  %v1328_v1 = vsel %vm1312_vm11, %v1304_v58, %v1320_v37  ;;  %vm1315_vm12 = vcmp.gt.f32.partialorder %v1307_v42, 0.0  ;;  %v1323_v18 = vmul.f32 0.01, %v1307_v42  ;;  %v1305_v19 = vadd.f32 %v7423_v57, %v1290_v60  ;;  %v1373_v20 = vld [vmem:[#allocation3 + $0x1] sm:$0xff] }
 0x131   : > { %1356 = vst.msk [vmem:[#allocation3 + $0x40] sm:$0xff] %vm1332_vm3, %v1328_v1  ;;  %v1360_v17 = vld [vmem:[#allocation3] sm:$0xff]  ;;  %6765 = vrot.lane.b32.xlu1 %v6764_v0, %s6934_s21  ;;  %v6774_v56 = vpack.i.bf16 %v2007_v53, %v2006_v32  ;;  %v2026_v49 = vunpack.c.h.bf16 %v1944_v48  ;;  %v1939_v58 = vld [vmem:[%s7376_s20 + $0x10c] sm:$0x1]  ;;  %v2017_v63 = vunpack.c.l.bf16 %v1937_v39  ;;  %v1978_v37 = vunpack.c.l.bf16 %v1898_v55 }
 0x132   : > { %v1331_v6 = vsel %vm1315_vm12, %v1307_v42, %v1323_v18  ;;  %vm1313_vm13 = vcmp.gt.f32.partialorder %v1305_v19, 0.0  ;;  %v1321_v8 = vmul.f32 0.01, %v1305_v19  ;;  %v1376_v59 = vld [vmem:[#allocation3 + $0x31] sm:$0xff]  ;;  %v1362_v57 = vld [vmem:[#allocation3 + $0x20] sm:$0xff]  ;;  %v2019_v15 = vunpack.c.l.bf16 %v1939_v58 }
 0x133   : > { %1359 = vst.msk [vmem:[#allocation3 + $0x70] sm:$0xff] %vm1332_vm3, %v1331_v6  ;;  %v1363_v3 = vld [vmem:[#allocation3 + $0x30] sm:$0xff]  ;;  %v1382_v23 = vpack.c.bf16 %v1376_v59, %v1375_v12  ;;  %v6784_v2 = vpack.i.bf16 %v2026_v49, %v2024_v61  ;;  %v1980_v42 = vunpack.c.h.bf16 %v1898_v55  ;;  %v1974_v60 = vunpack.c.l.bf16 %v1894_v16  ;;  %v1947_v6 = vld [vmem:[%s7376_s20 + $0x12c] sm:$0x1]  ;;  %v7505_v13 = vld [vmem:[%s9046_s5] ss:$0 sm:$0xff] }
 0x134   : > { %v1329_v14 = vsel %vm1313_vm13, %v1305_v19, %v1321_v8  ;;  %v1369_v24 = vpack.c.bf16 %v1363_v3, %v1362_v57  ;;  %v6794_v51 = vpack.i.bf16 %v2019_v15, %v2017_v63  ;;  %v1976_v4 = vunpack.c.h.bf16 %v1894_v16  ;;  %v1945_v19 = vld [vmem:[%s7376_s20 + $0x124] sm:$0x1]  ;;  %v1941_v8 = vld [vmem:[%s7376_s20 + $0x114] sm:$0x1] }
 0x135   : > { %1357 = vst.msk [vmem:[#allocation3 + $0x50] sm:$0xff] %vm1332_vm3, %v1329_v14  ;;  %v1374_v10 = vld [vmem:[#allocation3 + $0x11] sm:$0xff]  ;;  %6775 = vrot.lane.b32.xlu1 %v6774_v56, %s6934_s21  ;;  %v6804_v1 = vpack.i.bf16 %v1980_v42, %v1978_v37  ;;  %v2025_v14 = vunpack.c.l.bf16 %v1945_v19 }
 0x136   : > { %v1361_v22 = vld [vmem:[#allocation3 + $0x10] sm:$0xff]  ;;  %v1381_v5 = vpack.c.bf16 %v1374_v10, %v1373_v20  ;;  %v6799_v18 = vpack.i.bf16 %v1976_v4, %v1974_v60  ;;  %v2027_v20 = vunpack.c.l.bf16 %v1947_v6 }
 0x137   : > { %v1368_v7 = vpack.c.bf16 %v1361_v22, %v1360_v17  ;;  %v1379_v35 = vld [vmem:[#allocation3 + $0x61] sm:$0xff]  ;;  %v1557_v38 = vpack.c.bf16 %v1362_v57, %v1361_v22 }
 0x138   : > { %6263 = vmatprep.mubr.msk.bf16.mxu1 %vm1332_vm3, %v1381_v5  ;;  %v1377_v26 = vld [vmem:[#allocation3 + $0x41] sm:$0xff]  ;;  %6800 = vrot.lane.b32.xlu0 %v6799_v18, %s6934_s21  ;;  %v6814_v17 = vpack.i.bf16 %v2027_v20, %v2025_v14  ;;  %v7482_v5 = vpop.permute.xlu0 %6735 }
 0x139   : > { %6273 = vmatprep.mubr.msk.bf16.mxu0 %vm1332_vm3, %v1368_v7  ;;  %6264 = vmatmul.mubr.msk.bf16.vlgmr.msra.gmra.mxu1 %vm1332_vm3, %v1382_v23  ;;  %v1364_v27 = vld [vmem:[#allocation3 + $0x40] sm:$0xff]  ;;  %v1660_v43 = vpack.c.bf16 %v1377_v26, %v1376_v59  ;;  %v1943_v59 = vld [vmem:[%s7376_s20 + $0x11c] sm:$0x1] }
 0x13a   : > { %6274 = vmatmul.mubr.msk.bf16.vlgmr.msra.gmra.mxu0 %vm1332_vm3, %v1369_v24  ;;  %6282 = vmatpush3.bf16.msra.mxu1 %v7365_v52  ;;  %v1380_v28 = vld [vmem:[#allocation3 + $0x71] sm:$0xff]  ;;  %v1366_v36 = vld [vmem:[#allocation3 + $0x60] sm:$0xff]  ;;  %v1659_v52 = vpack.c.bf16 %v1375_v12, %v1374_v10  ;;  %v2023_v10 = vunpack.c.l.bf16 %v1943_v59 }
 0x13b   : > { %6292 = vmatpush3.bf16.msra.mxu0 %v7370_v54  ;;  %v1367_v34 = vld [vmem:[#allocation3 + $0x70] sm:$0xff]  ;;  %v1384_v33 = vpack.c.bf16 %v1380_v28, %v1379_v35  ;;  %v1558_v54 = vpack.c.bf16 %v1364_v27, %v1363_v3  ;;  %v1662_v40 = vpack.c.bf16 %v1658_v45, %v1380_v28  ;;  %6785 = vrot.lane.b32.xlu1 %v6784_v2, %s6934_s21  ;;  %v2021_v3 = vunpack.c.l.bf16 %v1941_v8 }
 0x13c   : > { %v1378_v21 = vld [vmem:[#allocation3 + $0x51] sm:$0xff]  ;;  %v1371_v44 = vpack.c.bf16 %v1367_v34, %v1366_v36  ;;  %v1560_v62 = vpack.c.bf16 %v1556_v25, %v1367_v34  ;;  %v7484_v7 = vpop.permute.xlu0 %6745 }
 0x13d   : > { %v1365_v29 = vld [vmem:[#allocation3 + $0x50] sm:$0xff]  ;;  %v1383_v31 = vpack.c.bf16 %v1378_v21, %v1377_v26  ;;  %v1661_v11 = vpack.c.bf16 %v1379_v35, %v1378_v21  ;;  %v6809_v22 = vpack.i.bf16 %v2023_v10, %v2021_v3  ;;  %v6731_v26 = vpop.permute.xlu1 %6730 }
 0x13e   : > { %v1370_v9 = vpack.c.bf16 %v1365_v29, %v1364_v27  ;;  %v1559_v47 = vpack.c.bf16 %v1366_v36, %v1365_v29  ;;  %v6733_v27 = vunpack.i.h.bf16 %v6731_v26  ;;  %v6732_v28 = vunpack.i.l.bf16 %v6731_v26 }
 0x13f   : > { %6267 = vmatprep.mubr.msk.bf16.mxu1 %vm1332_vm3, %v1383_v31  ;;  %6795 = vrot.lane.b32.xlu1 %v6794_v51, %s6934_s21 }
 0x140   : > { %6277 = vmatprep.mubr.msk.bf16.mxu0 %vm1332_vm3, %v1370_v9  ;;  %6810 = vrot.lane.b32.xlu0 %v6809_v22, %s6934_s21  ;;  %v7486_v12 = vpop.permute.xlu0 %6750  ;;  %2400 = vst.msk [vmem:[#allocation4 + $0x148] sm:$0x3] %vm2123_vm15, %v6733_v27 }
 0x141   : > { %6268 = vmatmul.mubr.msk.bf16.gmra.mxu1 %vm1332_vm3, %v1384_v33  ;;  %v6752_v57 = vunpack.i.l.bf16 %v7486_v12  ;;  %2399 = vst.msk [vmem:[#allocation4 + $0x140] sm:$0xff] %vm2121_vm14, %v6732_v28 }
 0x142   : > { %6278 = vmatmul.mubr.msk.bf16.gmra.mxu0 %vm1332_vm3, %v1371_v44  ;;  %6283 = vmatprep.mubr.msk.bf16.mxu1 %vm1332_vm3, %v1557_v38 }
 0x143   : > { %6293 = vmatprep.mubr.msk.bf16.mxu0 %vm1332_vm3, %v1659_v52  ;;  %6805 = vrot.lane.b32.xlu1 %v6804_v1, %s6934_s21  ;;  %2533 = vst.msk [vmem:[#allocation4 + $0x1e0] sm:$0xff] %vm2121_vm14, %v6752_v57 }
 0x144   : > { %v7490_v23 = vpop.permute.xlu0 %6760 }
 0x147   : > { %6815 = vrot.lane.b32.xlu1 %v6814_v17, %s6934_s21 }
 0x148   : > { %v7492_v24 = vpop.permute.xlu0 %6770 }
 0x149   : > { %6284 = vmatmul.mubr.msk.bf16.vlgmr.msra.gmra.mxu1 %vm1332_vm3, %v1558_v54 }
 0x14a   : > { %6294 = vmatmul.mubr.msk.bf16.vlgmr.msra.gmra.mxu0 %vm1332_vm3, %v1660_v43  ;;  %6287 = vmatprep.mubr.msk.bf16.mxu1 %vm1332_vm3, %v1559_v47 }
 0x14b   : > { %6297 = vmatprep.mubr.msk.bf16.mxu0 %vm1332_vm3, %v1661_v11 }
 0x14c   : > { %v7496_v21 = vpop.permute.xlu0 %6780 }
 0x150   : > { %v7498_v29 = vpop.permute.xlu0 %6790 }
 0x151   : > { %6288 = vmatmul.mubr.msk.bf16.gmra.mxu1 %vm1332_vm3, %v1560_v62  ;;  %v6792_v34 = vunpack.i.l.bf16 %v7498_v29 }
 0x152   : > { %6298 = vmatmul.mubr.msk.bf16.gmra.mxu0 %vm1332_vm3, %v1662_v40 }
 0x153   : > { %2534 = vst.msk [vmem:[#allocation4 + $0x1e8] sm:$0x3] %vm2123_vm15, %v6792_v34 }
 0x1f9   : > { %v6265_v31 = vpop.f32.mrf.mxu1 }
 0x1fa   : > { %v6275_v9 = vpop.f32.mrf.mxu0 }
 0x1fb   : > { %v1437_v35 = vpop.f32.mrf.mxu1  ;;  %v1526_v46 = vadd.f32 %v6275_v9, %v6265_v31 }
 0x1fc   : > { %v1517_v36 = vpop.f32.mrf.mxu0 }
 0x1fd   : > { %v6266_v33 = vpop.f32.mrf.mxu1  ;;  %v1518_v41 = vadd.f32 %v1517_v36, %v1437_v35 }
 0x1fe   : > { %v6276_v44 = vpop.f32.mrf.mxu0 }
 0x1ff   : > { %v1440_v38 = vpop.f32.mrf.mxu1  ;;  %v1529_v56 = vadd.f32 %v6276_v44, %v6266_v33 }
 0x200   : > { %v1520_v52 = vpop.f32.mrf.mxu0 }
 0x201   : > { %v6269_v54 = vpop.f32.mrf.mxu1  ;;  %v1521_v39 = vadd.f32 %v1520_v52, %v1440_v38 }
 0x202   : > { %v6279_v43 = vpop.f32.mrf.mxu0 }
 0x203   : > { %v1453_v47 = vpop.f32.mrf.mxu1  ;;  %v1542_v51 = vadd.f32 %v6279_v43, %v6269_v54 }
 0x204   : > { %v1533_v11 = vpop.f32.mrf.mxu0 }
 0x205   : > { %v6270_v25 = vpop.f32.mrf.mxu1  ;;  %v1534_v1 = vadd.f32 %v1533_v11, %v1453_v47 }
 0x206   : > { %v6280_v45 = vpop.f32.mrf.mxu0 }
 0x207   : > { %v1456_v62 = vpop.f32.mrf.mxu1  ;;  %v1545_v59 = vadd.f32 %v6280_v45, %v6270_v25 }
 0x208   : > { %v1536_v40 = vpop.f32.mrf.mxu0 }
 0x209   : > { %v6285_v50 = vpop.f32.mrf.mxu1  ;;  %v1537_v28 = vadd.f32 %v1536_v40, %v1456_v62 }
 0x20a   : > { %v6295_v30 = vpop.f32.mrf.mxu0  ;;  %v1645_v0 = vadd.f32 %v6285_v50, %v1526_v46 }
 0x20b   : > { %v1612_v32 = vpop.f32.mrf.mxu1 }
 0x20c   : > { %v1714_v53 = vpop.f32.mrf.mxu0  ;;  %v1747_v48 = vadd.f32 %v6295_v30, %v1645_v0  ;;  %v1643_v61 = vadd.f32 %v1612_v32, %v1518_v41  ;;  %v7529_v32 = vld [vmem:[%s9047_s6 + $0x4] sm:$0xf] }
 0x20d   : > { %v6286_v49 = vpop.f32.mrf.mxu1  ;;  %6677 = vmatprep.subr.msk.bf16.mxu1 %vm428_vm0, %v7529_v32 }
 0x20e   : > { %v6296_v2 = vpop.f32.mrf.mxu0  ;;  %v1762_v58 = vadd.f32 %v7505_v13, %v1747_v48  ;;  %v1745_v63 = vadd.f32 %v1714_v53, %v1643_v61  ;;  %v1646_v15 = vadd.f32 %v6286_v49, %v1529_v56  ;;  %v7536_v53 = vsel %vm428_vm0, %v7529_v32, 0  ;;  %v7548_v61 = vld [vmem:[%s9047_s6] sm:$0xf] }
 0x20f   : > { %v1615_v55 = vpop.f32.mrf.mxu1  ;;  %6302 = vmatpush3.bf16.msra.mxu1 %v7536_v53  ;;  %6678 = vmatprep.subr.msk.bf16.mxu0 %vm428_vm0, %v7548_v61  ;;  %v7555_v49 = vsel %vm428_vm0, %v7548_v61, 0 }
 0x210   : > { %v1717_v16 = vpop.f32.mrf.mxu0  ;;  %v1778_v37 = vmul.f32 0.01, %v1762_v58  ;;  %v1760_v42 = vadd.f32 %v7505_v13, %v1745_v63  ;;  %v1748_v60 = vadd.f32 %v6296_v2, %v1646_v15  ;;  %v1644_v4 = vadd.f32 %v1615_v55, %v1521_v39  ;;  %6312 = vmatpush3.bf16.msra.mxu0 %v7555_v49  ;;  %v7567_v2 = vld [vmem:[%s9047_s6 + $0x8] sm:$0xf]  ;;  %v1902_v39 = vld [vmem:[%s7376_s20 + $0x78] ss:$8 sps:$4 sm:$0xff]  }
 0x211   : > { %v6289_v18 = vpop.f32.mrf.mxu1  ;;  %vm1770_vm2 = vcmp.gt.f32.partialorder %v1762_v58, 0.0  ;;  %6679 = vmatprep.subr.msk.bf16.mxu1 %vm428_vm0, %v7567_v2  ;;  %v1982_v63 = vunpack.c.l.bf16 %v1902_v39  ;;  %v1984_v15 = vunpack.c.h.bf16 %v1902_v39  ;;  %v1874_v55 = vld [vmem:[%s7376_s20 + $0x8] ss:$8 sps:$4 sm:$0xff]  }
 0x212   : > { %v6299_v19 = vpop.f32.mrf.mxu0  ;;  %v1776_v6 = vmul.f32 0.01, %v1760_v42  ;;  %v1763_v8 = vadd.f32 %v7505_v13, %v1748_v60  ;;  %v1746_v14 = vadd.f32 %v1717_v16, %v1644_v4  ;;  %v1649_v20 = vadd.f32 %v6289_v18, %v1542_v51  ;;  %v1906_v51 = vld [vmem:[%s7376_s20 + $0x88] ss:$8 sps:$4 sm:$0xff]   ;;  %v1875_v16 = vld [vmem:[%s7376_s20 + $0xc] sm:$0x1] }
 0x213   : > { %v1628_v3 = vpop.f32.mrf.mxu1  ;;  %v1786_v10 = vsel %vm1770_vm2, %v1762_v58, %v1778_v37  ;;  %vm1768_vm4 = vcmp.gt.f32.partialorder %v1760_v42, 0.0  ;;  %v7577_v58 = vld [vmem:[%s9047_s6 + $0xc] sm:$0xf]  ;;  %v6819_v37 = vpack.i.bf16 %v1984_v15, %v1982_v63  ;;  %v1988_v60 = vunpack.c.h.bf16 %v1906_v51  ;;  %v1877_v18 = vld [vmem:[%s7376_s20 + $0x14] sm:$0x1] }
 0x214   : > { %v1730_v17 = vpop.f32.mrf.mxu0  ;;  %v1779_v22 = vmul.f32 0.01, %v1763_v8  ;;  %v1761_v57 = vadd.f32 %v7505_v13, %v1746_v14  ;;  %v1751_v26 = vadd.f32 %v6299_v19, %v1649_v20  ;;  %v1647_v27 = vadd.f32 %v1628_v3, %v1534_v1  ;;  %2155 = vrot.lane.b32.xlu0 %v1786_v10, %s6935_s26  ;;  %2035 = vst.msk [vmem:[#allocation4 + $0x31] sm:$0xff] %vm1332_vm3, %v1786_v10  ;;  %v1880_v20 = vld [vmem:[%s7376_s20 + $0x18] ss:$8 sps:$4 sm:$0xff]  }
 0x215   : > { %2289 = vrot.lane.b32.xlu1 %v1786_v10, %s6936_s29  ;;  %v6290_v34 = vpop.f32.mrf.mxu1  ;;  %v1784_v9 = vsel %vm1768_vm4, %v1760_v42, %v1776_v6  ;;  %vm1771_vm5 = vcmp.gt.f32.partialorder %v1763_v8, 0.0  ;;  %6680 = vmatprep.subr.msk.bf16.mxu0 %vm428_vm0, %v7577_v58  ;;  %v1986_v42 = vunpack.c.l.bf16 %v1906_v51  ;;  %v1954_v4 = vunpack.c.l.bf16 %v1874_v55  ;;  %v1879_v3 = vld [vmem:[%s7376_s20 + $0x1c] sm:$0x1]  ;;  %v1907_v15 = vld [vmem:[%s7376_s20 + $0x8c] sm:$0x1] }
 0x216   : > { %v6300_v31 = vpop.f32.mrf.mxu0  ;;  %v1766_v35 = vadd.f32 %v7505_v13, %v1751_v26  ;;  %v1749_v36 = vadd.f32 %v1730_v17, %v1647_v27  ;;  %v1650_v33 = vadd.f32 %v6290_v34, %v1545_v59  ;;  %2033 = vst.msk [vmem:[#allocation4 + $0x11] sm:$0xff] %vm1332_vm3, %v1784_v9  ;;  %v1787_v44 = vsel %vm1771_vm5, %v1763_v8, %v1779_v22  ;;  %v1881_v59 = vld [vmem:[%s7376_s20 + $0x24] sm:$0x1]  ;;  %v1899_v17 = vld [vmem:[%s7376_s20 + $0x6c] sm:$0x1] }
 0x217   : > { %v1631_v38 = vpop.f32.mrf.mxu1  ;;  %2036 = vst.msk [vmem:[#allocation4 + $0x41] sm:$0xff] %vm1332_vm3, %v1787_v44  ;;  %vm1769_vm6 = vcmp.gt.f32.partialorder %v1761_v57, 0.0  ;;  %v1777_v52 = vmul.f32 0.01, %v1761_v57  ;;  %v1955_v1 = vunpack.c.l.bf16 %v1875_v16  ;;  %v1956_v19 = vunpack.c.h.bf16 %v1874_v55  ;;  %v1901_v22 = vld [vmem:[%s7376_s20 + $0x74] sm:$0x1] }
 0x218   : > { %v1782_v54 = vmul.f32 0.01, %v1766_v35  ;;  %v1764_v43 = vadd.f32 %v7505_v13, %v1749_v36  ;;  %v1752_v47 = vadd.f32 %v6300_v31, %v1650_v33  ;;  %v1648_v11 = vadd.f32 %v1631_v38, %v1537_v28  ;;  %2285 = vrot.lane.b32.xlu0 %v1784_v9, %s6936_s29  ;;  %v1733_v25 = vpop.f32.mrf.mxu0  ;;  %v1895_v34 = vld [vmem:[%s7376_s20 + $0x5c] sm:$0x1]  ;;  %v1897_v31 = vld [vmem:[%s7376_s20 + $0x64] sm:$0x1] }
 0x219   : > { %2423 = vrot.lane.b32.xlu1 %v1786_v10, %s6937_s30  ;;  %v1785_v45 = vsel %vm1769_vm6, %v1761_v57, %v1777_v52  ;;  %vm1774_vm7 = vcmp.gt.f32.partialorder %v1766_v35, 0.0  ;;  %v1957_v6 = vunpack.c.l.bf16 %v1877_v18  ;;  %v6824_v8 = vpack.i.bf16 %v1988_v60, %v1986_v42  ;;  %v1884_v52 = vld [vmem:[%s7376_s20 + $0x28] ss:$8 sps:$4 sm:$0xff]   ;;  %v1909_v51 = vld [vmem:[%s7376_s20 + $0x94] sm:$0x1] }
 0x21a   : > { %v1780_v62 = vmul.f32 0.01, %v1764_v43  ;;  %v1767_v40 = vadd.f32 %v7505_v13, %v1752_v47  ;;  %v1750_v46 = vadd.f32 %v1733_v25, %v1648_v11  ;;  %2034 = vst.msk [vmem:[#allocation4 + $0x21] sm:$0xff] %vm1332_vm3, %v1785_v45  ;;  %v1790_v50 = vsel %vm1774_vm7, %v1766_v35, %v1782_v54  ;;  %v1885_v54 = vld [vmem:[%s7376_s20 + $0x34] sm:$0x1] }
 0x21b   : > { %2039 = vst.msk [vmem:[#allocation4 + $0x71] sm:$0xff] %vm1332_vm3, %v1790_v50  ;;  %vm1772_vm8 = vcmp.gt.f32.partialorder %v1764_v43, 0.0  ;;  %v6829_v14 = vpack.i.bf16 %v1955_v1, %v1954_v4  ;;  %v6834_v10 = vpack.i.bf16 %v1957_v6, %v1956_v19  ;;  %v1960_v57 = vunpack.c.h.bf16 %v1880_v20  ;;  %v1888_v25 = vld [vmem:[%s7376_s20 + $0x38] ss:$8 sps:$4 sm:$0xff]   ;;  %v1903_v55 = vld [vmem:[%s7376_s20 + $0x7c] sm:$0x1] }
 0x21c   : > { %v1783_v30 = vmul.f32 0.01, %v1767_v40  ;;  %v1765_v41 = vadd.f32 %v7505_v13, %v1750_v46  ;;  %2291 = vrot.lane.b32.xlu0 %v1787_v44, %s6936_s29  ;;  %v1788_v0 = vsel %vm1772_vm8, %v1764_v43, %v1780_v62  ;;  %vm1775_vm9 = vcmp.gt.f32.partialorder %v1767_v40, 0.0  ;;  %v1883_v43 = vld [vmem:[%s7376_s20 + $0x2c] sm:$0x1] }
 0x21d   : > { %2419 = vrot.lane.b32.xlu1 %v1784_v9, %s6937_s30  ;;  %2037 = vst.msk [vmem:[#allocation4 + $0x51] sm:$0xff] %vm1332_vm3, %v1788_v0  ;;  %v1961_v26 = vunpack.c.l.bf16 %v1881_v59  ;;  %v1958_v27 = vunpack.c.l.bf16 %v1880_v20  ;;  %v1959_v28 = vunpack.c.l.bf16 %v1879_v3  ;;  %v1981_v35 = vunpack.c.l.bf16 %v1901_v22  ;;  %v1905_v16 = vld [vmem:[%s7376_s20 + $0x84] sm:$0x1]  ;;  %v1928_v19 = vld [vmem:[%s7376_s20 + $0xe0] ss:$80 sps:$4 sm:$0xff]   ;;  %v7622_v59 = vpop.permute.xlu1 %6740 }
 0x21e   : > { %vm1773_vm10 = vcmp.gt.f32.partialorder %v1765_v41, 0.0  ;;  %v1781_v13 = vmul.f32 0.01, %v1765_v41  ;;  %v7538_v56 = vsel %vm1775_vm9, %v1767_v40, %v1783_v30  ;;  %v1975_v36 = vunpack.c.l.bf16 %v1895_v34  ;;  %v1887_v30 = vld [vmem:[%s7376_s20 + $0x3c] sm:$0x1] }
 0x21f   : > { %2040 = vst.msk [vmem:[#allocation4 + $0x81] sm:$0xff] %vm1332_vm3, %v7538_v56  ;;  %v1977_v33 = vunpack.c.l.bf16 %v1897_v31  ;;  %v6839_v38 = vpack.i.bf16 %v1959_v28, %v1958_v27  ;;  %v1965_v62 = vunpack.c.l.bf16 %v1885_v54  ;;  %v1962_v40 = vunpack.c.l.bf16 %v1884_v52  ;;  %v1949_v28 = vld [vmem:[%s7376_s20 + $0x134] sm:$0x1] }
 0x220   : > { %2425 = vrot.lane.b32.xlu0 %v1787_v44, %s6937_s30  ;;  %v1789_v48 = vsel %vm1773_vm10, %v1765_v41, %v1781_v13  ;;  %v1963_v46 = vunpack.c.l.bf16 %v1883_v43  ;;  %v1968_v41 = vunpack.c.h.bf16 %v1888_v25  ;;  %v1966_v13 = vunpack.c.l.bf16 %v1888_v25  ;;  %v7651_v43 = vpop.permute.xlu0 %6800 }
 0x221   : > { %2151 = vrot.lane.b32.xlu1 %v1784_v9, %s6935_s26  ;;  %2038 = vst.msk [vmem:[#allocation4 + $0x61] sm:$0xff] %vm1332_vm3, %v1789_v48  ;;  %v1979_v9 = vunpack.c.l.bf16 %v1899_v17  ;;  %v6849_v11 = vpack.i.bf16 %v1977_v33, %v1975_v36  ;;  %v1987_v60 = vunpack.c.l.bf16 %v1907_v15  ;;  %v1989_v4 = vunpack.c.l.bf16 %v1909_v51  ;;  %v1890_v17 = vld [vmem:[%s7376_s20 + $0x48] ss:$80 sps:$4 sm:$0xff]   ;;  %v7631_v27 = vpop.permute.xlu1 %6755 }
 0x222   : > { %v6859_v63 = vpack.i.bf16 %v1963_v46, %v1962_v40  ;;  %v1983_v1 = vunpack.c.l.bf16 %v1903_v55  ;;  %v1985_v18 = vunpack.c.l.bf16 %v1905_v16  ;;  %v2028_v20 = vunpack.c.h.bf16 %v1928_v19 }
 0x223   : > { %v6854_v47 = vpack.i.bf16 %v1981_v35, %v1979_v9  ;;  %v6884_v6 = vpack.i.bf16 %v1989_v4, %v1987_v60  ;;  %v2029_v31 = vunpack.c.l.bf16 %v1949_v28  ;;  %v1911_v9 = vld [vmem:[%s7376_s20 + $0x9c] sm:$0x1]  ;;  %v1891_v35 = vld [vmem:[%s7376_s20 + $0x4c] sm:$0x1]  ;;  %v6748_v25 = vunpack.i.h.bf16 %v7484_v7 }
 0x224   : > { %2287 = vrot.lane.b32.xlu0 %v1785_v45, %s6936_s29  ;;  %v1991_v33 = vunpack.c.l.bf16 %v1911_v9  ;;  %v6743_v4 = vunpack.i.h.bf16 %v7622_v59 }
 0x225   : > { %2157 = vrot.lane.b32.xlu1 %v1787_v44, %s6935_s26  ;;  %v6844_v44 = vpack.i.bf16 %v1961_v26, %v1960_v57  ;;  %v1970_v57 = vunpack.c.l.bf16 %v1890_v17  ;;  %v1990_v26 = vunpack.c.h.bf16 %v1890_v17  ;;  %v7639_v36 = vpop.permute.xlu1 %6765 }
 0x227   : > { %v6894_v34 = vpack.i.bf16 %v1970_v57, %v1990_v26 }
 0x228   : > { %2421 = vrot.lane.b32.xlu0 %v1785_v45, %s6937_s30 }
 0x229   : > { %2297 = vrot.lane.b32.xlu1 %v1790_v50, %s6936_s29 }
 0x22c   : > { %2153 = vrot.lane.b32.xlu0 %v1785_v45, %s6935_s26  ;;  %v1964_v45 = vunpack.c.h.bf16 %v1884_v52 }
 0x22d   : > { %2431 = vrot.lane.b32.xlu1 %v1790_v50, %s6937_s30 }
 0x22e   : > { %v6864_v39 = vpack.i.bf16 %v1965_v62, %v1964_v45  ;;  %v6747_v45 = vunpack.i.l.bf16 %v7484_v7 }
 0x230   : > { %2163 = vrot.lane.b32.xlu0 %v1790_v50, %s6935_s26  ;;  %v1889_v50 = vld [vmem:[%s7376_s20 + $0x44] sm:$0x1] }
 0x231   : > { %2293 = vrot.lane.b32.xlu1 %v1788_v0, %s6936_s29 }
 0x234   : > { %2295 = vrot.lane.b32.xlu0 %v1789_v48, %s6936_s29 }
 0x235   : > { %2427 = vrot.lane.b32.xlu1 %v1788_v0, %s6937_s30 }
 0x238   : > { %2429 = vrot.lane.b32.xlu0 %v1789_v48, %s6937_s30 }
 0x239   : > { %2159 = vrot.lane.b32.xlu1 %v1788_v0, %s6935_s26  ;;  %v1969_v0 = vunpack.c.l.bf16 %v1889_v50  ;;  %v6738_v50 = vunpack.i.h.bf16 %v7482_v5 }
 0x23c   : > { %6820 = vrot.lane.b32.xlu0 %v6819_v37, %s6934_s21  ;;  %v6874_v37 = vpack.i.bf16 %v1969_v0, %v1968_v41  ;;  %v6758_v41 = vunpack.i.h.bf16 %v7631_v27 }
 0x23d   : > { %2165 = vrot.lane.b32.xlu1 %v7538_v56, %s6935_s26 }
 0x240   : > { %6830 = vrot.lane.b32.xlu0 %v6829_v14, %s6934_s21  ;;  %v2008_v14 = vunpack.c.l.bf16 %v1928_v19 }
 0x241   : > { %6825 = vrot.lane.b32.xlu1 %v6824_v8, %s6934_s21  ;;  %v6879_v8 = vpack.i.bf16 %v1985_v18, %v1983_v1  ;;  %v6742_v1 = vunpack.i.l.bf16 %v7622_v59  ;;  %v6757_v59 = vunpack.i.l.bf16 %v7631_v27  ;;  %v6803_v27 = vunpack.i.h.bf16 %v7651_v43 }
 0x242   : > { %v6889_v3 = vpack.i.bf16 %v2008_v14, %v2028_v20 }
 0x244   : > { %2161 = vrot.lane.b32.xlu0 %v1789_v48, %s6935_s26  ;;  %v1967_v48 = vunpack.c.l.bf16 %v1887_v30  ;;  %v6737_v30 = vunpack.i.l.bf16 %v7482_v5  ;;  %v6753_v5 = vunpack.i.h.bf16 %v7486_v12  ;;  %v6782_v12 = vunpack.i.l.bf16 %v7496_v21 }
 0x245   : > { %6835 = vrot.lane.b32.xlu1 %v6834_v10, %s6934_s21  ;;  %v1929_v10 = vld [vmem:[%s7376_s20 + $0xe4] sm:$0x1] }
 0x246   : > { %v6869_v42 = vpack.i.bf16 %v1967_v48, %v1966_v13  ;;  %v2009_v22 = vunpack.c.l.bf16 %v1929_v10  ;;  %v6763_v48 = vunpack.i.h.bf16 %v7490_v23 }
 0x248   : > { %6840 = vrot.lane.b32.xlu0 %v6839_v38, %s6934_s21  ;;  %v7645_v38 = vpop.permute.xlu1 %6775 }
 0x249   : > { %6845 = vrot.lane.b32.xlu1 %v6844_v44, %s6934_s21  ;;  %v1971_v44 = vunpack.c.l.bf16 %v1891_v35  ;;  %v6777_v10 = vunpack.i.l.bf16 %v7645_v38 }
 0x24c   : > { %6850 = vrot.lane.b32.xlu0 %v6849_v11, %s6934_s21  ;;  %v7647_v52 = vpop.permute.xlu1 %6785  ;;  %v7655_v11 = vpop.permute.xlu0 %6810 }
 0x24d   : > { %6855 = vrot.lane.b32.xlu1 %v6854_v47, %s6934_s21  ;;  %v6788_v26 = vunpack.i.h.bf16 %v7647_v52 }
 0x250   : > { %6860 = vrot.lane.b32.xlu0 %v6859_v63, %s6934_s21  ;;  %v6793_v63 = vunpack.i.h.bf16 %v7498_v29  ;;  %v6812_v29 = vunpack.i.l.bf16 %v7655_v11 }
 0x251   : > { %6865 = vrot.lane.b32.xlu1 %v6864_v39, %s6934_s21  ;;  %v6762_v39 = vunpack.i.l.bf16 %v7490_v23  ;;  %v6802_v23 = vunpack.i.l.bf16 %v7651_v43 }
 0x254   : > { %6870 = vrot.lane.b32.xlu0 %v6869_v42, %s6934_s21 }
 0x255   : > { %6875 = vrot.lane.b32.xlu1 %v6874_v37, %s6934_s21  ;;  %v2566_v37 = vld [vmem:[#allocation4 + $0x141] sm:$0xff] }
 0x258   : > { %6880 = vrot.lane.b32.xlu0 %v6879_v8, %s6934_s21  ;;  %v2553_v8 = vld [vmem:[#allocation4 + $0x1e0] sm:$0xff] }
 0x259   : > { %6885 = vrot.lane.b32.xlu1 %v6884_v6, %s6934_s21 }
 0x25c   : > { %2433 = vrot.lane.b32.xlu0 %v7538_v56, %s6937_s30 }
 0x25d   : > { %6890 = vrot.lane.b32.xlu1 %v6889_v3, %s6934_s21  ;;  %v6778_v3 = vunpack.i.h.bf16 %v7645_v38  ;;  %v7743_v38 = vld [vmem:[%s9047_s6 + $0x10] sm:$0xf] }
 0x260   : > { %2299 = vrot.lane.b32.xlu0 %v7538_v56, %s6936_s29  ;;  %v7649_v56 = vpop.permute.xlu1 %6795 }
 0x261   : > { %2372 = vrot.lane.b32.xlu1 %v2009_v22, %s6934_s21  ;;  %v6798_v7 = vunpack.i.h.bf16 %v7649_v56  ;;  %v6797_v17 = vunpack.i.l.bf16 %v7649_v56  ;;  %v6768_v56 = vunpack.i.h.bf16 %v7639_v36 }
 0x264   : > { %2506 = vrot.lane.b32.xlu0 %v2029_v31, %s6934_s21  ;;  %v6806_v54 = vpop.permute.xlu1 %6805 }
 0x265   : > { %6895 = vrot.lane.b32.xlu1 %v6894_v34, %s6934_s21  ;;  %v6807_v62 = vunpack.i.l.bf16 %v6806_v54  ;;  %v6808_v18 = vunpack.i.h.bf16 %v6806_v54  ;;  %v6767_v54 = vunpack.i.l.bf16 %v7639_v36 }
 0x268   : > { %2099 = vrot.lane.b32.xlu0 %v1971_v44, %s6934_s21  ;;  %v7653_v47 = vpop.permute.xlu1 %6815  ;;  %v7738_v44 = vsel %vm428_vm0, %v7567_v2, 0 }
 0x269   : > { %2242 = vrot.lane.b32.xlu1 %v1991_v33, %s6934_s21  ;;  %v6818_v28 = vunpack.i.h.bf16 %v7653_v47 }
 0x286   : > { %v2156_v40 = vpop.permute.xlu0 %2155 }
 0x287   : > { %v2290_v46 = vpop.permute.xlu1 %2289  ;;  %2178 = vst.msk [vmem:[#allocation4 + $0xd1] sm:$0xff] %vm1332_vm3, %v2156_v40  ;;  %v7762_v40 = vsel %vm428_vm0, %v7577_v58, 0 }
 0x288   : > { %2312 = vst.msk [vmem:[#allocation4 + $0x171] sm:$0xff] %vm1332_vm3, %v2290_v46  ;;  %v7769_v46 = vld [vmem:[%s9047_s6 + $0x14] sm:$0xf] }
 0x289   : > { %2271 = vst.msk [vmem:[#allocation4 + $0xd0] sm:$0xff] %vm2121_vm14, %v6807_v62  ;;  %2405 = vst.msk [vmem:[#allocation4 + $0x170] sm:$0xff] %vm2121_vm14, %v6747_v45 }
 0x28a   : > { %2406 = vst.msk [vmem:[#allocation4 + $0x178] sm:$0x3] %vm2123_vm15, %v6748_v25  ;;  %v2286_v13 = vpop.permute.xlu0 %2285 }
 0x28b   : > { %v2424_v0 = vpop.permute.xlu1 %2423  ;;  %2310 = vst.msk [vmem:[#allocation4 + $0x151] sm:$0xff] %vm1332_vm3, %v2286_v13 }
 0x28c   : > { %2446 = vst.msk [vmem:[#allocation4 + $0x211] sm:$0xff] %vm1332_vm3, %v2424_v0 }
 0x28d   : > { %2539 = vst.msk [vmem:[#allocation4 + $0x210] sm:$0xff] %vm2121_vm14, %v6758_v41  ;;  %2401 = vst.msk [vmem:[#allocation4 + $0x150] sm:$0xff] %vm2121_vm14, %v6737_v30  ;;  %v6772_v30 = vunpack.i.l.bf16 %v7492_v24  ;;  %v6783_v41 = vunpack.i.h.bf16 %v7496_v21  ;;  %v6787_v21 = vunpack.i.l.bf16 %v7647_v52 }
 0x28e   : > { %2540 = vst.msk [vmem:[#allocation4 + $0x218] sm:$0x3] %vm2123_vm15, %v6798_v7  ;;  %2402 = vst.msk [vmem:[#allocation4 + $0x158] sm:$0x3] %vm2123_vm15, %v6738_v50  ;;  %v2292_v51 = vpop.permute.xlu0 %2291  ;;  %v6773_v50 = vunpack.i.h.bf16 %v7492_v24  ;;  %v6813_v7 = vunpack.i.h.bf16 %v7655_v11  ;;  %v6817_v11 = vunpack.i.l.bf16 %v7653_v47 }
 0x28f   : > { %v2420_v15 = vpop.permute.xlu1 %2419  ;;  %2313 = vst.msk [vmem:[#allocation4 + $0x181] sm:$0xff] %vm1332_vm3, %v2292_v51 }
 0x290   : > { %2444 = vst.msk [vmem:[#allocation4 + $0x1f1] sm:$0xff] %vm1332_vm3, %v2420_v15 }
 0x291   : > { %2535 = vst.msk [vmem:[#allocation4 + $0x1f0] sm:$0xff] %vm2121_vm14, %v6753_v5  ;;  %2407 = vst.msk [vmem:[#allocation4 + $0x180] sm:$0xff] %vm2121_vm14, %v6762_v39  ;;  %v7727_v35 = vld [vmem:[#allocation4 + $0x171] sm:$0xff] }
 0x292   : > { %2536 = vst.msk [vmem:[#allocation4 + $0x1f8] sm:$0x3] %vm2123_vm15, %v6793_v63  ;;  %2408 = vst.msk [vmem:[#allocation4 + $0x188] sm:$0x3] %vm2123_vm15, %v6763_v48  ;;  %v2426_v16 = vpop.permute.xlu0 %2425  ;;  %v7781_v48 = vld [vmem:[#allocation4 + $0xd0] sm:$0xff] }
 0x293   : > { %v2152_v55 = vpop.permute.xlu1 %2151  ;;  %2447 = vst.msk [vmem:[#allocation4 + $0x221] sm:$0xff] %vm1332_vm3, %v2426_v16  ;;  %9088 = vst [vmem:[#allocation6_spill] sm:$0xff] %v7781_v48 }
 0x294   : > { %2176 = vst.msk [vmem:[#allocation4 + $0xb1] sm:$0xff] %vm1332_vm3, %v2152_v55  ;;  %v7753_v62 = vld [vmem:[#allocation4 + $0x210] sm:$0xff] }
 0x295   : > { %v7689_v42 = vld [vmem:[#allocation4 + $0x151] sm:$0xff]  ;;  %2267 = vst.msk [vmem:[#allocation4 + $0xb0] sm:$0xff] %vm2121_vm14, %v6802_v23  ;;  %2541 = vst.msk [vmem:[#allocation4 + $0x220] sm:$0xff] %vm2121_vm14, %v6782_v12 }
 0x296   : > { %2542 = vst.msk [vmem:[#allocation4 + $0x228] sm:$0x3] %vm2123_vm15, %v6812_v29  ;;  %v7695_v60 = vpack.c.bf16 %v7689_v42, %v2566_v37  ;;  %v2288_v6 = vpop.permute.xlu0 %2287 }
 0x297   : > { %v2158_v19 = vpop.permute.xlu1 %2157  ;;  %2311 = vst.msk [vmem:[#allocation4 + $0x161] sm:$0xff] %vm1332_vm3, %v2288_v6 }
 0x298   : > { %6303 = vmatprep.mubr.msk.bf16.mxu1 %vm367_vm1, %v7695_v60  ;;  %2179 = vst.msk [vmem:[#allocation4 + $0xe1] sm:$0xff] %vm1332_vm3, %v2158_v19  ;;  %v7703_v14 = vld [vmem:[#allocation4 + $0x1f0] sm:$0xff]  ;;  %v2740_v19 = vld [vmem:[#allocation4 + $0x1e1] sm:$0xff] }
 0x299   : > { %2273 = vst.msk [vmem:[#allocation4 + $0xe0] sm:$0xff] %vm2121_vm14, %v6808_v18  ;;  %2403 = vst.msk [vmem:[#allocation4 + $0x160] sm:$0xff] %vm2121_vm14, %v6742_v1  ;;  %v2561_v20 = vpack.c.bf16 %v7703_v14, %v2553_v8  ;;  %v7795_v15 = vld [vmem:[#allocation4 + $0x181] sm:$0xff]  ;;  %v7809_v29 = vld [vmem:[#allocation4 + $0x1f1] sm:$0xff] }
 0x29a   : > { %2404 = vst.msk [vmem:[#allocation4 + $0x168] sm:$0x3] %vm2123_vm15, %v6743_v4  ;;  %v2422_v57 = vpop.permute.xlu0 %2421  ;;  %v7826_v6 = vpack.c.bf16 %v7809_v29, %v2740_v19 }
 0x29b   : > { %6313 = vmatprep.mubr.msk.bf16.mxu0 %vm367_vm1, %v2561_v20  ;;  %v2298_v22 = vpop.permute.xlu1 %2297  ;;  %2445 = vst.msk [vmem:[#allocation4 + $0x201] sm:$0xff] %vm1332_vm3, %v2422_v57 }
 0x29c   : > { %2316 = vst.msk [vmem:[#allocation4 + $0x1b1] sm:$0xff] %vm1332_vm3, %v2298_v22  ;;  %v7807_v23 = vld [vmem:[#allocation4 + $0x220] sm:$0xff] }
 0x29d   : > { %2413 = vst.msk [vmem:[#allocation4 + $0x1b0] sm:$0xff] %vm2121_vm14, %v6777_v10  ;;  %2537 = vst.msk [vmem:[#allocation4 + $0x200] sm:$0xff] %vm2121_vm14, %v6757_v59 }
 0x29e   : > { %2414 = vst.msk [vmem:[#allocation4 + $0x1b8] sm:$0x3] %vm2123_vm15, %v6778_v3  ;;  %2538 = vst.msk [vmem:[#allocation4 + $0x208] sm:$0x3] %vm2123_vm15, %v6797_v17  ;;  %v2154_v31 = vpop.permute.xlu0 %2153 }
 0x29f   : > { %v2432_v34 = vpop.permute.xlu1 %2431  ;;  %2177 = vst.msk [vmem:[#allocation4 + $0xc1] sm:$0xff] %vm1332_vm3, %v2154_v31 }
 0x2a0   : > { %2450 = vst.msk [vmem:[#allocation4 + $0x251] sm:$0xff] %vm1332_vm3, %v2432_v34 }
 0x2a1   : > { %v7725_v9 = vld [vmem:[#allocation4 + $0x161] sm:$0xff]  ;;  %2547 = vst.msk [vmem:[#allocation4 + $0x250] sm:$0xff] %vm2121_vm14, %v6788_v26  ;;  %2269 = vst.msk [vmem:[#allocation4 + $0xc0] sm:$0xff] %vm2121_vm14, %v6803_v27  ;;  %v2842_v27 = vld [vmem:[#allocation4 + $0xb0] sm:$0xff] }
 0x2a2   : > { %2548 = vst.msk [vmem:[#allocation4 + $0x258] sm:$0x3] %vm2123_vm15, %v6818_v28  ;;  %v7734_v33 = vpack.c.bf16 %v7727_v35, %v7725_v9  ;;  %v2164_v25 = vpop.permute.xlu0 %2163 }
 0x2a3   : > { %v2294_v43 = vpop.permute.xlu1 %2293  ;;  %2182 = vst.msk [vmem:[#allocation4 + $0x111] sm:$0xff] %vm1332_vm3, %v2164_v25 }
 0x2a4   : > { %6304 = vmatmul.mubr.msk.bf16.vlgmr.msra.gmra.mxu1 %vm367_vm1, %v7734_v33  ;;  %2314 = vst.msk [vmem:[#allocation4 + $0x191] sm:$0xff] %vm1332_vm3, %v2294_v43  ;;  %v7751_v45 = vld [vmem:[#allocation4 + $0x200] sm:$0xff] }
 0x2a5   : > { %6322 = vmatpush3.bf16.msra.mxu1 %v7738_v44  ;;  %2409 = vst.msk [vmem:[#allocation4 + $0x190] sm:$0xff] %vm2121_vm14, %v6767_v54  ;;  %v2562_v36 = vpack.c.bf16 %v7753_v62, %v7751_v45  ;;  %v7814_v37 = vld [vmem:[#allocation4 + $0x1b1] sm:$0xff]  ;;  %v7846_v34 = vld [vmem:[#allocation4 + $0x201] sm:$0xff] }
 0x2a6   : > { %2410 = vst.msk [vmem:[#allocation4 + $0x198] sm:$0x3] %vm2123_vm15, %v6768_v56  ;;  %6681 = vmatprep.subr.msk.bf16.mxu1 %vm428_vm0, %v7743_v38  ;;  %v2296_v13 = vpop.permute.xlu0 %2295 }
 0x2a7   : > { %v2428_v0 = vpop.permute.xlu1 %2427  ;;  %6314 = vmatmul.mubr.msk.bf16.vlgmr.msra.gmra.mxu0 %vm367_vm1, %v2562_v36  ;;  %2315 = vst.msk [vmem:[#allocation4 + $0x1a1] sm:$0xff] %vm1332_vm3, %v2296_v13 }
 0x2a8   : > { %2448 = vst.msk [vmem:[#allocation4 + $0x231] sm:$0xff] %vm1332_vm3, %v2428_v0  ;;  %6332 = vmatpush3.bf16.msra.mxu0 %v7762_v40  ;;  %v7779_v5 = vld [vmem:[#allocation4 + $0xc0] sm:$0xff]  ;;  %v7835_v57 = vld [vmem:[#allocation4 + $0x250] sm:$0xff]  ;;  %v7867_v0 = vsel %vm428_vm0, %v7743_v38, 0 }
 0x2a9   : > { %9087 = vst [vmem:[#allocation5_spill] sm:$0xff] %v7779_v5  ;;  %2543 = vst.msk [vmem:[#allocation4 + $0x230] sm:$0xff] %vm2121_vm14, %v6783_v41  ;;  %6682 = vmatprep.subr.msk.bf16.mxu0 %vm428_vm0, %v7769_v46  ;;  %v7844_v28 = vpack.c.bf16 %v7779_v5, %v2842_v27  ;;  %v7861_v41 = vld [vmem:[#allocation4 + $0x221] sm:$0xff] }
 0x2aa   : > { %2544 = vst.msk [vmem:[#allocation4 + $0x238] sm:$0x3] %vm2123_vm15, %v6813_v7  ;;  %2412 = vst.msk [vmem:[#allocation4 + $0x1a8] sm:$0x3] %vm2123_vm15, %v6773_v50  ;;  %v2430_v63 = vpop.permute.xlu0 %2429  ;;  %v7854_v50 = vld [vmem:[#allocation4 + $0x211] sm:$0xff]  ;;  %v7863_v7 = vld [vmem:[#allocation4 + $0xe0] sm:$0xff] }
 0x2ab   : > { %2411 = vst.msk [vmem:[#allocation4 + $0x1a0] sm:$0xff] %vm2121_vm14, %v6772_v30  ;;  %v2160_v39 = vpop.permute.xlu1 %2159  ;;  %9089 = vst [vmem:[#allocation7_spill] sm:$0xff] %v7844_v28  ;;  %v7859_v30 = vpack.c.bf16 %v7854_v50, %v7846_v34 }
 0x2ac   : > { %2180 = vst.msk [vmem:[#allocation4 + $0xf1] sm:$0xff] %vm1332_vm3, %v2160_v39  ;;  %2449 = vst.msk [vmem:[#allocation4 + $0x241] sm:$0xff] %vm1332_vm3, %v2430_v63 }
 0x2ad   : > { %v7797_v51 = vld [vmem:[#allocation4 + $0x191] sm:$0xff]  ;;  %2545 = vst.msk [vmem:[#allocation4 + $0x240] sm:$0xff] %vm2121_vm14, %v6787_v21  ;;  %9090 = vst [vmem:[#allocation8_spill] sm:$0xff] %v7863_v7 }
 0x2ae   : > { %2546 = vst.msk [vmem:[#allocation4 + $0x248] sm:$0x3] %vm2123_vm15, %v6817_v11  ;;  %v7803_v12 = vpack.c.bf16 %v7797_v51, %v7795_v15  ;;  %v6821_v47 = vpop.permute.xlu0 %6820  ;;  %v7880_v11 = vld [vmem:[%s9047_s6 + $0x18] sm:$0xf] }
 0x2af   : > { %v2166_v52 = vpop.permute.xlu1 %2165  ;;  %v6822_v55 = vunpack.i.l.bf16 %v6821_v47  ;;  %v6823_v31 = vunpack.i.h.bf16 %v6821_v47 }
 0x2b0   : > { %6307 = vmatprep.mubr.msk.bf16.mxu1 %vm367_vm1, %v7803_v12  ;;  %2183 = vst.msk [vmem:[#allocation4 + $0x121] sm:$0xff] %vm1332_vm3, %v2166_v52  ;;  %v7816_v4 = vld [vmem:[#allocation4 + $0x230] sm:$0xff] }
 0x2b1   : > { %v2563_v18 = vpack.c.bf16 %v7816_v4, %v7807_v23  ;;  %2275 = vst.msk [vmem:[#allocation4 + $0xf0] sm:$0xff] %vm2121_vm14, %v6822_v55  ;;  %v7849_v43 = vld [vmem:[#allocation4 + $0x231] sm:$0xff] }
 0x2b2   : > { %v7812_v16 = vld [vmem:[#allocation4 + $0x1a1] sm:$0xff]  ;;  %v6831_v20 = vpop.permute.xlu0 %6830  ;;  %v7875_v21 = vpack.c.bf16 %v7849_v43, %v7861_v41 }
 0x2b3   : > { %v7820_v1 = vpack.c.bf16 %v7814_v37, %v7812_v16  ;;  %v6826_v8 = vpop.permute.xlu1 %6825  ;;  %6317 = vmatprep.mubr.msk.bf16.mxu0 %vm367_vm1, %v2563_v18  ;;  %v6833_v10 = vunpack.i.h.bf16 %v6831_v20  ;;  %v6832_v17 = vunpack.i.l.bf16 %v6831_v20  ;;  %v7895_v20 = vsel %vm428_vm0, %v7769_v46, 0 }
 0x2b4   : > { %v6828_v59 = vunpack.i.h.bf16 %v6826_v8  ;;  %v6827_v3 = vunpack.i.l.bf16 %v6826_v8  ;;  %v7833_v22 = vld [vmem:[#allocation4 + $0x240] sm:$0xff]  ;;  %v7891_v8 = vpack.c.bf16 %v7863_v7, %v7781_v48 }
 0x2b5   : > { %6308 = vmatmul.mubr.msk.bf16.gmra.mxu1 %vm367_vm1, %v7820_v1  ;;  %v2564_v26 = vpack.c.bf16 %v7835_v57, %v7833_v22  ;;  %2125 = vst.msk [vmem:[#allocation4 + $0x10] sm:$0xff] %vm2121_vm14, %v6832_v17 }
 0x2b6   : > { %6323 = vmatprep.mubr.msk.bf16.mxu1 %vm367_vm1, %v7826_v6  ;;  %2281 = vst.msk [vmem:[#allocation4 + $0x120] sm:$0xff] %vm2121_vm14, %v6828_v59  ;;  %2279 = vst.msk [vmem:[#allocation4 + $0x110] sm:$0xff] %vm2121_vm14, %v6827_v3  ;;  %v2162_v54 = vpop.permute.xlu0 %2161  ;;  %v7903_v59 = vld [vmem:[#allocation4 + $0x241] sm:$0xff]  ;;  %v7908_v3 = vld [vmem:[%s9047_s6 + $0x1c] sm:$0xf] }
 0x2b7   : > { %2126 = vst.msk [vmem:[#allocation4 + $0x18] sm:$0x3] %vm2123_vm15, %v6833_v10  ;;  %v6836_v56 = vpop.permute.xlu1 %6835  ;;  %6318 = vmatmul.mubr.msk.bf16.gmra.mxu0 %vm367_vm1, %v2564_v26  ;;  %9092 = vst [vmem:[#allocation10_spill] sm:$0xff] %v7891_v8 }
 0x2b8   : > { %v6838_v25 = vunpack.i.h.bf16 %v6836_v56  ;;  %v6837_v36 = vunpack.i.l.bf16 %v6836_v56  ;;  %2181 = vst.msk [vmem:[#allocation4 + $0x101] sm:$0xff] %vm1332_vm3, %v2162_v54  ;;  %6333 = vmatprep.mubr.msk.bf16.mxu0 %vm367_vm1, %v7844_v28  ;;  %v7869_v13 = vld [vmem:[#allocation4 + $0xf0] sm:$0xff]  ;;  %9093 = vst [vmem:[#allocation11_spill] sm:$0xff] %v7908_v3  ;;  %v7993_v28 = vsel %vm428_vm0, %v7908_v3, 0 }
 0x2b9   : > { %2277 = vst.msk [vmem:[#allocation4 + $0x100] sm:$0xff] %vm2121_vm14, %v6823_v31  ;;  %9091 = vst [vmem:[#allocation9_spill] sm:$0xff] %v7869_v13  ;;  %v7913_v54 = vld [vmem:[#allocation4 + $0x251] sm:$0xff] }
 0x2ba   : > { %2128 = vst.msk [vmem:[#allocation4 + $0x28] sm:$0x3] %vm2123_vm15, %v6838_v25  ;;  %v6841_v52 = vpop.permute.xlu0 %6840  ;;  %9105 = vst [vmem:[#allocation23_spill] sm:$0xff] %v7993_v28 }
 0x2bb   : > { %2127 = vst.msk [vmem:[#allocation4 + $0x20] sm:$0xff] %vm2121_vm14, %v6837_v36  ;;  %v6846_v63 = vpop.permute.xlu1 %6845  ;;  %v6843_v18 = vunpack.i.h.bf16 %v6841_v52  ;;  %v6842_v19 = vunpack.i.l.bf16 %v6841_v52 }
 0x2bc   : > { %v6848_v47 = vunpack.i.h.bf16 %v6846_v63  ;;  %v6847_v55 = vunpack.i.l.bf16 %v6846_v63  ;;  %v7921_v63 = vpack.c.bf16 %v7913_v54, %v7903_v59 }
 0x2bd   : > { %6324 = vmatmul.mubr.msk.bf16.vlgmr.msra.gmra.mxu1 %vm367_vm1, %v7859_v30  ;;  %2130 = vst.msk [vmem:[#allocation4 + $0x38] sm:$0x3] %vm2123_vm15, %v6843_v18  ;;  %v7917_v36 = vld [vmem:[#allocation4 + $0x110] sm:$0xff] }
 0x2be   : > { %6327 = vmatprep.mubr.msk.bf16.mxu1 %vm367_vm1, %v7875_v21  ;;  %6342 = vmatpush3.bf16.msra.mxu1 %v7867_v0  ;;  %2132 = vst.msk [vmem:[#allocation4 + $0x48] sm:$0x3] %vm2123_vm15, %v6848_v47  ;;  %v6851_v17 = vpop.permute.xlu0 %6850  ;;  %9095 = vst [vmem:[#allocation13_spill] sm:$0xff] %v7917_v36  ;;  %v2944_v47 = vld [vmem:[#allocation4 + $0x11] sm:$0xff] }
 0x2bf   : > { %6683 = vmatprep.subr.msk.bf16.mxu1 %vm428_vm0, %v7880_v11  ;;  %2131 = vst.msk [vmem:[#allocation4 + $0x40] sm:$0xff] %vm2121_vm14, %v6847_v55  ;;  %2129 = vst.msk [vmem:[#allocation4 + $0x30] sm:$0xff] %vm2121_vm14, %v6842_v19  ;;  %v6856_v10 = vpop.permute.xlu1 %6855  ;;  %6334 = vmatmul.mubr.msk.bf16.vlgmr.msra.gmra.mxu0 %vm367_vm1, %v7891_v8  ;;  %v6853_v31 = vunpack.i.h.bf16 %v6851_v17  ;;  %v6852_v56 = vunpack.i.l.bf16 %v6851_v17 }
 0x2c0   : > { %v6858_v26 = vunpack.i.h.bf16 %v6856_v10  ;;  %v6857_v27 = vunpack.i.l.bf16 %v6856_v10  ;;  %6352 = vmatpush3.bf16.msra.mxu0 %v7895_v20  ;;  %v7915_v25 = vld [vmem:[#allocation4 + $0x100] sm:$0xff] }
 0x2c1   : > { %9094 = vst [vmem:[#allocation12_spill] sm:$0xff] %v7915_v25  ;;  %v7925_v52 = vpack.c.bf16 %v7915_v25, %v7869_v13  ;;  %6684 = vmatprep.subr.msk.bf16.mxu0 %vm428_vm0, %v7908_v3  ;;  %2270 = vst.msk [vmem:[#allocation4 + $0xc8] sm:$0x3] %vm2123_vm15, %v6853_v31  ;;  %v7937_v10 = vld [vmem:[#allocation4 + $0x120] sm:$0xff] }
 0x2c2   : > { %v2945_v55 = vld [vmem:[#allocation4 + $0x21] sm:$0xff]  ;;  %2274 = vst.msk [vmem:[#allocation4 + $0xe8] sm:$0x3] %vm2123_vm15, %v6858_v26  ;;  %2272 = vst.msk [vmem:[#allocation4 + $0xd8] sm:$0x3] %vm2123_vm15, %v6857_v27  ;;  %v6861_v39 = vpop.permute.xlu0 %6860  ;;  %v7947_v31 = vpack.c.bf16 %v7937_v10, %v7917_v36 }
 0x2c3   : > { %9096 = vst [vmem:[#allocation14_spill] sm:$0xff] %v7925_v52  ;;  %2268 = vst.msk [vmem:[#allocation4 + $0xb8] sm:$0x3] %vm2123_vm15, %v6852_v56  ;;  %v7935_v19 = vpack.c.bf16 %v2945_v55, %v2944_v47  ;;  %v6866_v17 = vpop.permute.xlu1 %6865  ;;  %6337 = vmatprep.mubr.msk.bf16.mxu0 %vm367_vm1, %v7925_v52  ;;  %v6863_v24 = vunpack.i.h.bf16 %v6861_v39  ;;  %v6862_v27 = vunpack.i.l.bf16 %v6861_v39  ;;  %v7949_v47 = vld [vmem:[#allocation4 + $0x22] sm:$0xff] }
 0x2c4   : > { %9097 = vst [vmem:[#allocation15_spill] sm:$0xff] %v7937_v10  ;;  %v6868_v18 = vunpack.i.h.bf16 %v6866_v17  ;;  %v6867_v26 = vunpack.i.l.bf16 %v6866_v17  ;;  %9098 = vst [vmem:[#allocation16_spill] sm:$0xff] %v7947_v31 }
 0x2c5   : > { %6328 = vmatmul.mubr.msk.bf16.gmra.mxu1 %vm367_vm1, %v7921_v63  ;;  %9099 = vst [vmem:[#allocation17_spill] sm:$0xff] %v7949_v47  ;;  %2134 = vst.msk [vmem:[#allocation4 + $0x58] sm:$0x3] %vm2123_vm15, %v6863_v24 }
 0x2c6   : > { %6343 = vmatprep.mubr.msk.bf16.mxu1 %vm367_vm1, %v7935_v19  ;;  %v2946_v56 = vld [vmem:[#allocation4 + $0x31] sm:$0xff]  ;;  %2136 = vst.msk [vmem:[#allocation4 + $0x68] sm:$0x3] %vm2123_vm15, %v6868_v18  ;;  %v2947_v39 = vld [vmem:[#allocation4 + $0x41] sm:$0xff]  ;;  %v6871_v7 = vpop.permute.xlu0 %6870 }
 0x2c7   : > { %v7951_v25 = vld [vmem:[#allocation4 + $0x32] sm:$0xff]  ;;  %2135 = vst.msk [vmem:[#allocation4 + $0x60] sm:$0xff] %vm2121_vm14, %v6867_v26  ;;  %2133 = vst.msk [vmem:[#allocation4 + $0x50] sm:$0xff] %vm2121_vm14, %v6862_v27  ;;  %v7957_v17 = vpack.c.bf16 %v2946_v56, %v2945_v55  ;;  %v6876_v36 = vpop.permute.xlu1 %6875  ;;  %6338 = vmatmul.mubr.msk.bf16.gmra.mxu0 %vm367_vm1, %v7947_v31  ;;  %v6873_v18 = vunpack.i.h.bf16 %v6871_v7  ;;  %v6872_v48 = vunpack.i.l.bf16 %v6871_v7  ;;  %v7963_v26 = vpack.c.bf16 %v2947_v39, %v2946_v56 }
 0x2c8   : > { %9100 = vst [vmem:[#allocation18_spill] sm:$0xff] %v7951_v25  ;;  %v6878_v13 = vunpack.i.h.bf16 %v6876_v36  ;;  %v6877_v5 = vunpack.i.l.bf16 %v6876_v36  ;;  %v3047_v52 = vld [vmem:[#allocation4 + $0xc1] sm:$0xff]  ;;  %v7967_v55 = vsel %vm428_vm0, %v7880_v11, 0  ;;  %v7978_v56 = vld [vmem:[%s9047_s6 + $0x20] sm:$0xf] }
 0x2c9   : > { %9101 = vst [vmem:[#allocation19_spill] sm:$0xff] %v7957_v17  ;;  %v3048_v27 = vld [vmem:[#allocation4 + $0xd1] sm:$0xff]  ;;  %9102 = vst [vmem:[#allocation20_spill] sm:$0xff] %v7967_v55  ;;  %v3049_v7 = vld [vmem:[#allocation4 + $0xe1] sm:$0xff] }
 0x2ca   : > { %v3046_v24 = vld [vmem:[#allocation4 + $0xb1] sm:$0xff]  ;;  %2140 = vst.msk [vmem:[#allocation4 + $0x88] sm:$0x3] %vm2123_vm15, %v6878_v13  ;;  %2138 = vst.msk [vmem:[#allocation4 + $0x78] sm:$0x3] %vm2123_vm15, %v6873_v18  ;;  %v7980_v10 = vpack.c.bf16 %v3048_v27, %v3047_v52  ;;  %v6881_v31 = vpop.permute.xlu0 %6880 }
 0x2cb   : > { %2139 = vst.msk [vmem:[#allocation4 + $0x80] sm:$0xff] %vm2121_vm14, %v6877_v5  ;;  %2137 = vst.msk [vmem:[#allocation4 + $0x70] sm:$0xff] %vm2121_vm14, %v6872_v48  ;;  %v7973_v36 = vpack.c.bf16 %v3047_v52, %v3046_v24  ;;  %v6886_v17 = vpop.permute.xlu1 %6885  ;;  %v6883_v18 = vunpack.i.h.bf16 %v6881_v31  ;;  %v6882_v8 = vunpack.i.l.bf16 %v6881_v31  ;;  %v7987_v48 = vld [vmem:[#allocation4 + $0x42] sm:$0xff]  ;;  %v7989_v24 = vpack.c.bf16 %v3049_v7, %v3048_v27 }
 0x2cc   : > { %9103 = vst [vmem:[#allocation21_spill] sm:$0xff] %v7980_v10  ;;  %v6888_v5 = vunpack.i.h.bf16 %v6886_v17  ;;  %v6887_v13 = vunpack.i.l.bf16 %v6886_v17  ;;  %9104 = vst [vmem:[#allocation22_spill] sm:$0xff] %v7987_v48 }
 0x2cd   : > { %6344 = vmatmul.mubr.msk.bf16.vlgmr.msra.gmra.mxu1 %vm367_vm1, %v7963_v26  ;;  %6353 = vmatprep.mubr.msk.bf16.mxu0 %vm367_vm1, %v7973_v36  ;;  %2278 = vst.msk [vmem:[#allocation4 + $0x108] sm:$0x3] %vm2123_vm15, %v6883_v18  ;;  %2276 = vst.msk [vmem:[#allocation4 + $0xf8] sm:$0x3] %vm2123_vm15, %v6882_v8 }
 0x2ce   : > { %6362 = vmatpush3.bf16.msra.mxu1 %v7967_v55  ;;  %v2948_v52 = vld [vmem:[#allocation4 + $0x51] sm:$0xff]  ;;  %v2949_v10 = vld [vmem:[#allocation4 + $0x61] sm:$0xff]  ;;  %2282 = vst.msk [vmem:[#allocation4 + $0x128] sm:$0x3] %vm2123_vm15, %v6888_v5  ;;  %2280 = vst.msk [vmem:[#allocation4 + $0x118] sm:$0x3] %vm2123_vm15, %v6887_v13  ;;  %v2434_v55 = vpop.permute.xlu0 %2433 }
 0x2cf   : > { %6685 = vmatprep.subr.msk.bf16.mxu1 %vm428_vm0, %v7978_v56  ;;  %v7997_v17 = vld [vmem:[#allocation4 + $0x52] sm:$0xff]  ;;  %v8003_v31 = vpack.c.bf16 %v2949_v10, %v2948_v52  ;;  %v8005_v27 = vpack.c.bf16 %v2948_v52, %v2947_v39  ;;  %v6891_v47 = vpop.permute.xlu1 %6890  ;;  %6354 = vmatmul.mubr.msk.bf16.vlgmr.msra.gmra.mxu0 %vm367_vm1, %v7989_v24  ;;  %2451 = vst.msk [vmem:[#allocation4 + $0x261] sm:$0xff] %vm1332_vm3, %v2434_v55  ;;  %v8015_v8 = vld [vmem:[#allocation4 + $0x62] sm:$0xff] }
 0x2d0   : > { %9106 = vst [vmem:[#allocation24_spill] sm:$0xff] %v7997_v17  ;;  %v6892_v3 = vunpack.i.l.bf16 %v6891_v47  ;;  %6372 = vmatpush3.bf16.msra.mxu0 %v7993_v28  ;;  %9108 = vst [vmem:[#allocation26_spill] sm:$0xff] %v8015_v8  ;;  %v6893_v39 = vunpack.i.h.bf16 %v6891_v47  ;;  %v8033_v28 = vpack.c.bf16 %v7751_v45, %v7703_v14 }
 0x2d1   : > { %9107 = vst [vmem:[#allocation25_spill] sm:$0xff] %v8005_v27  ;;  %6347 = vmatprep.mubr.msk.bf16.mxu1 %vm367_vm1, %v8003_v31  ;;  %6686 = vmatprep.subr.msk.bf16.mxu0 %vm428_vm0, %v7529_v32 }
 0x2d2   : > { %v2950_v5 = vld [vmem:[#allocation4 + $0x71] sm:$0xff]  ;;  %v8017_v13 = vld [vmem:[#allocation4 + $0x81] sm:$0xff]  ;;  %2549 = vst.msk [vmem:[#allocation4 + $0x260] sm:$0xff] %vm2121_vm14, %v6892_v3  ;;  %v2300_v47 = vpop.permute.xlu0 %2299  ;;  %9112 = vst [vmem:[#allocation30_spill] sm:$0xff] %v8033_v28 }
 0x2d3   : > { %9109 = vst [vmem:[#allocation27_spill] sm:$0xff] %v8017_v13  ;;  %v8021_v18 = vld [vmem:[#allocation4 + $0x72] sm:$0xff]  ;;  %v8025_v55 = vpack.c.bf16 %v8017_v13, %v2950_v5  ;;  %v8027_v52 = vpack.c.bf16 %v2950_v5, %v2949_v10  ;;  %v2373_v27 = vpop.permute.xlu1 %2372  ;;  %2317 = vst.msk [vmem:[#allocation4 + $0x1c1] sm:$0xff] %vm1332_vm3, %v2300_v47 }
 0x2d4   : > { %9110 = vst [vmem:[#allocation28_spill] sm:$0xff] %v8021_v18  ;;  %2415 = vst.msk [vmem:[#allocation4 + $0x1c0] sm:$0xff] %vm2121_vm14, %v6893_v39  ;;  %v3050_v32 = vld [vmem:[#allocation4 + $0xf1] sm:$0xff]  ;;  %v3051_v3 = vld [vmem:[#allocation4 + $0x101] sm:$0xff] }
 0x2d5   : > { %9111 = vst [vmem:[#allocation29_spill] sm:$0xff] %v8027_v52  ;;  %6348 = vmatmul.mubr.msk.bf16.gmra.mxu1 %vm367_vm1, %v8025_v55  ;;  %2416 = vst.msk [vmem:[#allocation4 + $0x1c8] sm:$0x3] %vm2123_vm15, %v2373_v27  ;;  %v3052_v10 = vld [vmem:[#allocation4 + $0x111] sm:$0xff]  ;;  %v8042_v5 = vpack.c.bf16 %v3051_v3, %v3050_v32  ;;  %v8044_v25 = vld [vmem:[#allocation4 + $0x121] sm:$0xff]  ;;  %v8046_v14 = vpack.c.bf16 %v3050_v32, %v3049_v7  ;;  %v8068_v7 = vpack.c.bf16 %v7807_v23, %v7753_v62 }
 0x2d6   : > { %6363 = vmatprep.mubr.msk.bf16.mxu1 %vm367_vm1, %v8033_v28  ;;  %v8048_v45 = vpack.c.bf16 %v3052_v10, %v3051_v3  ;;  %v2507_v13 = vpop.permute.xlu0 %2506  ;;  %v8051_v39 = vpack.c.bf16 %v8044_v25, %v3052_v10  ;;  %v8058_v28 = vpack.c.bf16 %v7725_v9, %v7689_v42  ;;  %v8076_v32 = vpack.c.bf16 %v7833_v22, %v7816_v4  ;;  %v1931_v3 = vld [vmem:[%s7376_s20 + $0xec] sm:$0x1] }
 0x2d7   : > { %9113 = vst [vmem:[#allocation31_spill] sm:$0xff] %v8046_v14  ;;  %v6896_v47 = vpop.permute.xlu1 %6895  ;;  %2550 = vst.msk [vmem:[#allocation4 + $0x268] sm:$0x3] %vm2123_vm15, %v2507_v13  ;;  %6357 = vmatprep.mubr.msk.bf16.mxu0 %vm367_vm1, %v8042_v5  ;;  %v8072_v13 = vsel %vm428_vm0, %v7978_v56, 0  ;;  %v8089_v62 = vpack.c.bf16 %v7795_v15, %v7727_v35  ;;  %v8093_v4 = vpack.c.bf16 %v7812_v16, %v7797_v51 }
 0x2d8   : > { %9114 = vst [vmem:[#allocation32_spill] sm:$0xff] %v8048_v45  ;;  %v6898_v27 = vunpack.i.h.bf16 %v6896_v47  ;;  %v6897_v52 = vunpack.i.l.bf16 %v6896_v47  ;;  %6358 = vmatmul.mubr.msk.bf16.gmra.mxu0 %vm367_vm1, %v8051_v39  ;;  %v8122_v51 = vpack.c.bf16 %v7861_v41, %v7854_v50  ;;  %v3588_v50 = vld [vmem:[#allocation4 + $0x182] sm:$0xff]  ;;  %v2011_v47 = vunpack.c.l.bf16 %v1931_v3  ;;  %v9124_v3 = vld [vmem:[#allocation16_spill] sm:$0xff] }
 0x2d9   : > { %6373 = vmatprep.mubr.msk.bf16.mxu0 %vm367_vm1, %v8058_v28  ;;  %v3155_v23 = vld [vmem:[#allocation4 + $0x260] sm:$0xff] }
 0x2da   : > { %2141 = vst.msk [vmem:[#allocation4 + $0x90] sm:$0xff] %vm2121_vm14, %v6898_v27  ;;  %2283 = vst.msk [vmem:[#allocation4 + $0x130] sm:$0xff] %vm2121_vm14, %v6897_v52  ;;  %v2100_v9 = vpop.permute.xlu0 %2099  ;;  %v8101_v22 = vpack.c.bf16 %v3155_v23, %v7835_v57  ;;  %v3586_v57 = vld [vmem:[#allocation4 + $0x162] sm:$0xff]  ;;  %v9116_v27 = vld [vmem:[#allocation20_spill] sm:$0xff] }
 0x2db   : > { %v2243_v42 = vpop.permute.xlu1 %2242  ;;  %2142 = vst.msk [vmem:[#allocation4 + $0x98] sm:$0x3] %vm2123_vm15, %v2100_v9  ;;  %v9117_v23 = vld [vmem:[#allocation17_spill] sm:$0xff] }
 0x2dc   : > { %2284 = vst.msk [vmem:[#allocation4 + $0x138] sm:$0x3] %vm2123_vm15, %v2243_v42  ;;  %v3257_v35 = vld [vmem:[#allocation4 + $0x1c1] sm:$0xff]  ;;  %v3827_v42 = vld [vmem:[#allocation4 + $0x12] sm:$0xff] }
 0x2dd   : > { %6364 = vmatmul.mubr.msk.bf16.vlgmr.msra.gmra.mxu1 %vm367_vm1, %v8068_v7  ;;  %v8114_v15 = vpack.c.bf16 %v3257_v35, %v7814_v37  ;;  %v3584_v37 = vld [vmem:[#allocation4 + $0x142] sm:$0xff]  ;;  %v8200_v35 = vpack.c.bf16 %v9117_v23, %v3827_v42 }
 0x2de   : > { %6367 = vmatprep.mubr.msk.bf16.mxu1 %vm367_vm1, %v8076_v32  ;;  %6382 = vmatpush3.bf16.msra.mxu1 %v8072_v13 }
 0x2df   : > { %6687 = vmatprep.subr.msk.bf16.mxu1 %vm428_vm0, %v7548_v61  ;;  %v8105_v61 = vpack.c.bf16 %v7846_v34, %v7809_v29  ;;  %v3359_v29 = vld [vmem:[#allocation4 + $0x261] sm:$0xff]  ;;  %v8162_v34 = vld [vmem:[#allocation4 + $0x172] sm:$0xff] }
 0x2e0   : > { %6374 = vmatmul.mubr.msk.bf16.vlgmr.msra.gmra.mxu0 %vm367_vm1, %v8089_v62  ;;  %v8141_v16 = vpack.c.bf16 %v3359_v29, %v7913_v54  ;;  %v9118_v29 = vld [vmem:[#allocation18_spill] sm:$0xff] }
 0x2e1   : > { %6392 = vmatpush3.bf16.msra.mxu0 %v7536_v53  ;;  %6377 = vmatprep.mubr.msk.bf16.mxu0 %vm367_vm1, %v8093_v4 }
 0x2e2   : > { %6688 = vmatprep.subr.msk.bf16.mxu0 %vm428_vm0, %v7567_v2  ;;  %v8126_v2 = vpack.c.bf16 %v7903_v59, %v7849_v43  ;;  %v3593_v43 = vpack.c.bf16 %v8162_v34, %v3586_v57  ;;  %v1873_v59 = vld [vmem:[%s7376_s20 + $0x4] sm:$0x1] }
 0x2e3   : > { %v1953_v54 = vunpack.c.l.bf16 %v1873_v59  ;;  %v8247_v59 = vld [vmem:[%s9047_s6] sm:$0xf] }
 0x2e5   : > { %6368 = vmatmul.mubr.msk.bf16.gmra.mxu1 %vm367_vm1, %v8101_v22 }
 0x2e6   : > { %6383 = vmatprep.mubr.msk.bf16.mxu1 %vm367_vm1, %v8105_v61 }
 0x2e8   : > { %6378 = vmatmul.mubr.msk.bf16.gmra.mxu0 %vm367_vm1, %v8114_v15 }
 0x2e9   : > { %6393 = vmatprep.mubr.msk.bf16.mxu0 %vm367_vm1, %v7826_v6 }
 0x2ed   : > { %6384 = vmatmul.mubr.msk.bf16.vlgmr.msra.gmra.mxu1 %vm367_vm1, %v8122_v51 }
 0x2ee   : > { %6387 = vmatprep.mubr.msk.bf16.mxu1 %vm367_vm1, %v8126_v2  ;;  %6402 = vmatpush3.bf16.msra.mxu1 %v7555_v49 }
 0x2ef   : > { %6689 = vmatprep.subr.msk.bf16.mxu1 %vm428_vm0, %v7577_v58  ;;  %v8149_v58 = vld [vmem:[#allocation4 + $0x152] sm:$0xff] }
 0x2f0   : > { %6394 = vmatmul.mubr.msk.bf16.vlgmr.msra.gmra.mxu0 %vm367_vm1, %v7859_v30  ;;  %v3592_v6 = vpack.c.bf16 %v8149_v58, %v3584_v37  ;;  %v8177_v30 = vld [vmem:[#allocation4 + $0x1b2] sm:$0xff]  ;;  %v8215_v37 = vpack.c.bf16 %v7987_v48, %v9118_v29  ;;  %v9140_v48 = vld [vmem:[#allocation21_spill] sm:$0xff] }
 0x2f1   : > { %6412 = vmatpush3.bf16.msra.mxu0 %v7738_v44  ;;  %6397 = vmatprep.mubr.msk.bf16.mxu0 %vm367_vm1, %v7875_v21  ;;  %v1872_v21 = vld [vmem:[%s7376_s20] ss:$232 sps:$4 sm:$0xff]  }
 0x2f2   : > { %6690 = vmatprep.subr.msk.bf16.mxu0 %vm428_vm0, %v7743_v38  ;;  %v2010_v10 = vunpack.c.h.bf16 %v1872_v21 }
 0x2f4   : > { %v6909_v9 = vpack.i.bf16 %v2011_v47, %v2010_v10  ;;  %v9125_v10 = vld [vmem:[#allocation30_spill] sm:$0xff] }
 0x2f5   : > { %6388 = vmatmul.mubr.msk.bf16.gmra.mxu1 %vm367_vm1, %v8141_v16 }
 0x2f6   : > { %6403 = vmatprep.mubr.msk.bf16.mxu1 %vm367_vm1, %v7695_v60  ;;  %v8160_v60 = vld [vmem:[#allocation4 + $0x192] sm:$0xff] }
 0x2f8   : > { %6398 = vmatmul.mubr.msk.bf16.gmra.mxu0 %vm367_vm1, %v7921_v63  ;;  %v9115_v63 = vld [vmem:[#allocation11_spill] sm:$0xff] }
 0x2f9   : > { %6413 = vmatprep.mubr.msk.bf16.mxu0 %vm367_vm1, %v3592_v6  ;;  %v8219_v6 = vpack.c.bf16 %v8015_v8, %v7997_v17 }
 0x2fd   : > { %6404 = vmatmul.mubr.msk.bf16.vlgmr.msra.gmra.mxu1 %vm367_vm1, %v7734_v33  ;;  %v3594_v33 = vpack.c.bf16 %v8160_v60, %v3588_v50 }
 0x2fe   : > { %6407 = vmatprep.mubr.msk.bf16.mxu1 %vm367_vm1, %v7803_v12  ;;  %6422 = vmatpush3.bf16.msra.mxu1 %v7762_v40  ;;  %v3590_v12 = vld [vmem:[#allocation4 + $0x1a2] sm:$0xff] }
 0x2ff   : > { %6691 = vmatprep.subr.msk.bf16.mxu1 %vm428_vm0, %v7769_v46  ;;  %v3595_v41 = vpack.c.bf16 %v8177_v30, %v3590_v12 }
 0x300   : > { %6414 = vmatmul.mubr.msk.bf16.vlgmr.msra.gmra.mxu0 %vm367_vm1, %v3593_v43  ;;  %v9119_v43 = vld [vmem:[#allocation23_spill] sm:$0xff] }
 0x301   : > { %6432 = vmatpush3.bf16.msra.mxu0 %v7867_v0  ;;  %6417 = vmatprep.mubr.msk.bf16.mxu0 %vm367_vm1, %v3594_v33  ;;  %v8229_v33 = vld [vmem:[%s9047_s6 + $0x4] sm:$0xf] }
 0x302   : > { %6692 = vmatprep.subr.msk.bf16.mxu0 %vm428_vm0, %v7880_v11 }
 0x305   : > { %6408 = vmatmul.mubr.msk.bf16.gmra.mxu1 %vm367_vm1, %v7820_v1  ;;  %v1952_v1 = vunpack.c.l.bf16 %v1872_v21 }
 0x306   : > { %6423 = vmatprep.mubr.msk.bf16.mxu1 %vm367_vm1, %v7935_v19 }
 0x307   : > { %v6899_v52 = vpack.i.bf16 %v1953_v54, %v1952_v1  ;;  %v8256_v1 = vpack.c.bf16 %v3586_v57, %v8149_v58  ;;  %v8270_v54 = vld [vmem:[%s9047_s6 + $0x8] sm:$0xf]  ;;  %v8275_v58 = vpack.c.bf16 %v3588_v50, %v8162_v34  ;;  %v8278_v57 = vpack.c.bf16 %v3590_v12, %v8160_v60  ;;  %v4077_v60 = vld [vmem:[#allocation4 + $0x1c2] sm:$0xff]  ;;  %v9121_v50 = vld [vmem:[#allocation7_spill] sm:$0xff] }
 0x308   : > { %6418 = vmatmul.mubr.msk.bf16.gmra.mxu0 %vm367_vm1, %v3595_v41  ;;  %v8233_v41 = vld [vmem:[#allocation4 + $0x82] sm:$0xff]  ;;  %v8297_v34 = vpack.c.bf16 %v4077_v60, %v8177_v30  ;;  %v9129_v60 = vld [vmem:[#allocation19_spill] sm:$0xff] }
 0x309   : > { %6433 = vmatprep.mubr.msk.bf16.mxu0 %vm367_vm1, %v7973_v36  ;;  %6900 = vrot.lane.b32.xlu0 %v6899_v52, %s6934_s21  ;;  %9120 = vst [vmem:[#allocation11_spill] sm:$0xff] %v8233_v41  ;;  %v8242_v21 = vpack.c.bf16 %v8233_v41, %v8021_v18  ;;  %v8288_v52 = vld [vmem:[%s9047_s6 + $0xc] sm:$0xf]  ;;  %v9122_v12 = vld [vmem:[#allocation10_spill] sm:$0xff] }
 0x30a   : > { %v9123_v30 = vld [vmem:[#allocation14_spill] sm:$0xff] }
 0x30d   : > { %6424 = vmatmul.mubr.msk.bf16.vlgmr.msra.gmra.mxu1 %vm367_vm1, %v7963_v26  ;;  %6910 = vrot.lane.b32.xlu0 %v6909_v9, %s6934_s21 }
 0x30e   : > { %6427 = vmatprep.mubr.msk.bf16.mxu1 %vm367_vm1, %v8003_v31  ;;  %6442 = vmatpush3.bf16.msra.mxu1 %v7895_v20 }
 0x30f   : > { %6693 = vmatprep.subr.msk.bf16.mxu1 %vm428_vm0, %v9115_v63 }
 0x310   : > { %6434 = vmatmul.mubr.msk.bf16.vlgmr.msra.gmra.mxu0 %vm367_vm1, %v7989_v24 }
 0x311   : > { %6452 = vmatpush3.bf16.msra.mxu0 %v9116_v27  ;;  %6437 = vmatprep.mubr.msk.bf16.mxu0 %vm367_vm1, %v8042_v5 }
 0x312   : > { %6694 = vmatprep.subr.msk.bf16.mxu0 %vm428_vm0, %v7978_v56 }
 0x315   : > { %6428 = vmatmul.mubr.msk.bf16.gmra.mxu1 %vm367_vm1, %v8025_v55 }
 0x316   : > { %6443 = vmatprep.mubr.msk.bf16.mxu1 %vm367_vm1, %v8200_v35 }
 0x318   : > { %6438 = vmatmul.mubr.msk.bf16.gmra.mxu0 %vm367_vm1, %v8051_v39 }
 0x319   : > { %6453 = vmatprep.mubr.msk.bf16.mxu0 %vm367_vm1, %v8058_v28 }
 0x31d   : > { %6444 = vmatmul.mubr.msk.bf16.vlgmr.msra.gmra.mxu1 %vm367_vm1, %v8215_v37 }
 0x31e   : > { %6447 = vmatprep.mubr.msk.bf16.mxu1 %vm367_vm1, %v8219_v6  ;;  %6462 = vmatpush3.bf16.msra.mxu1 %v9119_v43 }
 0x31f   : > { %6695 = vmatprep.subr.msk.bf16.mxu1 %vm428_vm0, %v8229_v33 }
 0x320   : > { %6454 = vmatmul.mubr.msk.bf16.vlgmr.msra.gmra.mxu0 %vm367_vm1, %v8089_v62 }
 0x321   : > { %6472 = vmatpush3.bf16.msra.mxu0 %v8072_v13  ;;  %6457 = vmatprep.mubr.msk.bf16.mxu0 %vm367_vm1, %v8093_v4 }
 0x322   : > { %6696 = vmatprep.subr.msk.bf16.mxu0 %vm428_vm0, %v8247_v59 }
 0x325   : > { %6448 = vmatmul.mubr.msk.bf16.gmra.mxu1 %vm367_vm1, %v8242_v21 }
 0x326   : > { %6463 = vmatprep.mubr.msk.bf16.mxu1 %vm367_vm1, %v8105_v61 }
 0x328   : > { %6458 = vmatmul.mubr.msk.bf16.gmra.mxu0 %vm367_vm1, %v8114_v15 }
 0x329   : > { %6473 = vmatprep.mubr.msk.bf16.mxu0 %vm367_vm1, %v8256_v1 }
 0x32d   : > { %6464 = vmatmul.mubr.msk.bf16.vlgmr.msra.gmra.mxu1 %vm367_vm1, %v8122_v51 }
 0x32e   : > { %6467 = vmatprep.mubr.msk.bf16.mxu1 %vm367_vm1, %v8126_v2  ;;  %6482 = vmatpush3.bf16.msra.mxu1 %v7536_v53 }
 0x32f   : > { %6697 = vmatprep.subr.msk.bf16.mxu1 %vm428_vm0, %v8270_v54 }
 0x330   : > { %6474 = vmatmul.mubr.msk.bf16.vlgmr.msra.gmra.mxu0 %vm367_vm1, %v8275_v58 }
 0x331   : > { %6492 = vmatpush3.bf16.msra.mxu0 %v7555_v49  ;;  %6477 = vmatprep.mubr.msk.bf16.mxu0 %vm367_vm1, %v8278_v57 }
 0x332   : > { %6698 = vmatprep.subr.msk.bf16.mxu0 %vm428_vm0, %v8288_v52 }
 0x335   : > { %6468 = vmatmul.mubr.msk.bf16.gmra.mxu1 %vm367_vm1, %v8141_v16 }
 0x336   : > { %6483 = vmatprep.mubr.msk.bf16.mxu1 %vm367_vm1, %v7935_v19 }
 0x338   : > { %6478 = vmatmul.mubr.msk.bf16.gmra.mxu0 %vm367_vm1, %v8297_v34 }
 0x339   : > { %6493 = vmatprep.mubr.msk.bf16.mxu0 %vm367_vm1, %v9121_v50  ;;  %v9131_v50 = vld [vmem:[#allocation8_spill] sm:$0xff] }
 0x33d   : > { %6484 = vmatmul.mubr.msk.bf16.vlgmr.msra.gmra.mxu1 %vm367_vm1, %v7963_v26 }
 0x33e   : > { %6487 = vmatprep.mubr.msk.bf16.mxu1 %vm367_vm1, %v8003_v31  ;;  %6502 = vmatpush3.bf16.msra.mxu1 %v7738_v44 }
 0x33f   : > { %6699 = vmatprep.subr.msk.bf16.mxu1 %vm428_vm0, %v7743_v38 }
 0x340   : > { %6494 = vmatmul.mubr.msk.bf16.vlgmr.msra.gmra.mxu0 %vm367_vm1, %v9122_v12 }
 0x341   : > { %6512 = vmatpush3.bf16.msra.mxu0 %v7762_v40  ;;  %6497 = vmatprep.mubr.msk.bf16.mxu0 %vm367_vm1, %v9123_v30 }
 0x342   : > { %6700 = vmatprep.subr.msk.bf16.mxu0 %vm428_vm0, %v7769_v46 }
 0x345   : > { %6488 = vmatmul.mubr.msk.bf16.gmra.mxu1 %vm367_vm1, %v8025_v55 }
 0x346   : > { %6503 = vmatprep.mubr.msk.bf16.mxu1 %vm367_vm1, %v7973_v36 }
 0x348   : > { %6498 = vmatmul.mubr.msk.bf16.gmra.mxu0 %vm367_vm1, %v9124_v3 }
 0x349   : > { %6513 = vmatprep.mubr.msk.bf16.mxu0 %vm367_vm1, %v9125_v10  ;;  %v9133_v10 = vld [vmem:[#allocation13_spill] sm:$0xff] }
 0x34d   : > { %6504 = vmatmul.mubr.msk.bf16.vlgmr.msra.gmra.mxu1 %vm367_vm1, %v7989_v24 }
 0x34e   : > { %6507 = vmatprep.mubr.msk.bf16.mxu1 %vm367_vm1, %v8042_v5  ;;  %6522 = vmatpush3.bf16.msra.mxu1 %v7867_v0 }
 0x34f   : > { %6701 = vmatprep.subr.msk.bf16.mxu1 %vm428_vm0, %v7880_v11 }
 0x350   : > { %6514 = vmatmul.mubr.msk.bf16.vlgmr.msra.gmra.mxu0 %vm367_vm1, %v8068_v7 }
 0x351   : > { %6532 = vmatpush3.bf16.msra.mxu0 %v7895_v20  ;;  %6517 = vmatprep.mubr.msk.bf16.mxu0 %vm367_vm1, %v8076_v32  ;;  %v9126_v32 = vld [vmem:[#allocation6_spill] sm:$0xff] }
 0x352   : > { %6702 = vmatprep.subr.msk.bf16.mxu0 %vm428_vm0, %v9115_v63 }
 0x355   : > { %6508 = vmatmul.mubr.msk.bf16.gmra.mxu1 %vm367_vm1, %v8051_v39 }
 0x356   : > { %6523 = vmatprep.mubr.msk.bf16.mxu1 %vm367_vm1, %v8058_v28 }
 0x358   : > { %6518 = vmatmul.mubr.msk.bf16.gmra.mxu0 %vm367_vm1, %v8101_v22  ;;  %v9127_v22 = vld [vmem:[#allocation5_spill] sm:$0xff] }
 0x359   : > { %6533 = vmatprep.mubr.msk.bf16.mxu0 %vm367_vm1, %v8105_v61  ;;  %v9128_v47 = vpack.c.bf16 %v9126_v32, %v9127_v22  ;;  %v9134_v32 = vld [vmem:[#allocation12_spill] sm:$0xff] }
 0x35a   : > { %v9135_v22 = vpack.c.bf16 %v9133_v10, %v9134_v32  ;;  %v9138_v10 = vld [vmem:[#allocation15_spill] sm:$0xff] }
 0x35d   : > { %6524 = vmatmul.mubr.msk.bf16.vlgmr.msra.gmra.mxu1 %vm367_vm1, %v8089_v62 }
 0x35e   : > { %6527 = vmatprep.mubr.msk.bf16.mxu1 %vm367_vm1, %v8093_v4  ;;  %6542 = vmatpush3.bf16.msra.mxu1 %v9116_v27 }
 0x35f   : > { %6703 = vmatprep.subr.msk.bf16.mxu1 %vm428_vm0, %v7978_v56 }
 0x360   : > { %6534 = vmatmul.mubr.msk.bf16.vlgmr.msra.gmra.mxu0 %vm367_vm1, %v8122_v51 }
 0x361   : > { %6552 = vmatpush3.bf16.msra.mxu0 %v9119_v43  ;;  %6537 = vmatprep.mubr.msk.bf16.mxu0 %vm367_vm1, %v8126_v2 }
 0x362   : > { %6704 = vmatprep.subr.msk.bf16.mxu0 %vm428_vm0, %v8229_v33  ;;  %v9130_v33 = vld [vmem:[#allocation9_spill] sm:$0xff] }
 0x363   : > { %v9132_v12 = vpack.c.bf16 %v9130_v33, %v9131_v50  ;;  %v9136_v50 = vld [vmem:[#allocation25_spill] sm:$0xff] }
 0x364   : > { %v8363_v7 = vpop.f32.mrf.mxu1 }
 0x365   : > { %6528 = vmatmul.mubr.msk.bf16.gmra.mxu1 %vm367_vm1, %v8114_v15 }
 0x366   : > { %6543 = vmatprep.mubr.msk.bf16.mxu1 %vm367_vm1, %v9128_v47  ;;  %v8369_v42 = vpop.f32.mrf.mxu1  ;;  %v4597_v47 = vld [vmem:[#allocation4 + $0x130] sm:$0xff] }
 0x367   : > { %v8371_v9 = vpop.f32.mrf.mxu0  ;;  %v4601_v32 = vpack.c.bf16 %v4597_v47, %v9138_v10  ;;  %v9143_v47 = vld [vmem:[#allocation27_spill] sm:$0xff] }
 0x368   : > { %6538 = vmatmul.mubr.msk.bf16.gmra.mxu0 %vm367_vm1, %v8141_v16  ;;  %v8381_v30 = vpop.f32.mrf.mxu1 }
 0x369   : > { %6553 = vmatprep.mubr.msk.bf16.mxu0 %vm367_vm1, %v9129_v60  ;;  %v8383_v3 = vpop.f32.mrf.mxu0 }
 0x36a   : > { %v8392_v41 = vpop.f32.mrf.mxu1 }
 0x36b   : > { %v8394_v33 = vpop.f32.mrf.mxu0 }
 0x36d   : > { %6544 = vmatmul.mubr.msk.bf16.vlgmr.msra.gmra.mxu1 %vm367_vm1, %v9132_v12  ;;  %v9137_v12 = vld [vmem:[#allocation29_spill] sm:$0xff]  ;;  %v8407_v8 = vpop.f32.mrf.mxu0 }
 0x36e   : > { %6547 = vmatprep.mubr.msk.bf16.mxu1 %vm367_vm1, %v9135_v22  ;;  %6562 = vmatpush3.bf16.msra.mxu1 %v8072_v13 }
 0x36f   : > { %6705 = vmatprep.subr.msk.bf16.mxu1 %vm428_vm0, %v8247_v59  ;;  %v4695_v59 = vld [vmem:[#allocation4 + $0x91] sm:$0xff] }
 0x370   : > { %6554 = vmatmul.mubr.msk.bf16.vlgmr.msra.gmra.mxu0 %vm367_vm1, %v9136_v50  ;;  %v8418_v10 = vpack.c.bf16 %v4695_v59, %v9143_v47 }
 0x371   : > { %6572 = vmatpush3.bf16.msra.mxu0 %v7536_v53  ;;  %6557 = vmatprep.mubr.msk.bf16.mxu0 %vm367_vm1, %v9137_v12 }
 0x372   : > { %6706 = vmatprep.subr.msk.bf16.mxu0 %vm428_vm0, %v8270_v54  ;;  %9144 = vst [vmem:[#allocation10_spill] sm:$0xff] %v8418_v10 }
 0x375   : > { %v8402_v22 = vpop.f32.mrf.mxu1  ;;  %6548 = vmatmul.mubr.msk.bf16.gmra.mxu1 %vm367_vm1, %v4601_v32 }
 0x376   : > { %9139 = vst [vmem:[#allocation20_spill] sm:$0xff] %v8402_v22  ;;  %6563 = vmatprep.mubr.msk.bf16.mxu1 %vm367_vm1, %v9140_v48 }
 0x377   : > { %v8409_v18 = vpop.f32.mrf.mxu1  ;;  %v8415_v17 = vpop.f32.mrf.mxu0 }
 0x378   : > { %9142 = vst [vmem:[#allocation7_spill] sm:$0xff] %v8415_v17  ;;  %6558 = vmatmul.mubr.msk.bf16.gmra.mxu0 %vm367_vm1, %v8418_v10 }
 0x379   : > { %v8413_v53 = vpop.f32.mrf.mxu1  ;;  %v8422_v54 = vpop.f32.mrf.mxu0  ;;  %6573 = vmatprep.mubr.msk.bf16.mxu0 %vm367_vm1, %v7973_v36 }
 0x37a   : > { %9141 = vst [vmem:[#allocation23_spill] sm:$0xff] %v8413_v53 }
 0x37b   : > { %v8420_v23 = vpop.f32.mrf.mxu1  ;;  %v8428_v32 = vpop.f32.mrf.mxu0 }
 0x37c   : > { %9145 = vst [vmem:[#allocation14_spill] sm:$0xff] %v8428_v32  ;;  %v4792_v32 = vld [vmem:[#allocation4 + $0x131] sm:$0xff] }
 0x37d   : > { %v8430_v29 = vpop.f32.mrf.mxu1  ;;  %6564 = vmatmul.mubr.msk.bf16.vlgmr.msra.gmra.mxu1 %vm367_vm1, %v8046_v14  ;;  %v8434_v53 = vpop.f32.mrf.mxu0 }
 0x37e   : > { %6567 = vmatprep.mubr.msk.bf16.mxu1 %vm367_vm1, %v8048_v45  ;;  %6582 = vmatpush3.bf16.msra.mxu1 %v7555_v49  ;;  %v8457_v49 = vpack.c.bf16 %v4792_v32, %v8044_v25 }
 0x37f   : > { %v8436_v59 = vpop.f32.mrf.mxu1  ;;  %6707 = vmatprep.subr.msk.bf16.mxu1 %vm428_vm0, %v8288_v52  ;;  %v8445_v47 = vpop.f32.mrf.mxu0 }
 0x380   : > { %6574 = vmatmul.mubr.msk.bf16.vlgmr.msra.gmra.mxu0 %vm367_vm1, %v7989_v24  ;;  %9146 = vst [vmem:[#allocation16_spill] sm:$0xff] %v8457_v49 }
 0x381   : > { %v8443_v36 = vpop.f32.mrf.mxu1  ;;  %v8449_v14 = vpop.f32.mrf.mxu0  ;;  %6592 = vmatpush3.bf16.msra.mxu0 %v7738_v44  ;;  %6577 = vmatprep.mubr.msk.bf16.mxu0 %vm367_vm1, %v8042_v5 }
 0x382   : > { %6708 = vmatprep.subr.msk.bf16.mxu0 %vm428_vm0, %v7743_v38 }
 0x383   : > { %v8447_v10 = vpop.f32.mrf.mxu1  ;;  %v8461_v45 = vpop.f32.mrf.mxu0 }
 0x385   : > { %v8459_v52 = vpop.f32.mrf.mxu1  ;;  %6568 = vmatmul.mubr.msk.bf16.gmra.mxu1 %vm367_vm1, %v8457_v49  ;;  %v8469_v44 = vpop.f32.mrf.mxu0 }
 0x386   : > { %9147 = vst [vmem:[#allocation30_spill] sm:$0xff] %v8459_v52  ;;  %6583 = vmatprep.mubr.msk.bf16.mxu1 %vm367_vm1, %v7935_v19  ;;  %v1892_v19 = vld [vmem:[%s7376_s20 + $0x50] ss:$232 sps:$4 sm:$0xff]  }
 0x387   : > { %v8467_v24 = vpop.f32.mrf.mxu1  ;;  %v8475_v5 = vpop.f32.mrf.mxu0 }
 0x388   : > { %9149 = vst [vmem:[#allocation5_spill] sm:$0xff] %v8475_v5  ;;  %6578 = vmatmul.mubr.msk.bf16.gmra.mxu0 %vm367_vm1, %v8051_v39  ;;  %v1972_v39 = vunpack.c.l.bf16 %v1892_v19 }
 0x389   : > { %v8473_v25 = vpop.f32.mrf.mxu1  ;;  %v8479_v52 = vpop.f32.mrf.mxu0  ;;  %6593 = vmatprep.mubr.msk.bf16.mxu0 %vm367_vm1, %v8200_v35 }
 0x38a   : > { %9148 = vst [vmem:[#allocation6_spill] sm:$0xff] %v8473_v25  ;;  %v1893_v25 = vld [vmem:[%s7376_s20 + $0x54] sm:$0x1] }
 0x38b   : > { %v8477_v32 = vpop.f32.mrf.mxu1  ;;  %v8485_v38 = vpop.f32.mrf.mxu0  ;;  %v1973_v35 = vunpack.c.l.bf16 %v1893_v25 }
 0x38c   : > { %9150 = vst [vmem:[#allocation19_spill] sm:$0xff] %v8477_v32  ;;  %9151 = vst [vmem:[#allocation9_spill] sm:$0xff] %v8485_v38  ;;  %v1951_v32 = vld [vmem:[%s7376_s20 + $0x13c] sm:$0x1] }
 0x38d   : > { %v8487_v49 = vpop.f32.mrf.mxu1  ;;  %6584 = vmatmul.mubr.msk.bf16.vlgmr.msra.gmra.mxu1 %vm367_vm1, %v7963_v26  ;;  %v8493_v5 = vpop.f32.mrf.mxu0  ;;  %v6904_v26 = vpack.i.bf16 %v1973_v35, %v1972_v39 }
 0x38e   : > { %9152 = vst [vmem:[#allocation8_spill] sm:$0xff] %v8493_v5  ;;  %6587 = vmatprep.mubr.msk.bf16.mxu1 %vm367_vm1, %v8003_v31  ;;  %6602 = vmatpush3.bf16.msra.mxu1 %v7762_v40  ;;  %v2030_v40 = vunpack.c.h.bf16 %v1892_v19  ;;  %v2031_v31 = vunpack.c.l.bf16 %v1951_v32  ;;  %v9086_v32 = vmov 0  }
 0x38f   : > { %v8495_v17 = vpop.f32.mrf.mxu1  ;;  %6709 = vmatprep.subr.msk.bf16.mxu1 %vm428_vm0, %v7769_v46  ;;  %v8504_v22 = vpop.f32.mrf.mxu0  ;;  %6905 = vrot.lane.b32.xlu1 %v6904_v26, %s6934_s21 }
 0x390   : > { %6594 = vmatmul.mubr.msk.bf16.vlgmr.msra.gmra.mxu0 %vm367_vm1, %v8215_v37  ;;  %v6914_v25 = vpack.i.bf16 %v2031_v31, %v2030_v40  ;;  %6919 = vset.pattern.permute.xlu1 %v9086_v32  ;;  %v2710_v31 = vadd.f32 %v8383_v3, %v8369_v42 }
 0x391   : > { %v8502_v38 = vpop.f32.mrf.mxu1  ;;  %v3109_v5 = vpop.f32.mrf.mxu0  ;;  %6612 = vmatpush3.bf16.msra.mxu0 %v7867_v0  ;;  %6597 = vmatprep.mubr.msk.bf16.mxu0 %vm367_vm1, %v8219_v6 }
 0x392   : > { %6710 = vmatprep.subr.msk.bf16.mxu0 %vm428_vm0, %v7880_v11  ;;  %v5611_v11 = vld [vmem:[%s9048_s7] sm:$0xf] }
 0x393   : > { %v8507_v48 = vpop.f32.mrf.mxu1  ;;  %v8515_v46 = vpop.f32.mrf.mxu0  ;;  %6915 = vrot.lane.b32.xlu1 %v6914_v25, %s6934_s21  ;;  %s5925_s21 = sshll.u32 %s9194_s28, 3 }
 0x394   : > { %s325_s22 = scalar_lea.vmem %s9049_s8, %s5925_s21 }
 0x395   : > { %v8519_v39 = vpop.f32.mrf.mxu1  ;;  %6588 = vmatmul.mubr.msk.bf16.gmra.mxu1 %vm367_vm1, %v8025_v55  ;;  %v3112_v37 = vpop.f32.mrf.mxu0 }
 0x396   : > { %6603 = vmatprep.mubr.msk.bf16.mxu1 %vm367_vm1, %v8058_v28 }
 0x397   : > { %v8526_v0 = vpop.f32.mrf.mxu1  ;;  %5614 = vperm.xlu1 %6919, %v5611_v11  }
 0x398   : > { %v8534_v19 = vpop.f32.mrf.mxu0  ;;  %6598 = vmatmul.mubr.msk.bf16.gmra.mxu0 %vm367_vm1, %v8242_v21 }
 0x399   : > { %v8528_v6 = vpop.f32.mrf.mxu1  ;;  %6613 = vmatprep.mubr.msk.bf16.mxu0 %vm367_vm1, %v8105_v61 }
 0x39a   : > { %v8542_v55 = vpop.f32.mrf.mxu0 }
 0x39b   : > { %v8538_v28 = vpop.f32.mrf.mxu1 }
 0x39c   : > { %v8548_v26 = vpop.f32.mrf.mxu0 }
 0x39d   : > { %v8544_v35 = vpop.f32.mrf.mxu1  ;;  %6604 = vmatmul.mubr.msk.bf16.vlgmr.msra.gmra.mxu1 %vm367_vm1, %v8089_v62 }
 0x39e   : > { %6607 = vmatprep.mubr.msk.bf16.mxu1 %vm367_vm1, %v8093_v4  ;;  %6622 = vmatpush3.bf16.msra.mxu1 %v7895_v20  ;;  %v8555_v40 = vpop.f32.mrf.mxu0  ;;  %v2834_v20 = vadd.f32 %v8436_v59, %v2710_v31 }
 0x39f   : > { %v3211_v21 = vpop.f32.mrf.mxu1  ;;  %6711 = vmatprep.subr.msk.bf16.mxu1 %vm428_vm0, %v9115_v63 }
 0x3a0   : > { %v8561_v25 = vpop.f32.mrf.mxu0  ;;  %6614 = vmatmul.mubr.msk.bf16.vlgmr.msra.gmra.mxu0 %vm367_vm1, %v8122_v51  ;;  %v2713_v51 = vadd.f32 %v8407_v8, %v8392_v41 }
 0x3a1   : > { %v8557_v61 = vpop.f32.mrf.mxu1  ;;  %6632 = vmatpush3.bf16.msra.mxu0 %v9116_v27  ;;  %6617 = vmatprep.mubr.msk.bf16.mxu0 %vm367_vm1, %v8126_v2  ;;  %v2936_v27 = vadd.f32 %v8449_v14, %v2834_v20 }
 0x3a2   : > { %v3313_v4 = vpop.f32.mrf.mxu0  ;;  %6712 = vmatprep.subr.msk.bf16.mxu0 %vm428_vm0, %v7978_v56  ;;  %v2835_v3 = vadd.f32 %v8447_v10, %v2713_v51 }
 0x3a3   : > { %v3214_v62 = vpop.f32.mrf.mxu1  ;;  %v3038_v56 = vadd.f32 %v8495_v17, %v2936_v27 }
 0x3a4   : > { %v8578_v42 = vpop.f32.mrf.mxu0  ;;  %v2937_v8 = vadd.f32 %v8469_v44, %v2835_v3  ;;  %v9154_v3 = vld [vmem:[#allocation19_spill] sm:$0xff] }
 0x3a5   : > { %v8571_v63 = vpop.f32.mrf.mxu1  ;;  %6608 = vmatmul.mubr.msk.bf16.gmra.mxu1 %vm367_vm1, %v8114_v15  ;;  %v2718_v15 = vadd.f32 %v8371_v9, %v8363_v7  ;;  %v3140_v14 = vadd.f32 %v3109_v5, %v3038_v56  ;;  %v2721_v7 = vadd.f32 %v8394_v33, %v8381_v30 }
 0x3a6   : > { %6623 = vmatprep.mubr.msk.bf16.mxu1 %vm367_vm1, %v8256_v1  ;;  %v3316_v59 = vpop.f32.mrf.mxu0  ;;  %v3039_v10 = vadd.f32 %v8507_v48, %v2937_v8  ;;  %v9157_v8 = vld [vmem:[#allocation8_spill] sm:$0xff] }
 0x3a7   : > { %v8582_v2 = vpop.f32.mrf.mxu1  ;;  %v2836_v17 = vadd.f32 %v8430_v29, %v2718_v15  ;;  %v3242_v31 = vadd.f32 %v3211_v21, %v3140_v14  ;;  %v2837_v29 = vadd.f32 %v8443_v36, %v2721_v7  ;;  %v9158_v7 = vld [vmem:[#allocation10_spill] sm:$0xff] }
 0x3a8   : > { %v8591_v41 = vpop.f32.mrf.mxu0  ;;  %6618 = vmatmul.mubr.msk.bf16.gmra.mxu0 %vm367_vm1, %v8141_v16  ;;  %v3141_v44 = vadd.f32 %v3112_v37, %v3039_v10 }
 0x3a9   : > { %v8586_v11 = vpop.f32.mrf.mxu1  ;;  %6633 = vmatprep.mubr.msk.bf16.mxu0 %vm367_vm1, %v9129_v60  ;;  %v2938_v16 = vadd.f32 %v8445_v47, %v2836_v17  ;;  %v3344_v5 = vadd.f32 %v3313_v4, %v3242_v31  ;;  %v2939_v37 = vadd.f32 %v8461_v45, %v2837_v29 }
 0x3aa   : > { %v8601_v20 = vpop.f32.mrf.mxu0  ;;  %v3243_v30 = vadd.f32 %v3214_v62, %v3141_v44  ;;  %v9162_v44 = vld [vmem:[#allocation30_spill] sm:$0xff] }
 0x3ab   : > { %v8595_v1 = vpop.f32.mrf.mxu1  ;;  %v3040_v60 = vadd.f32 %v8487_v49, %v2938_v16  ;;  %v2729_v49 = vadd.f32 %v8434_v53, %v8420_v23 }
 0x3ac   : > { %v8608_v51 = vpop.f32.mrf.mxu0 }
 0x3ad   : > { %v6385_v9 = vpop.f32.mrf.mxu1  ;;  %6624 = vmatmul.mubr.msk.bf16.vlgmr.msra.gmra.mxu1 %vm367_vm1, %v8275_v58  ;;  %v2726_v58 = vadd.f32 %v8422_v54, %v8409_v18  ;;  %v3142_v4 = vadd.f32 %v8504_v22, %v3040_v60  ;;  %v3041_v54 = vadd.f32 %v8502_v38, %v2939_v37  ;;  %v2839_v23 = vadd.f32 %v9154_v3, %v2729_v49  ;;  %v9163_v60 = vld [vmem:[#allocation23_spill] sm:$0xff] }
 0x3ae   : > { %6627 = vmatprep.mubr.msk.bf16.mxu1 %vm367_vm1, %v8278_v57  ;;  %6642 = vmatpush3.bf16.msra.mxu1 %v9119_v43  ;;  %v8615_v21 = vpop.f32.mrf.mxu0  ;;  %v3345_v57 = vadd.f32 %v3316_v59, %v3243_v30  ;;  %v9164_v30 = vld [vmem:[#allocation14_spill] sm:$0xff]  ;;  %v9165_v37 = vld [vmem:[#allocation31_spill] sm:$0xff] }
 0x3af   : > { %v3415_v48 = vpop.f32.mrf.mxu1  ;;  %v2838_v18 = vadd.f32 %v8467_v24, %v2726_v58  ;;  %v3244_v45 = vadd.f32 %v8544_v35, %v3142_v4  ;;  %v9153_v35 = vld [vmem:[#allocation21_spill] sm:$0xff]  ;;  %v2941_v14 = vadd.f32 %v9157_v8, %v2839_v23 }
 0x3b0   : > { %v3446_v33 = vadd.f32 %v3415_v48, %v3344_v5  ;;  %v8621_v27 = vpop.f32.mrf.mxu0  ;;  %6634 = vmatmul.mubr.msk.bf16.vlgmr.msra.gmra.mxu0 %vm367_vm1, %v9136_v50  ;;  %v9166_v4 = vld [vmem:[#allocation5_spill] sm:$0xff] }
 0x3b1   : > { %v6386_v47 = vpop.f32.mrf.mxu1  ;;  %6652 = vmatpush3.bf16.msra.mxu0 %v8072_v13  ;;  %6637 = vmatprep.mubr.msk.bf16.mxu0 %vm367_vm1, %v9137_v12  ;;  %v2940_v13 = vadd.f32 %v8479_v52, %v2838_v18  ;;  %v3143_v12 = vadd.f32 %v8515_v46, %v3041_v54  ;;  %v3346_v24 = vadd.f32 %v8561_v25, %v3244_v45  ;;  %v9155_v52 = vld [vmem:[#allocation20_spill] sm:$0xff]  ;;  %v9156_v46 = vld [vmem:[#allocation7_spill] sm:$0xff]  ;;  %v9168_v54 = vld [vmem:[#allocation6_spill] sm:$0xff] }
 0x3b2   : > { %5547 = vxpose.xlu0.b32.start [1/16] (narrow) %v3446_v33, 8  ;;  %v8631_v36 = vpop.f32.mrf.mxu0  ;;  %v2734_v15 = vadd.f32 %v9156_v46, %v9155_v52  ;;  %v3043_v48 = vadd.f32 %v8538_v28, %v2941_v14  ;;  %v2737_v33 = vadd.f32 %v9164_v30, %v9163_v60  ;;  %v9176_v14 = vld [vmem:[#allocation16_spill] sm:$0xff] }
 0x3b3   : > { %v3418_v43 = vpop.f32.mrf.mxu1  ;;  %v3042_v53 = vadd.f32 %v8526_v0, %v2940_v13  ;;  %v3245_v56 = vadd.f32 %v8557_v61, %v3143_v12  ;;  %v9159_v61 = vld [vmem:[#allocation18_spill] sm:$0xff] }
 0x3b4   : > { %v3447_v22 = vadd.f32 %v3418_v43, %v3345_v57  ;;  %v8642_v38 = vpop.f32.mrf.mxu0  ;;  %v2840_v5 = vadd.f32 %v9162_v44, %v2734_v15  ;;  %v3145_v43 = vadd.f32 %v8555_v40, %v3043_v48  ;;  %v2841_v45 = vadd.f32 %v9168_v54, %v2737_v33 }
 0x3b5   : > { %v8635_v50 = vpop.f32.mrf.mxu1  ;;  %6628 = vmatmul.mubr.msk.bf16.gmra.mxu1 %vm367_vm1, %v8297_v34  ;;  %v3448_v34 = vadd.f32 %v6385_v9, %v3346_v24  ;;  %v3144_v17 = vadd.f32 %v8542_v55, %v3042_v53  ;;  %v3347_v10 = vadd.f32 %v8578_v42, %v3245_v56  ;;  %v9160_v9 = vld [vmem:[#allocation17_spill] sm:$0xff]  ;;  %v9170_v53 = vld [vmem:[#allocation24_spill] sm:$0xff]  ;;  %v9171_v56 = vld [vmem:[#allocation22_spill] sm:$0xff] }
 0x3b6   : > { %6643 = vmatprep.mubr.msk.bf16.mxu1 %vm367_vm1, %v9153_v35  ;;  %5548 = vxpose.xlu0.b32.cont [2/16] (narrow) %v3447_v22, 8  ;;  %v8649_v59 = vpop.f32.mrf.mxu0  ;;  %v9161_v16 = vpack.c.bf16 %v9159_v61, %v9160_v9  ;;  %v2942_v57 = vadd.f32 %v9166_v4, %v2840_v5  ;;  %v3247_v49 = vadd.f32 %v8595_v1, %v3145_v43  ;;  %v9173_v1 = vld [vmem:[#allocation28_spill] sm:$0xff] }
 0x3b7   : > { %v3431_v62 = vpop.f32.mrf.mxu1  ;;  %v3246_v55 = vadd.f32 %v8582_v2, %v3144_v17  ;;  %v3449_v29 = vadd.f32 %v6386_v47, %v3347_v10  ;;  %v9167_v2 = vld [vmem:[#allocation32_spill] sm:$0xff] }
 0x3b8   : > { %v8656_v31 = vpop.f32.mrf.mxu0  ;;  %6638 = vmatmul.mubr.msk.bf16.gmra.mxu0 %vm367_vm1, %v9158_v7  ;;  %v3044_v22 = vadd.f32 %v8519_v39, %v2942_v57  ;;  %v3349_v3 = vadd.f32 %v8615_v21, %v3247_v49  ;;  %v5457_v17 = vld [vmem:[#allocation4 + $0x92] sm:$0xff] }
 0x3b9   : > { %v6390_v25 = vpop.f32.mrf.mxu1  ;;  %6653 = vmatprep.mubr.msk.bf16.mxu0 %vm367_vm1, %v9161_v16  ;;  %v3348_v18 = vadd.f32 %v8601_v20, %v3246_v55  ;;  %v9169_v20 = vld [vmem:[#allocation9_spill] sm:$0xff]  ;;  %v9177_v16 = vld [vmem:[#allocation11_spill] sm:$0xff] }
 0x3ba   : > { %5549 = vxpose.xlu0.b32.cont [3/16] (narrow) %v3448_v34, 8  ;;  %v8667_v42 = vpop.f32.mrf.mxu0  ;;  %v2943_v24 = vadd.f32 %v9169_v20, %v2841_v45  ;;  %v3146_v35 = vadd.f32 %v8534_v19, %v3044_v22  ;;  %v9172_v34 = vpack.c.bf16 %v9170_v53, %v9171_v56  ;;  %v5461_v44 = vpack.c.bf16 %v5457_v17, %v9177_v16 }
 0x3bb   : > { %v3434_v0 = vpop.f32.mrf.mxu1  ;;  %v3450_v13 = vadd.f32 %v3431_v62, %v3348_v18  ;;  %v9174_v62 = vld [vmem:[#allocation26_spill] sm:$0xff] }
 0x3bc   : > { %v8678_v28 = vpop.f32.mrf.mxu0  ;;  %v9175_v52 = vpack.c.bf16 %v9173_v1, %v9174_v62  ;;  %v3045_v46 = vadd.f32 %v8528_v6, %v2943_v24  ;;  %v3248_v19 = vadd.f32 %v8571_v63, %v3146_v35  ;;  %v3451_v15 = vadd.f32 %v3434_v0, %v3349_v3 }
 0x3bd   : > { %v8671_v58 = vpop.f32.mrf.mxu1  ;;  %6644 = vmatmul.mubr.msk.bf16.vlgmr.msra.gmra.mxu1 %vm367_vm1, %v9165_v37 }
 0x3be   : > { %6647 = vmatprep.mubr.msk.bf16.mxu1 %vm367_vm1, %v9167_v2  ;;  %5550 = vxpose.xlu0.b32.cont [4/16] (narrow) %v3449_v29, 8  ;;  %v8687_v12 = vpop.f32.mrf.mxu0  ;;  %v3147_v10 = vadd.f32 %v8548_v26, %v3045_v46  ;;  %v3350_v7 = vadd.f32 %v8591_v41, %v3248_v19 }
 0x3bf   : > { %v8682_v47 = vpop.f32.mrf.mxu1 }
 0x3c0   : > { %v8694_v23 = vpop.f32.mrf.mxu0  ;;  %6654 = vmatmul.mubr.msk.bf16.vlgmr.msra.gmra.mxu0 %vm367_vm1, %v9172_v34  ;;  %v3249_v6 = vadd.f32 %v8586_v11, %v3147_v10  ;;  %v3452_v63 = vadd.f32 %v8635_v50, %v3350_v7  ;;  %v3554_v62 = vadd.f32 %v8682_v47, %v8631_v36  ;;  %v3562_v36 = vadd.f32 %v8671_v58, %v8621_v27 }
 0x3c1   : > { %v8689_v40 = vpop.f32.mrf.mxu1  ;;  %6657 = vmatprep.mubr.msk.bf16.mxu0 %vm367_vm1, %v9175_v52 }
 0x3c2   : > { %5551 = vxpose.xlu0.b32.cont [5/16] (narrow) %v3450_v13, 8  ;;  %v3642_v21 = vpop.f32.mrf.mxu0  ;;  %v3351_v48 = vadd.f32 %v8608_v51, %v3249_v6  ;;  %v3675_v32 = vadd.f32 %v8694_v23, %v3562_v36 }
 0x3c3   : > { %v3556_v39 = vpop.f32.mrf.mxu1  ;;  %v3673_v19 = vadd.f32 %v3642_v21, %v3554_v62 }
 0x3c4   : > { %v8712_v61 = vpop.f32.mrf.mxu0  ;;  %v3453_v41 = vadd.f32 %v6390_v25, %v3351_v48  ;;  %v3557_v17 = vadd.f32 %v3556_v39, %v8649_v59 }
 0x3c5   : > { %v8706_v8 = vpop.f32.mrf.mxu1  ;;  %6648 = vmatmul.mubr.msk.bf16.gmra.mxu1 %vm367_vm1, %v9176_v14 }
 0x3c6   : > { %5552 = vxpose.xlu0.b32.cont [6/16] (narrow) %v3451_v15, 8  ;;  %v3645_v0 = vpop.f32.mrf.mxu0 }
 0x3c7   : > { %v8714_v9 = vpop.f32.mrf.mxu1 }
 0x3c8   : > { %v8722_v55 = vpop.f32.mrf.mxu0  ;;  %6658 = vmatmul.mubr.msk.bf16.gmra.mxu0 %vm367_vm1, %v5461_v44 }
 0x3c9   : > { %v8719_v5 = vpop.f32.mrf.mxu1 }
 0x3ca   : > { %5553 = vxpose.xlu0.b32.cont [7/16] (narrow) %v3452_v63, 8  ;;  %v8727_v29 = vpop.f32.mrf.mxu0  ;;  %v3674_v63 = vadd.f32 %v3645_v0, %v3557_v17  ;;  %v3565_v0 = vadd.f32 %v8689_v40, %v8642_v38 }
 0x3cb   : > { %v8725_v26 = vpop.f32.mrf.mxu1 }
 0x3cc   : > { %v8729_v60 = vpop.f32.mrf.mxu0  ;;  %v3676_v27 = vadd.f32 %v8712_v61, %v3565_v0 }
 0x3cd   : > { %v6425_v11 = vpop.f32.mrf.mxu1 }
 0x3ce   : > { %5554 = vxpose.xlu0.b32.cont [8/16] (narrow) %v3453_v41, 8  ;;  %v8731_v30 = vpop.f32.mrf.mxu0 }
 0x3cf   : > { %v3715_v50 = vpop.f32.mrf.mxu1 }
 0x3d0   : > { %v6435_v37 = vpop.f32.mrf.mxu0  ;;  %v3746_v10 = vadd.f32 %v3715_v50, %v3673_v19 }
 0x3d1   : > { %v6426_v33 = vpop.f32.mrf.mxu1 }
 0x3d2   : > { %v3788_v4 = vpop.f32.mrf.mxu0 }
 0x3d3   : > { %v3718_v51 = vpop.f32.mrf.mxu1  ;;  %v3819_v16 = vadd.f32 %v3788_v4, %v3746_v10  ;;  %v3748_v4 = vadd.f32 %v6425_v11, %v3675_v32 }
 0x3d4   : > { %v6436_v43 = vpop.f32.mrf.mxu0  ;;  %v3747_v47 = vadd.f32 %v3718_v51, %v3674_v63 }
 0x3d5   : > { %v8733_v57 = vpop.f32.mrf.mxu1  ;;  %v3821_v58 = vadd.f32 %v6435_v37, %v3748_v4 }
 0x3d6   : > { %v3791_v2 = vpop.f32.mrf.mxu0 }
 0x3d7   : > { %v8735_v18 = vpop.f32.mrf.mxu1  ;;  %v3820_v59 = vadd.f32 %v3791_v2, %v3747_v47  ;;  %v3570_v2 = vadd.f32 %v8714_v9, %v8667_v42 }
 0x3d8   : > { %v8739_v54 = vpop.f32.mrf.mxu0 }
 0x3d9   : > { %v8737_v25 = vpop.f32.mrf.mxu1  ;;  %v3677_v40 = vadd.f32 %v8727_v29, %v3570_v2 }
 0x3da   : > { %v8743_v22 = vpop.f32.mrf.mxu0 }
 0x3db   : > { %v8741_v45 = vpop.f32.mrf.mxu1  ;;  %v3750_v47 = vadd.f32 %v8735_v18, %v3677_v40 }
 0x3dc   : > { %v8745_v13 = vpop.f32.mrf.mxu0 }
 0x3dd   : > { %v6445_v49 = vpop.f32.mrf.mxu1 }
 0x3de   : > { %v8747_v24 = vpop.f32.mrf.mxu0 }
 0x3df   : > { %v3885_v20 = vpop.f32.mrf.mxu1 }
 0x3e0   : > { %v6455_v3 = vpop.f32.mrf.mxu0  ;;  %v3916_v21 = vadd.f32 %v3885_v20, %v3819_v16  ;;  %v3918_v16 = vadd.f32 %v6445_v49, %v3821_v58 }
 0x3e1   : > { %v6446_v35 = vpop.f32.mrf.mxu1 }
 0x3e2   : > { %v3958_v56 = vpop.f32.mrf.mxu0 }
 0x3e3   : > { %v3888_v53 = vpop.f32.mrf.mxu1  ;;  %v3989_v39 = vadd.f32 %v3958_v56, %v3916_v21  ;;  %v3749_v56 = vadd.f32 %v6426_v33, %v3676_v27 }
 0x3e4   : > { %v6456_v1 = vpop.f32.mrf.mxu0  ;;  %v3917_v17 = vadd.f32 %v3888_v53, %v3820_v59  ;;  %v3991_v53 = vadd.f32 %v6455_v3, %v3918_v16  ;;  %v3578_v59 = vadd.f32 %v8706_v8, %v8656_v31  ;;  %v3581_v31 = vadd.f32 %v8719_v5, %v8678_v28 }
 0x3e5   : > { %v8749_v34 = vpop.f32.mrf.mxu1  ;;  %v3822_v11 = vadd.f32 %v6436_v43, %v3749_v56 }
 0x3e6   : > { %v3961_v46 = vpop.f32.mrf.mxu0 }
 0x3e7   : > { %v8753_v52 = vpop.f32.mrf.mxu1  ;;  %v3990_v51 = vadd.f32 %v3961_v46, %v3917_v17  ;;  %v3919_v21 = vadd.f32 %v6446_v35, %v3822_v11 }
 0x3e8   : > { %v8757_v14 = vpop.f32.mrf.mxu0 }
 0x3e9   : > { %v8755_v15 = vpop.f32.mrf.mxu1  ;;  %v3992_v29 = vadd.f32 %v6456_v1, %v3919_v21 }
 0x3ea   : > { %9178 = vst [vmem:[#allocation13_spill] sm:$0xff] %v8755_v15  ;;  %v3974_v6 = vpop.f32.mrf.mxu0 }
 0x3eb   : > { %v8760_v7 = vpop.f32.mrf.mxu1 }
 0x3ec   : > { %v8762_v48 = vpop.f32.mrf.mxu0 }
 0x3ed   : > { %v6465_v44 = vpop.f32.mrf.mxu1  ;;  %9179 = vst [vmem:[#allocation12_spill] sm:$0xff] %v8762_v48 }
 0x3ee   : > { %v8766_v62 = vpop.f32.mrf.mxu0  ;;  %v4064_v42 = vadd.f32 %v6465_v44, %v3991_v53 }
 0x3ef   : > { %v4031_v41 = vpop.f32.mrf.mxu1 }
 0x3f0   : > { %v6475_v19 = vpop.f32.mrf.mxu0  ;;  %v4062_v10 = vadd.f32 %v4031_v41, %v3989_v39 }
 0x3f1   : > { %v6466_v50 = vpop.f32.mrf.mxu1  ;;  %v4161_v43 = vadd.f32 %v6475_v19, %v4064_v42 }
 0x3f2   : > { %v4128_v15 = vpop.f32.mrf.mxu0  ;;  %v4065_v18 = vadd.f32 %v6466_v50, %v3992_v29 }
 0x3f3   : > { %v4034_v48 = vpop.f32.mrf.mxu1  ;;  %v4159_v20 = vadd.f32 %v4128_v15, %v4062_v10  ;;  %v3573_v15 = vadd.f32 %v8725_v26, %v8687_v12 }
 0x3f4   : > { %v6476_v23 = vpop.f32.mrf.mxu0  ;;  %v4063_v36 = vadd.f32 %v4034_v48, %v3990_v51  ;;  %v3823_v48 = vadd.f32 %v8743_v22, %v3750_v47  ;;  %v9181_v16 = vld [vmem:[#allocation12_spill] sm:$0xff] }
 0x3f5   : > { %v8772_v63 = vpop.f32.mrf.mxu1  ;;  %5555 = vxpose.xlu0.b32.cont [9/16] (narrow) %v4159_v20, 8  ;;  %v3678_v49 = vadd.f32 %v8731_v30, %v3573_v15  ;;  %v3679_v30 = vadd.f32 %v8722_v55, %v3578_v59  ;;  %v4162_v39 = vadd.f32 %v6476_v23, %v4065_v18  ;;  %v9180_v23 = vld [vmem:[#allocation13_spill] sm:$0xff] }
 0x3f6   : > { %v4131_v32 = vpop.f32.mrf.mxu0  ;;  %v3920_v26 = vadd.f32 %v8753_v52, %v3823_v48 }
 0x3f7   : > { %v4047_v38 = vpop.f32.mrf.mxu1  ;;  %v4160_v61 = vadd.f32 %v4131_v32, %v4063_v36  ;;  %v3751_v12 = vadd.f32 %v8741_v45, %v3678_v49  ;;  %v3752_v8 = vadd.f32 %v8733_v57, %v3679_v30 }
 0x3f8   : > { %v6479_v46 = vpop.f32.mrf.mxu0  ;;  %v3993_v1 = vadd.f32 %v3974_v6, %v3920_v26 }
 0x3f9   : > { %v6470_v37 = vpop.f32.mrf.mxu1  ;;  %5556 = vxpose.xlu0.b32.cont [10/16] (narrow) %v4160_v61, 8  ;;  %v3824_v22 = vadd.f32 %v8747_v24, %v3751_v12  ;;  %v3680_v24 = vadd.f32 %v8729_v60, %v3581_v31  ;;  %v3825_v6 = vadd.f32 %v8739_v54, %v3752_v8 }
 0x3fa   : > { %v4144_v33 = vpop.f32.mrf.mxu0  ;;  %v4066_v52 = vadd.f32 %v4047_v38, %v3993_v1 }
 0x3fb   : > { %v4050_v9 = vpop.f32.mrf.mxu1  ;;  %v3921_v45 = vadd.f32 %v8760_v7, %v3824_v22  ;;  %v3753_v5 = vadd.f32 %v8737_v25, %v3680_v24  ;;  %v3922_v57 = vadd.f32 %v8749_v34, %v3825_v6  ;;  %v6901_v22 = vpop.permute.xlu0 %6900 }
 0x3fc   : > { %v6480_v41 = vpop.f32.mrf.mxu0  ;;  %v4163_v17 = vadd.f32 %v4144_v33, %v4066_v52 }
 0x3fd   : > { %v8782_v3 = vpop.f32.mrf.mxu1  ;;  %5557 = vxpose.xlu0.b32.cont [11/16] (narrow) %v4161_v43, 8  ;;  %v3994_v4 = vadd.f32 %v8766_v62, %v3921_v45  ;;  %v3826_v60 = vadd.f32 %v8745_v13, %v3753_v5  ;;  %v3995_v54 = vadd.f32 %v8757_v14, %v3922_v57 }
 0x3fe   : > { %v4147_v44 = vpop.f32.mrf.mxu0 }
 0x3ff   : > { %v8788_v35 = vpop.f32.mrf.mxu1  ;;  %v4067_v7 = vadd.f32 %v4050_v9, %v3994_v4  ;;  %v3923_v2 = vadd.f32 %v9180_v23, %v3826_v60  ;;  %v4068_v25 = vadd.f32 %v8772_v63, %v3995_v54  ;;  %v6911_v52 = vpop.permute.xlu0 %6910 }
 0x400   : > { %v8794_v0 = vpop.f32.mrf.mxu0 }
 0x401   : > { %v8792_v19 = vpop.f32.mrf.mxu1  ;;  %5558 = vxpose.xlu0.b32.cont [12/16] (narrow) %v4162_v39, 8  ;;  %v4164_v62 = vadd.f32 %v4147_v44, %v4067_v7  ;;  %v3996_v36 = vadd.f32 %v9181_v16, %v3923_v2  ;;  %v4165_v38 = vadd.f32 %v6479_v46, %v4068_v25  ;;  %v6906_v44 = vpop.permute.xlu1 %6905 }
 0x402   : > { %v8802_v55 = vpop.f32.mrf.mxu0 }
 0x403   : > { %v8800_v50 = vpop.f32.mrf.mxu1  ;;  %v4069_v32 = vadd.f32 %v6470_v37, %v3996_v36 }
 0x404   : > { %v8809_v28 = vpop.f32.mrf.mxu0 }
 0x405   : > { %v8807_v10 = vpop.f32.mrf.mxu1  ;;  %5559 = vxpose.xlu0.b32.cont [13/16] (narrow) %v4163_v17, 8  ;;  %v4166_v53 = vadd.f32 %v6480_v41, %v4069_v32  ;;  %v6916_v8 = vpop.permute.xlu1 %6915 }
 0x406   : > { %v8815_v58 = vpop.f32.mrf.mxu0 }
 0x407   : > { %v8813_v27 = vpop.f32.mrf.mxu1 }
 0x408   : > { %v8821_v20 = vpop.f32.mrf.mxu0 }
 0x409   : > { %v8819_v51 = vpop.f32.mrf.mxu1  ;;  %5560 = vxpose.xlu0.b32.cont [14/16] (narrow) %v4164_v62, 8  ;;  %v4267_v62 = vadd.f32 %v8802_v55, %v8788_v35  ;;  %v4275_v35 = vadd.f32 %v8794_v0, %v8782_v3 }
 0x40a   : > { %v8827_v56 = vpop.f32.mrf.mxu0 }
 0x40b   : > { %v8825_v34 = vpop.f32.mrf.mxu1 }
 0x40c   : > { %v8832_v14 = vpop.f32.mrf.mxu0 }
 0x40d   : > { %v8830_v13 = vpop.f32.mrf.mxu1  ;;  %5561 = vxpose.xlu0.b32.cont [15/16] (narrow) %v4165_v38, 8  ;;  %v4270_v38 = vadd.f32 %v8815_v58, %v8800_v50 }
 0x40e   : > { %v8834_v11 = vpop.f32.mrf.mxu0  ;;  %v4364_v50 = vadd.f32 %v8830_v13, %v4275_v35 }
 0x40f   : > { %v4331_v40 = vpop.f32.mrf.mxu1 }
 0x410   : > { %v8838_v63 = vpop.f32.mrf.mxu0  ;;  %v4362_v25 = vadd.f32 %v4331_v40, %v4267_v62 }
 0x411   : > { %v8836_v61 = vpop.f32.mrf.mxu1  ;;  %5562 = vxpose.xlu0.b32.end [16/16] (narrow) %v4166_v53, 8 }
 0x412   : > { %v4404_v47 = vpop.f32.mrf.mxu0 }
 0x413   : > { %v4334_v15 = vpop.f32.mrf.mxu1  ;;  %v4435_v32 = vadd.f32 %v4404_v47, %v4362_v25 }
 0x414   : > { %v8842_v46 = vpop.f32.mrf.mxu0  ;;  %v4363_v22 = vadd.f32 %v4334_v15, %v4270_v38  ;;  %v4437_v38 = vadd.f32 %v8838_v63, %v4364_v50 }
 0x415   : > { %v8840_v21 = vpop.f32.mrf.mxu1 }
 0x416   : > { %v4407_v9 = vpop.f32.mrf.mxu0 }
 0x417   : > { %v8844_v42 = vpop.f32.mrf.mxu1  ;;  %v4436_v55 = vadd.f32 %v4407_v9, %v4363_v22 }
 0x418   : > { %v8848_v33 = vpop.f32.mrf.mxu0 }
 0x419   : > { %v8846_v37 = vpop.f32.mrf.mxu1 }
 0x41a   : > { %v8852_v48 = vpop.f32.mrf.mxu0 }
 0x41b   : > { %v8850_v49 = vpop.f32.mrf.mxu1 }
 0x41c   : > { %v8854_v43 = vpop.f32.mrf.mxu0 }
 0x41d   : > { %v6525_v29 = vpop.f32.mrf.mxu1 }
 0x41e   : > { %v8856_v59 = vpop.f32.mrf.mxu0  ;;  %v4510_v22 = vadd.f32 %v6525_v29, %v4437_v38 }
 0x41f   : > { %v4477_v41 = vpop.f32.mrf.mxu1 }
 0x420   : > { %v6535_v26 = vpop.f32.mrf.mxu0  ;;  %v4508_v8 = vadd.f32 %v4477_v41, %v4435_v32  ;;  %v4278_v41 = vadd.f32 %v8809_v28, %v8792_v19 }
 0x421   : > { %v8858_v12 = vpop.f32.mrf.mxu1  ;;  %v4583_v19 = vadd.f32 %v6535_v26, %v4510_v22 }
 0x422   : > { %v4550_v30 = vpop.f32.mrf.mxu0  ;;  %v4365_v32 = vadd.f32 %v8836_v61, %v4278_v41 }
 0x423   : > { %v4480_v18 = vpop.f32.mrf.mxu1  ;;  %v4581_v40 = vadd.f32 %v4550_v30, %v4508_v8 }
 0x424   : > { %v8862_v39 = vpop.f32.mrf.mxu0  ;;  %v4509_v58 = vadd.f32 %v4480_v18, %v4436_v55  ;;  %v4438_v35 = vadd.f32 %v8842_v46, %v4365_v32 }
 0x425   : > { %v8860_v1 = vpop.f32.mrf.mxu1 }
 0x426   : > { %v4553_v45 = vpop.f32.mrf.mxu0  ;;  %v4511_v61 = vadd.f32 %v8858_v12, %v4438_v35 }
 0x427   : > { %v8864_v31 = vpop.f32.mrf.mxu1  ;;  %v4582_v3 = vadd.f32 %v4553_v45, %v4509_v58 }
 0x428   : > { %v8868_v6 = vpop.f32.mrf.mxu0  ;;  %v4584_v46 = vadd.f32 %v8862_v39, %v4511_v61 }
 0x429   : > { %v8866_v24 = vpop.f32.mrf.mxu1 }
 0x42a   : > { %9182 = vst [vmem:[#allocation25_spill] sm:$0xff] %v8866_v24  ;;  %v8872_v17 = vpop.f32.mrf.mxu0  ;;  %v9185_v24 = vmov 0  }
 0x42b   : > { %v8870_v4 = vpop.f32.mrf.mxu1 }
 0x42c   : > { %v8874_v57 = vpop.f32.mrf.mxu0 }
 0x42d   : > { %v6545_v5 = vpop.f32.mrf.mxu1  ;;  %9183 = vst [vmem:[#allocation29_spill] sm:$0xff] %v8874_v57 }
 0x42e   : > { %v8876_v60 = vpop.f32.mrf.mxu0  ;;  %v4681_v29 = vadd.f32 %v6545_v5, %v4583_v19 }
 0x42f   : > { %v4648_v7 = vpop.f32.mrf.mxu1 }
 0x430   : > { %v6555_v23 = vpop.f32.mrf.mxu0  ;;  %v4679_v47 = vadd.f32 %v4648_v7, %v4581_v40 }
 0x431   : > { %v6546_v54 = vpop.f32.mrf.mxu1  ;;  %v4779_v26 = vadd.f32 %v6555_v23, %v4681_v29 }
 0x432   : > { %v4746_v16 = vpop.f32.mrf.mxu0  ;;  %v4682_v5 = vadd.f32 %v6546_v54, %v4584_v46 }
 0x433   : > { %v4651_v2 = vpop.f32.mrf.mxu1  ;;  %v4777_v0 = vadd.f32 %v4746_v16, %v4679_v47 }
 0x434   : > { %v6556_v53 = vpop.f32.mrf.mxu0  ;;  %v4680_v13 = vadd.f32 %v4651_v2, %v4582_v3  ;;  %v9188_v19 = vld [vmem:[#allocation29_spill] sm:$0xff] }
 0x435   : > { %v8880_v36 = vpop.f32.mrf.mxu1  ;;  %v4780_v39 = vadd.f32 %v6556_v53, %v4682_v5 }
 0x436   : > { %9184 = vst [vmem:[#allocation15_spill] sm:$0xff] %v8880_v36  ;;  %v4749_v52 = vpop.f32.mrf.mxu0 }
 0x437   : > { %v8884_v44 = vpop.f32.mrf.mxu1  ;;  %v4778_v28 = vadd.f32 %v4749_v52, %v4680_v13 }
 0x438   : > { %v8890_v62 = vpop.f32.mrf.mxu0 }
 0x439   : > { %v8886_v57 = vpop.f32.mrf.mxu1 }
 0x43a   : > { %v4762_v25 = vpop.f32.mrf.mxu0  ;;  %6920 = vset.pattern.permute.xlu0 %v9185_v24  ;;  %v4283_v24 = vadd.f32 %v8827_v56, %v8813_v27  ;;  %v4286_v27 = vadd.f32 %v8834_v11, %v8825_v34  ;;  %v4291_v34 = vadd.f32 %v8821_v20, %v8807_v10  ;;  %v4294_v10 = vadd.f32 %v8832_v14, %v8819_v51 }
 0x43b   : > { %v8892_v36 = vpop.f32.mrf.mxu1 }
 0x43c   : > { %v8899_v9 = vpop.f32.mrf.mxu0  ;;  %v4366_v16 = vadd.f32 %v8844_v42, %v4283_v24  ;;  %v4367_v42 = vadd.f32 %v8850_v49, %v4286_v27  ;;  %v4368_v49 = vadd.f32 %v8840_v21, %v4291_v34 }
 0x43d   : > { %v6565_v15 = vpop.f32.mrf.mxu1 }
 0x43e   : > { %v4765_v7 = vpop.f32.mrf.mxu0  ;;  %v4439_v56 = vadd.f32 %v8852_v48, %v4366_v16  ;;  %v4876_v58 = vadd.f32 %v6565_v15, %v4779_v26  ;;  %v4440_v11 = vadd.f32 %v8856_v59, %v4367_v42  ;;  %v4441_v20 = vadd.f32 %v8848_v33, %v4368_v49 }
 0x43f   : > { %v4843_v30 = vpop.f32.mrf.mxu1 }
 0x440   : > { %v4874_v18 = vadd.f32 %v4843_v30, %v4777_v0  ;;  %v8905_v63 = vpop.f32.mrf.mxu0  ;;  %v4512_v12 = vadd.f32 %v8864_v31, %v4439_v56  ;;  %v4513_v31 = vadd.f32 %v8870_v4, %v4440_v11  ;;  %v4369_v4 = vadd.f32 %v8846_v37, %v4294_v10 }
 0x441   : > { %v6566_v8 = vpop.f32.mrf.mxu1 }
 0x442   : > { %5579 = vxpose.xlu1.b32.start [1/16] (narrow) %v4874_v18, 8  ;;  %v8909_v55 = vpop.f32.mrf.mxu0  ;;  %v4585_v48 = vadd.f32 %v8872_v17, %v4512_v12  ;;  %v4877_v15 = vadd.f32 %v6566_v8, %v4780_v39  ;;  %v4586_v59 = vadd.f32 %v8876_v60, %v4513_v31  ;;  %v4442_v51 = vadd.f32 %v8854_v43, %v4369_v4  ;;  %v9186_v18 = vld [vmem:[#allocation25_spill] sm:$0xff]  ;;  %v9187_v8 = vld [vmem:[#allocation15_spill] sm:$0xff] }
 0x443   : > { %v4846_v45 = vpop.f32.mrf.mxu1 }
 0x444   : > { %v4875_v2 = vadd.f32 %v4846_v45, %v4778_v28  ;;  %v8915_v52 = vpop.f32.mrf.mxu0  ;;  %v4683_v54 = vadd.f32 %v8884_v44, %v4585_v48  ;;  %v4514_v44 = vadd.f32 %v8860_v1, %v4441_v20  ;;  %v4684_v30 = vadd.f32 %v8892_v36, %v4586_v59 }
 0x445   : > { %v6569_v40 = vpop.f32.mrf.mxu1  ;;  %v4515_v37 = vadd.f32 %v9186_v18, %v4442_v51 }
 0x446   : > { %5580 = vxpose.xlu1.b32.cont [2/16] (narrow) %v4875_v2, 8  ;;  %v8919_v47 = vpop.f32.mrf.mxu0  ;;  %v4781_v17 = vadd.f32 %v4762_v25, %v4683_v54  ;;  %v4587_v14 = vadd.f32 %v8868_v6, %v4514_v44  ;;  %v4782_v33 = vadd.f32 %v4765_v7, %v4684_v30 }
 0x447   : > { %v4859_v50 = vpop.f32.mrf.mxu1  ;;  %v4588_v28 = vadd.f32 %v9188_v19, %v4515_v37 }
 0x448   : > { %v8925_v23 = vpop.f32.mrf.mxu0  ;;  %v4878_v32 = vadd.f32 %v4859_v50, %v4781_v17  ;;  %v4685_v1 = vadd.f32 %v9187_v8, %v4587_v14 }
 0x449   : > { %v6570_v41 = vpop.f32.mrf.mxu1  ;;  %v4686_v7 = vadd.f32 %v8886_v57, %v4588_v28 }
 0x44a   : > { %5581 = vxpose.xlu1.b32.cont [3/16] (narrow) %v4876_v58, 8  ;;  %v8930_v3 = vpop.f32.mrf.mxu0  ;;  %v4783_v45 = vadd.f32 %v8890_v62, %v4685_v1 }
 0x44b   : > { %v4862_v38 = vpop.f32.mrf.mxu1  ;;  %v4784_v2 = vadd.f32 %v8899_v9, %v4686_v7 }
 0x44c   : > { %v8938_v53 = vpop.f32.mrf.mxu0  ;;  %v4879_v24 = vadd.f32 %v4862_v38, %v4782_v33  ;;  %v4880_v16 = vadd.f32 %v6569_v40, %v4783_v45 }
 0x44d   : > { %v8932_v0 = vpop.f32.mrf.mxu1  ;;  %v4881_v46 = vadd.f32 %v6570_v41, %v4784_v2 }
 0x44e   : > { %5582 = vxpose.xlu1.b32.cont [4/16] (narrow) %v4877_v15, 8  ;;  %v8943_v22 = vpop.f32.mrf.mxu0 }
 0x44f   : > { %v4981_v21 = vpop.f32.mrf.mxu1 }
 0x450   : > { %v8949_v60 = vpop.f32.mrf.mxu0 }
 0x451   : > { %v8945_v13 = vpop.f32.mrf.mxu1 }
 0x452   : > { %5583 = vxpose.xlu1.b32.cont [5/16] (narrow) %v4878_v32, 8  ;;  %v5046_v36 = vpop.f32.mrf.mxu0  ;;  %v4982_v32 = vadd.f32 %v4981_v21, %v8909_v55  ;;  %v4990_v55 = vadd.f32 %v8932_v0, %v8905_v63 }
 0x453   : > { %v4984_v25 = vpop.f32.mrf.mxu1 }
 0x454   : > { %v8957_v43 = vpop.f32.mrf.mxu0  ;;  %v5077_v33 = vadd.f32 %v5046_v36, %v4982_v32  ;;  %v4985_v8 = vadd.f32 %v4984_v25, %v8919_v47  ;;  %v5079_v32 = vadd.f32 %v8949_v60, %v4990_v55 }
 0x455   : > { %v8953_v35 = vpop.f32.mrf.mxu1 }
 0x456   : > { %5584 = vxpose.xlu1.b32.cont [6/16] (narrow) %v4879_v24, 8  ;;  %v5049_v61 = vpop.f32.mrf.mxu0 }
 0x457   : > { %v8959_v6 = vpop.f32.mrf.mxu1  ;;  %v5078_v28 = vadd.f32 %v5049_v61, %v4985_v8  ;;  %v4993_v61 = vadd.f32 %v8945_v13, %v8915_v52 }
 0x458   : > { %v8965_v27 = vpop.f32.mrf.mxu0  ;;  %v4998_v60 = vadd.f32 %v8959_v6, %v8930_v3 }
 0x459   : > { %v8962_v29 = vpop.f32.mrf.mxu1  ;;  %v5080_v63 = vadd.f32 %v8957_v43, %v4993_v61 }
 0x45a   : > { %5585 = vxpose.xlu1.b32.cont [7/16] (narrow) %v4880_v16, 8  ;;  %v8969_v62 = vpop.f32.mrf.mxu0 }
 0x45b   : > { %v8967_v56 = vpop.f32.mrf.mxu1  ;;  %v5081_v13 = vadd.f32 %v8969_v62, %v4998_v60 }
 0x45c   : > { %v8971_v50 = vpop.f32.mrf.mxu0  ;;  %v5001_v43 = vadd.f32 %v8967_v56, %v8943_v22 }
 0x45d   : > { %v6605_v26 = vpop.f32.mrf.mxu1 }
 0x45e   : > { %5586 = vxpose.xlu1.b32.cont [8/16] (narrow) %v4881_v46, 8  ;;  %v8973_v57 = vpop.f32.mrf.mxu0 }
 0x45f   : > { %v5119_v42 = vpop.f32.mrf.mxu1  ;;  %v5082_v6 = vadd.f32 %v8973_v57, %v5001_v43 }
 0x460   : > { %v6615_v12 = vpop.f32.mrf.mxu0  ;;  %v5150_v1 = vadd.f32 %v5119_v42, %v5077_v33 }
 0x461   : > { %v6606_v40 = vpop.f32.mrf.mxu1 }
 0x462   : > { %v5192_v58 = vpop.f32.mrf.mxu0 }
 0x463   : > { %v5122_v5 = vpop.f32.mrf.mxu1  ;;  %v5223_v45 = vadd.f32 %v5192_v58, %v5150_v1  ;;  %v5152_v58 = vadd.f32 %v6605_v26, %v5079_v32 }
 0x464   : > { %v6616_v34 = vpop.f32.mrf.mxu0  ;;  %v5151_v21 = vadd.f32 %v5122_v5, %v5078_v28 }
 0x465   : > { %v8975_v9 = vpop.f32.mrf.mxu1  ;;  %v5225_v0 = vadd.f32 %v6615_v12, %v5152_v58 }
 0x466   : > { %v5195_v48 = vpop.f32.mrf.mxu0 }
 0x467   : > { %v8977_v11 = vpop.f32.mrf.mxu1 }
 0x468   : > { %v8981_v39 = vpop.f32.mrf.mxu0  ;;  %v5154_v12 = vadd.f32 %v8977_v11, %v5081_v13 }
 0x469   : > { %v8979_v41 = vpop.f32.mrf.mxu1 }
 0x46a   : > { %v8985_v49 = vpop.f32.mrf.mxu0 }
 0x46b   : > { %v8983_v38 = vpop.f32.mrf.mxu1 }
 0x46c   : > { %v8987_v54 = vpop.f32.mrf.mxu0 }
 0x46d   : > { %v6625_v31 = vpop.f32.mrf.mxu1 }
 0x46e   : > { %v8989_v10 = vpop.f32.mrf.mxu0 }
 0x46f   : > { %v5265_v15 = vpop.f32.mrf.mxu1 }
 0x470   : > { %v6635_v59 = vpop.f32.mrf.mxu0  ;;  %v5296_v36 = vadd.f32 %v5265_v15, %v5223_v45 }
 0x471   : > { %v6626_v20 = vpop.f32.mrf.mxu1 }
 0x472   : > { %v5338_v4 = vpop.f32.mrf.mxu0 }
 0x473   : > { %v5268_v17 = vpop.f32.mrf.mxu1  ;;  %v5369_v47 = vadd.f32 %v5338_v4, %v5296_v36  ;;  %v5298_v4 = vadd.f32 %v6625_v31, %v5225_v0 }
 0x474   : > { %v6636_v30 = vpop.f32.mrf.mxu0 }
 0x475   : > { %v8991_v44 = vpop.f32.mrf.mxu1 }
 0x476   : > { %v5341_v14 = vpop.f32.mrf.mxu0 }
 0x477   : > { %v5281_v51 = vpop.f32.mrf.mxu1 }
 0x478   : > { %v8996_v37 = vpop.f32.mrf.mxu0 }
 0x479   : > { %v8994_v18 = vpop.f32.mrf.mxu1 }
 0x47a   : > { %9189 = vst [vmem:[#allocation27_spill] sm:$0xff] %v8994_v18  ;;  %v5354_v19 = vpop.f32.mrf.mxu0  ;;  %v5224_v18 = vadd.f32 %v5195_v48, %v5151_v21  ;;  %v5153_v48 = vadd.f32 %v6606_v40, %v5080_v63  ;;  %v5227_v40 = vadd.f32 %v8985_v49, %v5154_v12  ;;  %v5009_v49 = vadd.f32 %v8962_v29, %v8938_v53 }
 0x47b   : > { %v8999_v24 = vpop.f32.mrf.mxu1 }
 0x47c   : > { %v9001_v16 = vpop.f32.mrf.mxu0  ;;  %v5297_v33 = vadd.f32 %v5268_v17, %v5224_v18  ;;  %v5226_v26 = vadd.f32 %v6616_v34, %v5153_v48  ;;  %v5371_v17 = vadd.f32 %v6635_v59, %v5298_v4  ;;  %v5006_v34 = vadd.f32 %v8953_v35, %v8925_v23 }
 0x47d   : > { %v6645_v7 = vpop.f32.mrf.mxu1  ;;  %9190 = vst [vmem:[#allocation21_spill] sm:$0xff] %v9001_v16  ;;  %v5155_v59 = vadd.f32 %v8983_v38, %v5082_v6 }
 0x47e   : > { %v5357_v46 = vpop.f32.mrf.mxu0  ;;  %v5370_v5 = vadd.f32 %v5341_v14, %v5297_v33  ;;  %v5299_v14 = vadd.f32 %v6626_v20, %v5226_v26  ;;  %v5083_v11 = vadd.f32 %v8965_v27, %v5006_v34 }
 0x47f   : > { %v5411_v2 = vpop.f32.mrf.mxu1  ;;  %v5228_v20 = vadd.f32 %v8989_v10, %v5155_v59 }
 0x480   : > { %v6655_v42 = vpop.f32.mrf.mxu0  ;;  %v5442_v8 = vadd.f32 %v5411_v2, %v5369_v47  ;;  %v5372_v31 = vadd.f32 %v6636_v30, %v5299_v14  ;;  %v5300_v2 = vadd.f32 %v5281_v51, %v5227_v40  ;;  %v5156_v30 = vadd.f32 %v8975_v9, %v5083_v11 }
 0x481   : > { %v6646_v25 = vpop.f32.mrf.mxu1  ;;  %v5301_v23 = vadd.f32 %v8999_v24, %v5228_v20  ;;  %v5084_v51 = vadd.f32 %v8971_v50, %v5009_v49  ;;  %v9191_v24 = vld [vmem:[#allocation27_spill] sm:$0xff] }
 0x482   : > { %v5508_v16 = vpop.f32.mrf.mxu0  ;;  %v5445_v22 = vadd.f32 %v6646_v25, %v5372_v31  ;;  %v5229_v47 = vadd.f32 %v8981_v39, %v5156_v30 }
 0x483   : > { %v5414_v1 = vpop.f32.mrf.mxu1  ;;  %v5539_v15 = vadd.f32 %v5508_v16, %v5442_v8  ;;  %v5444_v16 = vadd.f32 %v6645_v7, %v5371_v17  ;;  %v5373_v7 = vadd.f32 %v5354_v19, %v5300_v2  ;;  %v5374_v27 = vadd.f32 %v5357_v46, %v5301_v23 }
 0x484   : > { %v6656_v28 = vpop.f32.mrf.mxu0  ;;  %v5443_v45 = vadd.f32 %v5414_v1, %v5370_v5  ;;  %v5157_v19 = vadd.f32 %v8979_v41, %v5084_v51  ;;  %v9192_v39 = vld [vmem:[#allocation21_spill] sm:$0xff]  ;;  %v5563_v1 = vpop.trf.xlu0 }
 0x485   : > { %5587 = vxpose.xlu1.b32.cont [9/16] (narrow) %v5539_v15, 8  ;;  %v6649_v55 = vpop.f32.mrf.mxu1  ;;  %v5541_v36 = vadd.f32 %v6655_v42, %v5444_v16  ;;  %v5542_v57 = vadd.f32 %v6656_v28, %v5445_v22  ;;  %v5302_v42 = vadd.f32 %v8991_v44, %v5229_v47  ;;  %v5615_v44 = vpop.permute.xlu1 %5614 }
 0x486   : > { %v5511_v52 = vpop.f32.mrf.mxu0  ;;  %v5230_v53 = vadd.f32 %v8987_v54, %v5157_v19  ;;  %v5617_v63 = vadd.f32 %v5615_v44, %v5563_v1 }
 0x487   : > { %v5540_v18 = vadd.f32 %v5511_v52, %v5443_v45  ;;  %v5427_v3 = vpop.f32.mrf.mxu1  ;;  %v5375_v29 = vadd.f32 %v8996_v37, %v5302_v42 }
 0x488   : > { %v6659_v21 = vpop.f32.mrf.mxu0  ;;  %v5446_v35 = vadd.f32 %v5427_v3, %v5373_v7  ;;  %v5303_v58 = vadd.f32 %v9191_v24, %v5230_v53  ;;  %v5621_v54 = vmul.f32 0.01, %v5617_v63  ;;  %vm5619_vm0 = vcmp.gt.f32.partialorder %v5617_v63, 0.0 }
 0x489   : > { %5588 = vxpose.xlu1.b32.cont [10/16] (narrow) %v5540_v18, 8  ;;  %v6650_v56 = vpop.f32.mrf.mxu1  ;;  %v5448_v50 = vadd.f32 %v6649_v55, %v5375_v29 }
 0x48a   : > { %v5524_v62 = vpop.f32.mrf.mxu0  ;;  %v5376_v46 = vadd.f32 %v9192_v39, %v5303_v58  ;;  %v5623_v15 = vsel %vm5619_vm0, %v5617_v63, %v5621_v54 }
 0x48b   : > { %v5430_v38 = vpop.f32.mrf.mxu1  ;;  %v5543_v25 = vadd.f32 %v5524_v62, %v5446_v35  ;;  %v5545_v33 = vadd.f32 %v6659_v21, %v5448_v50 }
 0x48c   : > { %v6660_v32 = vpop.f32.mrf.mxu0  ;;  %v5447_v61 = vadd.f32 %v5430_v38, %v5374_v27  ;;  %v5449_v8 = vadd.f32 %v6650_v56, %v5376_v46 }
 0x48d   : > { %5589 = vxpose.xlu1.b32.cont [11/16] (narrow) %v5541_v36, 8 }
 0x48e   : > { %v5527_v10 = vpop.f32.mrf.mxu0  ;;  %v5546_v41 = vadd.f32 %v6660_v32, %v5449_v8 }
 0x48f   : > { %v5544_v9 = vadd.f32 %v5527_v10, %v5447_v61 }
 0x491   : > { %5590 = vxpose.xlu1.b32.cont [12/16] (narrow) %v5542_v57, 8 }
 0x495   : > { %5591 = vxpose.xlu1.b32.cont [13/16] (narrow) %v5543_v25, 8 }
 0x499   : > { %5592 = vxpose.xlu1.b32.cont [14/16] (narrow) %v5544_v9, 8 }
 0x49d   : > { %5593 = vxpose.xlu1.b32.cont [15/16] (narrow) %v5545_v33, 8 }
 0x4a1   : > { %5594 = vxpose.xlu1.b32.end [16/16] (narrow) %v5546_v41, 8 }
 0x4e1   : > { %v5595_v0 = vpop.trf.xlu1 }
 0x4e2   : > { %v5618_v5 = vadd.f32 %v5615_v44, %v5595_v0 }
 0x4e4   : > { %vm5620_vm1 = vcmp.gt.f32.partialorder %v5618_v5, 0.0  ;;  %v5622_v37 = vmul.f32 0.01, %v5618_v5 }
 0x4e6   : > { %v5624_v28 = vsel %vm5620_vm1, %v5618_v5, %v5622_v37 }
 0x4e7   : > { %v5627_v60 = vcombine.low %v5623_v15, %v5624_v28 }
 0x4e9   : > { %5629 = vst [vmem:[%s325_s22] sm:$0xff] %v5627_v60 }
 0x4ea PF: > { %s18_s27 = sadd.s32 1, %s6931_s27  }
 0x4eb   : > { %p15_p4 = scmp.ge.s32.totalorder %s18_s27, 4  }
 0x4ed   :  { %17 = sbr.rel (!%p15_p4) target bundleno = 1 (0x1), region = 116 }

</bundles_post_ra>
